<compile_context>
chip_gen: v7x
topology: tpu7x:2x2x1
jax: 0.10.0
libtpu: 0.0.40
codegen_flags: <defaults>
</compile_context>

<pallas_src>
import jax
import jax.numpy as jnp
from jax import lax
from jax.experimental import pallas as pl
from jax.experimental.pallas import tpu as pltpu


def _round_up(x, m):
    return (x + m - 1) // m * m


# ----------------------------------------------------------------------------
# Pallas kernels
# ----------------------------------------------------------------------------
def _gemm_kernel(a_ref, w_ref, o_ref):
    # Plain GEMM: bf16 operands on the MXU, f32 accumulate/output.
    o_ref[...] = jnp.dot(a_ref[...].astype(jnp.bfloat16), w_ref[...],
                         preferred_element_type=jnp.float32)


def _bn_relu_gemm_kernel(a_ref, s_ref, c_ref, w_ref, o_ref):
    # Fused BatchNorm-apply + ReLU on the A tile (per-K-column scale/bias, f32),
    # then bf16 MXU GEMM with f32 output.
    a = jnp.maximum(a_ref[...] * s_ref[...] + c_ref[...], 0.0)
    o_ref[...] = jnp.dot(a.astype(jnp.bfloat16), w_ref[...],
                         preferred_element_type=jnp.float32)


def _tanh_kernel(x_ref, o_ref):
    o_ref[...] = jnp.tanh(x_ref[...])


# ----------------------------------------------------------------------------
# GEMM wrapper: single K step, full-extent blocks where possible, no padding
# except sublane-rounding of K (exact: zero rows/cols contribute nothing).
# ----------------------------------------------------------------------------
def pallas_gemm(a, w, scale=None, bias=None):
    """out = (relu(a*scale + bias) if scale is given else a) @ w.

    a: (M, K) f32, w: (K, N) bf16, scale/bias: (1, K) f32 (per input channel).
    """
    M, K = a.shape
    Kw, N = w.shape
    assert K == Kw

    # K: single full-extent step; round up to a sublane multiple (cheap, exact).
    Kp = _round_up(K, 8)
    if Kp != K:
        a = jnp.pad(a, ((0, 0), (0, Kp - K)))
        w = jnp.pad(w, ((0, Kp - K), (0, 0)))
        if scale is not None:
            scale = jnp.pad(scale, ((0, 0), (0, Kp - K)))
            bias = jnp.pad(bias, ((0, 0), (0, Kp - K)))

    # M tiling: one full-extent block when small, 256-row blocks otherwise
    # (bigger tiles amortize per-step overhead; worst case per-step VMEM here
    # is ~3.5 MiB double-buffered, comfortably under the default limit).
    if M <= 512:
        tm, Mp = M, M
    else:
        tm = 256
        Mp = _round_up(M, tm)
        if Mp != M:
            a = jnp.pad(a, ((0, Mp - M), (0, 0)))

    # N tiling: a few lane-dense blocks (>=2 where N allows, for dual-TC chips).
    if N >= 2048 and N % 1024 == 0:
        tn = 1024
    elif N >= 1024 and N % 512 == 0:
        tn = 512
    else:
        tn = N

    grid = (Mp // tm, N // tn)

    if scale is None:
        kernel = _gemm_kernel
        in_specs = [
            pl.BlockSpec((tm, Kp), lambda i, j: (i, 0)),
            pl.BlockSpec((Kp, tn), lambda i, j: (0, j)),
        ]
        args = (a, w)
    else:
        kernel = _bn_relu_gemm_kernel
        in_specs = [
            pl.BlockSpec((tm, Kp), lambda i, j: (i, 0)),
            pl.BlockSpec((1, Kp), lambda i, j: (0, 0)),
            pl.BlockSpec((1, Kp), lambda i, j: (0, 0)),
            pl.BlockSpec((Kp, tn), lambda i, j: (0, j)),
        ]
        args = (a, scale, bias, w)

    out = pl.pallas_call(
        kernel,
        out_shape=jax.ShapeDtypeStruct((Mp, N), jnp.float32),
        grid_spec=pltpu.PrefetchScalarGridSpec(
            num_scalar_prefetch=0,
            grid=grid,
            in_specs=in_specs,
            out_specs=pl.BlockSpec((tm, tn), lambda i, j: (i, j)),
        ),
        compiler_params=pltpu.CompilerParams(
            dimension_semantics=("parallel", "parallel")),
    )(*args)
    return out[:M] if Mp != M else out


def pallas_tanh_2d(x2d):
    """Elementwise tanh on a lane-dense (M, N) f32 slab (N multiple of 128)."""
    M, N = x2d.shape
    if M <= 512:
        tm, Mp = M, M
    else:
        tm = 256
        Mp = _round_up(M, tm)
        if Mp != M:
            x2d = jnp.pad(x2d, ((0, Mp - M), (0, 0)))

    out = pl.pallas_call(
        _tanh_kernel,
        out_shape=jax.ShapeDtypeStruct((Mp, N), jnp.float32),
        grid_spec=pltpu.PrefetchScalarGridSpec(
            num_scalar_prefetch=0,
            grid=(Mp // tm,),
            in_specs=[pl.BlockSpec((tm, N), lambda i: (i, 0))],
            out_specs=pl.BlockSpec((tm, N), lambda i: (i, 0)),
        ),
        compiler_params=pltpu.CompilerParams(
            dimension_semantics=("parallel",)),
    )(x2d)
    return out[:M] if Mp != M else out


# ----------------------------------------------------------------------------
# ConvTranspose2d(k=4, s=2, p=1) glue: per-tap GEMM output -> overlap-add.
#   y[oh, ow] = sum over (ih, kh), (iw, kw) with oh = 2*ih + kh - 1, etc.
#   Even output rows use kernel rows (1, 3); odd rows use (2, 0). Same for cols.
# ----------------------------------------------------------------------------
def _overlap_add_stride2(t):
    """t: (B, H, W, 4(kh), 4(kw), C) per-tap contributions -> (B, 2H, 2W, C)."""
    B, H, W, _, _, C = t.shape
    zr = jnp.zeros((B, 1, W, 4, C), t.dtype)
    r_even = t[:, :, :, 1] + jnp.concatenate([zr, t[:, :H - 1, :, 3]], axis=1)
    r_odd = t[:, :, :, 2] + jnp.concatenate([t[:, 1:, :, 0], zr], axis=1)

    zc = jnp.zeros((B, H, 1, C), t.dtype)

    def cols(x):  # x: (B, H, W, 4(kw), C)
        c_even = x[:, :, :, 1] + jnp.concatenate([zc, x[:, :, :W - 1, 3]], axis=2)
        c_odd = x[:, :, :, 2] + jnp.concatenate([x[:, :, 1:, 0], zc], axis=2)
        return c_even, c_odd

    y00, y01 = cols(r_even)
    y10, y11 = cols(r_odd)
    y = jnp.stack([jnp.stack([y00, y01], axis=3),
                   jnp.stack([y10, y11], axis=3)], axis=2)  # (B, H, 2, W, 2, C)
    return y.reshape(B, 2 * H, 2 * W, C)


def _bn_scale_bias(y_nhwc, gamma, beta, eps=1e-5):
    """Training-mode BatchNorm2d (mini-batch mean, biased variance) -> per-channel
    scale/bias, consumed by the next GEMM's fused A-path.  Single pass over y."""
    n = y_nhwc.shape[0] * y_nhwc.shape[1] * y_nhwc.shape[2]
    s1 = jnp.sum(y_nhwc, axis=(0, 1, 2))
    s2 = jnp.sum(y_nhwc * y_nhwc, axis=(0, 1, 2))
    mean = s1 / n
    var = jnp.maximum(s2 / n - mean * mean, 0.0)
    scale = gamma * lax.rsqrt(var + eps)
    bias = beta - mean * scale
    return scale.reshape(1, -1), bias.reshape(1, -1)


def _w_to_mat(w):
    """PyTorch ConvTranspose2d weight (Cin, Cout, 4, 4) -> (Cin, 16*Cout) bf16,
    column order (kh, kw, cout)."""
    cin, cout = w.shape[0], w.shape[1]
    return jnp.transpose(w, (0, 2, 3, 1)).reshape(cin, 16 * cout).astype(jnp.bfloat16)


# ----------------------------------------------------------------------------
# Generator
# ----------------------------------------------------------------------------
def init_generator_params(key, nc=3, nz=100):
    ks = jax.random.split(key, 5)
    std = 0.02  # DCGAN-style deterministic init
    return {
        "label_emb": jax.random.normal(ks[0], (10, 10), jnp.float32),
        "w1": std * jax.random.normal(ks[1], (nz + 10, 256, 4, 4), jnp.float32),
        "w2": std * jax.random.normal(ks[2], (256, 128, 4, 4), jnp.float32),
        "w3": std * jax.random.normal(ks[3], (128, 64, 4, 4), jnp.float32),
        "w4": std * jax.random.normal(ks[4], (64, nc, 4, 4), jnp.float32),
        "g1": jnp.ones((256,), jnp.float32), "b1": jnp.zeros((256,), jnp.float32),
        "g2": jnp.ones((128,), jnp.float32), "b2": jnp.zeros((128,), jnp.float32),
        "g3": jnp.ones((64,), jnp.float32), "b3": jnp.zeros((64,), jnp.float32),
    }


def generator_forward(params, x, labels):
    """x: (B, nz, 1, 1) noise, labels: (B,) int32 in [0, 10) -> (B, 3, 32, 32)."""
    B = x.shape[0]
    c2, c3, c4 = params["w2"].shape[1], params["w3"].shape[1], params["w4"].shape[1]

    z = x.reshape(B, -1).astype(jnp.float32)              # (B, nz)
    c = jnp.take(params["label_emb"], labels, axis=0)     # (B, 10) embedding (glue)
    h = jnp.concatenate([z, c], axis=1)                   # (B, nz + 10)

    # layer 1: ConvTranspose2d(nz+10, 256, 4, 1, 0) on 1x1 input == one GEMM
    y1 = pallas_gemm(h, _w_to_mat(params["w1"])).reshape(B, 4, 4, 256)

    # layer 2: BN1+ReLU fused into GEMM A-path; sub-pixel overlap-add -> 8x8x128
    s1, b1 = _bn_scale_bias(y1, params["g1"], params["b1"])
    t2 = pallas_gemm(y1.reshape(B * 16, 256), _w_to_mat(params["w2"]),
                     scale=s1, bias=b1)
    y2 = _overlap_add_stride2(t2.reshape(B, 4, 4, 4, 4, c2))

    # layer 3: -> 16x16x64
    s2, b2 = _bn_scale_bias(y2, params["g2"], params["b2"])
    t3 = pallas_gemm(y2.reshape(B * 64, 128), _w_to_mat(params["w3"]),
                     scale=s2, bias=b2)
    y3 = _overlap_add_stride2(t3.reshape(B, 8, 8, 4, 4, c3))

    # layer 4: -> 32x32x3
    s3, b3 = _bn_scale_bias(y3, params["g3"], params["b3"])
    t4 = pallas_gemm(y3.reshape(B * 256, 64), _w_to_mat(params["w4"]),
                     scale=s3, bias=b3)
    y4 = _overlap_add_stride2(t4.reshape(B, 16, 16, 4, 4, c4))  # (B, 32, 32, 3)

    # Final Tanh on the lane-dense NCHW layout (B*3, 1024).
    # TODO(synk): tanh cannot fuse into the GEMM-4 epilogue because it must apply
    # after the cross-row overlap-add, so it stays a separate lane-dense kernel.
    y4_nchw = jnp.transpose(y4, (0, 3, 1, 2))              # (B, 3, 32, 32)
    out = pallas_tanh_2d(y4_nchw.reshape(B * c4, 32 * 32))
    return out.reshape(B, c4, 32, 32)


if __name__ == "__main__":
    key = jax.random.PRNGKey(0)
    k_param, k_x, k_lab = jax.random.split(key, 3)

    nz, nc, batch = 100, 3, 2
    params = init_generator_params(k_param, nc=nc, nz=nz)

    x = jax.random.normal(k_x, (batch, nz, 1, 1), jnp.float32)
    labels = jax.random.randint(k_lab, (batch,), 0, 10, jnp.int32)

    fwd = jax.jit(generator_forward)
    out = jax.block_until_ready(fwd(params, x, labels))

    assert out.shape == (batch, nc, 32, 32), out.shape
    assert bool(jnp.all(jnp.isfinite(out)))
    print("KERNEL_OK")
</pallas_src>

<mosaic_0001>
module attributes {stable_mosaic.version = 11 : i64} {
  func.func @_gemm_kernel(%arg0: i32, %arg1: i32, %arg2: memref<2x112xf32, #tpu.memory_space<vmem>>, %arg3: memref<112x1024xbf16, #tpu.memory_space<vmem>>, %arg4: memref<2x1024xf32, #tpu.memory_space<vmem>>) attributes {dimension_semantics = [#tpu.dimension_semantics<parallel>, #tpu.dimension_semantics<parallel>], iteration_bounds = array<i64: 1, 4>, scalar_prefetch = 0 : i64, scratch_operands = 0 : i64, tpu.core_type = #tpu.core_type<tc>, window_params = [{transform_indices = @transform_0, window_bounds = array<i64: 2, 112>}, {transform_indices = @transform_1, window_bounds = array<i64: 112, 1024>}, {transform_indices = @transform_2, window_bounds = array<i64: 2, 1024>}]} {
    %c0 = arith.constant 0 : index
    %c0_0 = arith.constant 0 : index
    %0 = vector.load %arg2[%c0, %c0_0] : memref<2x112xf32, #tpu.memory_space<vmem>>, vector<2x112xf32>
    %1 = arith.truncf %0 : vector<2x112xf32> to vector<2x112xbf16>
    %c0_1 = arith.constant 0 : index
    %c0_2 = arith.constant 0 : index
    %2 = vector.load %arg3[%c0_1, %c0_2] : memref<112x1024xbf16, #tpu.memory_space<vmem>>, vector<112x1024xbf16>
    %cst = arith.constant dense<0.000000e+00> : vector<2x1024xf32>
    %3 = tpu.matmul %1, %2, %cst {dimension_numbers = #tpu.dot_dimension_numbers<[1], [0], [0], [1], [0, 0, 1, 1], [], []>} : vector<2x112xbf16>, vector<112x1024xbf16>, vector<2x1024xf32> -> vector<2x1024xf32>
    %c0_3 = arith.constant 0 : index
    %c0_4 = arith.constant 0 : index
    %4 = vector.load %arg4[%c0_3, %c0_4] : memref<2x1024xf32, #tpu.memory_space<vmem>>, vector<2x1024xf32>
    tpu.vector_store %arg4[%c0_3, %c0_4], %3 {strides = array<i32>} : memref<2x1024xf32, #tpu.memory_space<vmem>>, vector<2x1024xf32>,
    return
  }
  func.func @transform_0(%arg0: i32, %arg1: i32) -> (i32, i32) {
    %c0_i32 = arith.constant 0 : i32
    %c0_i32_0 = arith.constant 0 : i32
    return %arg0, %c0_i32 : i32, i32
  }
  func.func @transform_1(%arg0: i32, %arg1: i32) -> (i32, i32) {
    %c0_i32 = arith.constant 0 : i32
    %c0_i32_0 = arith.constant 0 : i32
    return %c0_i32, %arg1 : i32, i32
  }
  func.func @transform_2(%arg0: i32, %arg1: i32) -> (i32, i32) {
    %c0_i32 = arith.constant 0 : i32
    return %arg0, %arg1 : i32, i32
  }
}

module attributes {stable_mosaic.version = 11 : i64} {
  func.func @_bn_relu_gemm_kernel(%arg0: i32, %arg1: i32, %arg2: memref<32x256xf32, #tpu.memory_space<vmem>>, %arg3: memref<1x256xf32, #tpu.memory_space<vmem>>, %arg4: memref<1x256xf32, #tpu.memory_space<vmem>>, %arg5: memref<256x1024xbf16, #tpu.memory_space<vmem>>, %arg6: memref<32x1024xf32, #tpu.memory_space<vmem>>) attributes {dimension_semantics = [#tpu.dimension_semantics<parallel>, #tpu.dimension_semantics<parallel>], iteration_bounds = array<i64: 1, 2>, scalar_prefetch = 0 : i64, scratch_operands = 0 : i64, tpu.core_type = #tpu.core_type<tc>, window_params = [{transform_indices = @transform_0, window_bounds = array<i64: 32, 256>}, {pipeline_mode = #tpu.pipeline_mode<synchronous>, transform_indices = @transform_1, window_bounds = array<i64: 1, 256>}, {pipeline_mode = #tpu.pipeline_mode<synchronous>, transform_indices = @transform_2, window_bounds = array<i64: 1, 256>}, {transform_indices = @transform_3, window_bounds = array<i64: 256, 1024>}, {transform_indices = @transform_4, window_bounds = array<i64: 32, 1024>}]} {
    %c0 = arith.constant 0 : index
    %c0_0 = arith.constant 0 : index
    %0 = vector.load %arg2[%c0, %c0_0] : memref<32x256xf32, #tpu.memory_space<vmem>>, vector<32x256xf32>
    %c0_1 = arith.constant 0 : index
    %c0_2 = arith.constant 0 : index
    %1 = vector.load %arg3[%c0_1, %c0_2] : memref<1x256xf32, #tpu.memory_space<vmem>>, vector<1x256xf32>
    %2 = vector.broadcast %1 : vector<1x256xf32> to vector<32x256xf32>
    %3 = arith.mulf %0, %2 : vector<32x256xf32>
    %c0_3 = arith.constant 0 : index
    %c0_4 = arith.constant 0 : index
    %4 = vector.load %arg4[%c0_3, %c0_4] : memref<1x256xf32, #tpu.memory_space<vmem>>, vector<1x256xf32>
    %5 = vector.broadcast %4 : vector<1x256xf32> to vector<32x256xf32>
    %6 = arith.addf %3, %5 : vector<32x256xf32>
    %cst = arith.constant 0.000000e+00 : f32
    %7 = vector.broadcast %cst : f32 to vector<32x256xf32>
    %8 = arith.maximumf %6, %7 : vector<32x256xf32>
    %9 = arith.truncf %8 : vector<32x256xf32> to vector<32x256xbf16>
    %c0_5 = arith.constant 0 : index
    %c0_6 = arith.constant 0 : index
    %10 = vector.load %arg5[%c0_5, %c0_6] : memref<256x1024xbf16, #tpu.memory_space<vmem>>, vector<256x1024xbf16>
    %cst_7 = arith.constant dense<0.000000e+00> : vector<32x1024xf32>
    %11 = tpu.matmul %9, %10, %cst_7 {dimension_numbers = #tpu.dot_dimension_numbers<[1], [0], [0], [1], [0, 0, 1, 1], [], []>} : vector<32x256xbf16>, vector<256x1024xbf16>, vector<32x1024xf32> -> vector<32x1024xf32>
    %c0_8 = arith.constant 0 : index
    %c0_9 = arith.constant 0 : index
    %12 = vector.load %arg6[%c0_8, %c0_9] : memref<32x1024xf32, #tpu.memory_space<vmem>>, vector<32x1024xf32>
    tpu.vector_store %arg6[%c0_8, %c0_9], %11 {strides = array<i32>} : memref<32x1024xf32, #tpu.memory_space<vmem>>, vector<32x1024xf32>,
    return
  }
  func.func @transform_0(%arg0: i32, %arg1: i32) -> (i32, i32) {
    %c0_i32 = arith.constant 0 : i32
    %c0_i32_0 = arith.constant 0 : i32
    return %arg0, %c0_i32 : i32, i32
  }
  func.func @transform_1(%arg0: i32, %arg1: i32) -> (i32, i32) {
    %c0_i32 = arith.constant 0 : i32
    %c0_i32_0 = arith.constant 0 : i32
    %c0_i32_1 = arith.constant 0 : i32
    return %c0_i32, %c0_i32_0 : i32, i32
  }
  func.func @transform_2(%arg0: i32, %arg1: i32) -> (i32, i32) {
    %c0_i32 = arith.constant 0 : i32
    %c0_i32_0 = arith.constant 0 : i32
    %c0_i32_1 = arith.constant 0 : i32
    return %c0_i32, %c0_i32_0 : i32, i32
  }
  func.func @transform_3(%arg0: i32, %arg1: i32) -> (i32, i32) {
    %c0_i32 = arith.constant 0 : i32
    %c0_i32_0 = arith.constant 0 : i32
    return %c0_i32, %arg1 : i32, i32
  }
  func.func @transform_4(%arg0: i32, %arg1: i32) -> (i32, i32) {
    %c0_i32 = arith.constant 0 : i32
    return %arg0, %arg1 : i32, i32
  }
}

module attributes {stable_mosaic.version = 11 : i64} {
  func.func @_bn_relu_gemm_kernel(%arg0: i32, %arg1: i32, %arg2: memref<128x128xf32, #tpu.memory_space<vmem>>, %arg3: memref<1x128xf32, #tpu.memory_space<vmem>>, %arg4: memref<1x128xf32, #tpu.memory_space<vmem>>, %arg5: memref<128x512xbf16, #tpu.memory_space<vmem>>, %arg6: memref<128x512xf32, #tpu.memory_space<vmem>>) attributes {dimension_semantics = [#tpu.dimension_semantics<parallel>, #tpu.dimension_semantics<parallel>], iteration_bounds = array<i64: 1, 2>, scalar_prefetch = 0 : i64, scratch_operands = 0 : i64, tpu.core_type = #tpu.core_type<tc>, window_params = [{transform_indices = @transform_0, window_bounds = array<i64: 128, 128>}, {pipeline_mode = #tpu.pipeline_mode<synchronous>, transform_indices = @transform_1, window_bounds = array<i64: 1, 128>}, {pipeline_mode = #tpu.pipeline_mode<synchronous>, transform_indices = @transform_2, window_bounds = array<i64: 1, 128>}, {transform_indices = @transform_3, window_bounds = array<i64: 128, 512>}, {transform_indices = @transform_4, window_bounds = array<i64: 128, 512>}]} {
    %c0 = arith.constant 0 : index
    %c0_0 = arith.constant 0 : index
    %0 = vector.load %arg2[%c0, %c0_0] : memref<128x128xf32, #tpu.memory_space<vmem>>, vector<128x128xf32>
    %c0_1 = arith.constant 0 : index
    %c0_2 = arith.constant 0 : index
    %1 = vector.load %arg3[%c0_1, %c0_2] : memref<1x128xf32, #tpu.memory_space<vmem>>, vector<1x128xf32>
    %2 = vector.broadcast %1 : vector<1x128xf32> to vector<128x128xf32>
    %3 = arith.mulf %0, %2 : vector<128x128xf32>
    %c0_3 = arith.constant 0 : index
    %c0_4 = arith.constant 0 : index
    %4 = vector.load %arg4[%c0_3, %c0_4] : memref<1x128xf32, #tpu.memory_space<vmem>>, vector<1x128xf32>
    %5 = vector.broadcast %4 : vector<1x128xf32> to vector<128x128xf32>
    %6 = arith.addf %3, %5 : vector<128x128xf32>
    %cst = arith.constant 0.000000e+00 : f32
    %7 = vector.broadcast %cst : f32 to vector<128x128xf32>
    %8 = arith.maximumf %6, %7 : vector<128x128xf32>
    %9 = arith.truncf %8 : vector<128x128xf32> to vector<128x128xbf16>
    %c0_5 = arith.constant 0 : index
    %c0_6 = arith.constant 0 : index
    %10 = vector.load %arg5[%c0_5, %c0_6] : memref<128x512xbf16, #tpu.memory_space<vmem>>, vector<128x512xbf16>
    %cst_7 = arith.constant dense<0.000000e+00> : vector<128x512xf32>
    %11 = tpu.matmul %9, %10, %cst_7 {dimension_numbers = #tpu.dot_dimension_numbers<[1], [0], [0], [1], [0, 0, 1, 1], [], []>} : vector<128x128xbf16>, vector<128x512xbf16>, vector<128x512xf32> -> vector<128x512xf32>
    %c0_8 = arith.constant 0 : index
    %c0_9 = arith.constant 0 : index
    %12 = vector.load %arg6[%c0_8, %c0_9] : memref<128x512xf32, #tpu.memory_space<vmem>>, vector<128x512xf32>
    tpu.vector_store %arg6[%c0_8, %c0_9], %11 {strides = array<i32>} : memref<128x512xf32, #tpu.memory_space<vmem>>, vector<128x512xf32>,
    return
  }
  func.func @transform_0(%arg0: i32, %arg1: i32) -> (i32, i32) {
    %c0_i32 = arith.constant 0 : i32
    %c0_i32_0 = arith.constant 0 : i32
    return %arg0, %c0_i32 : i32, i32
  }
  func.func @transform_1(%arg0: i32, %arg1: i32) -> (i32, i32) {
    %c0_i32 = arith.constant 0 : i32
    %c0_i32_0 = arith.constant 0 : i32
    %c0_i32_1 = arith.constant 0 : i32
    return %c0_i32, %c0_i32_0 : i32, i32
  }
  func.func @transform_2(%arg0: i32, %arg1: i32) -> (i32, i32) {
    %c0_i32 = arith.constant 0 : i32
    %c0_i32_0 = arith.constant 0 : i32
    %c0_i32_1 = arith.constant 0 : i32
    return %c0_i32, %c0_i32_0 : i32, i32
  }
  func.func @transform_3(%arg0: i32, %arg1: i32) -> (i32, i32) {
    %c0_i32 = arith.constant 0 : i32
    %c0_i32_0 = arith.constant 0 : i32
    return %c0_i32, %arg1 : i32, i32
  }
  func.func @transform_4(%arg0: i32, %arg1: i32) -> (i32, i32) {
    %c0_i32 = arith.constant 0 : i32
    return %arg0, %arg1 : i32, i32
  }
}

module attributes {stable_mosaic.version = 11 : i64} {
  func.func @_bn_relu_gemm_kernel(%arg0: i32, %arg1: i32, %arg2: memref<512x64xf32, #tpu.memory_space<vmem>>, %arg3: memref<1x64xf32, #tpu.memory_space<vmem>>, %arg4: memref<1x64xf32, #tpu.memory_space<vmem>>, %arg5: memref<64x48xbf16, #tpu.memory_space<vmem>>, %arg6: memref<512x48xf32, #tpu.memory_space<vmem>>) attributes {dimension_semantics = [#tpu.dimension_semantics<parallel>, #tpu.dimension_semantics<parallel>], iteration_bounds = array<i64: 1, 1>, scalar_prefetch = 0 : i64, scratch_operands = 0 : i64, tpu.core_type = #tpu.core_type<tc>, window_params = [{transform_indices = @transform_0, window_bounds = array<i64: 512, 64>}, {pipeline_mode = #tpu.pipeline_mode<synchronous>, transform_indices = @transform_1, window_bounds = array<i64: 1, 64>}, {pipeline_mode = #tpu.pipeline_mode<synchronous>, transform_indices = @transform_2, window_bounds = array<i64: 1, 64>}, {transform_indices = @transform_3, window_bounds = array<i64: 64, 48>}, {transform_indices = @transform_4, window_bounds = array<i64: 512, 48>}]} {
    %c0 = arith.constant 0 : index
    %c0_0 = arith.constant 0 : index
    %0 = vector.load %arg2[%c0, %c0_0] : memref<512x64xf32, #tpu.memory_space<vmem>>, vector<512x64xf32>
    %c0_1 = arith.constant 0 : index
    %c0_2 = arith.constant 0 : index
    %1 = vector.load %arg3[%c0_1, %c0_2] : memref<1x64xf32, #tpu.memory_space<vmem>>, vector<1x64xf32>
    %2 = vector.broadcast %1 : vector<1x64xf32> to vector<512x64xf32>
    %3 = arith.mulf %0, %2 : vector<512x64xf32>
    %c0_3 = arith.constant 0 : index
    %c0_4 = arith.constant 0 : index
    %4 = vector.load %arg4[%c0_3, %c0_4] : memref<1x64xf32, #tpu.memory_space<vmem>>, vector<1x64xf32>
    %5 = vector.broadcast %4 : vector<1x64xf32> to vector<512x64xf32>
    %6 = arith.addf %3, %5 : vector<512x64xf32>
    %cst = arith.constant 0.000000e+00 : f32
    %7 = vector.broadcast %cst : f32 to vector<512x64xf32>
    %8 = arith.maximumf %6, %7 : vector<512x64xf32>
    %9 = arith.truncf %8 : vector<512x64xf32> to vector<512x64xbf16>
    %c0_5 = arith.constant 0 : index
    %c0_6 = arith.constant 0 : index
    %10 = vector.load %arg5[%c0_5, %c0_6] : memref<64x48xbf16, #tpu.memory_space<vmem>>, vector<64x48xbf16>
    %cst_7 = arith.constant dense<0.000000e+00> : vector<512x48xf32>
    %11 = tpu.matmul %9, %10, %cst_7 {dimension_numbers = #tpu.dot_dimension_numbers<[1], [0], [0], [1], [0, 0, 1, 1], [], []>} : vector<512x64xbf16>, vector<64x48xbf16>, vector<512x48xf32> -> vector<512x48xf32>
    %c0_8 = arith.constant 0 : index
    %c0_9 = arith.constant 0 : index
    %12 = vector.load %arg6[%c0_8, %c0_9] : memref<512x48xf32, #tpu.memory_space<vmem>>, vector<512x48xf32>
    tpu.vector_store %arg6[%c0_8, %c0_9], %11 {strides = array<i32>} : memref<512x48xf32, #tpu.memory_space<vmem>>, vector<512x48xf32>,
    return
  }
  func.func @transform_0(%arg0: i32, %arg1: i32) -> (i32, i32) {
    %c0_i32 = arith.constant 0 : i32
    %c0_i32_0 = arith.constant 0 : i32
    return %arg0, %c0_i32 : i32, i32
  }
  func.func @transform_1(%arg0: i32, %arg1: i32) -> (i32, i32) {
    %c0_i32 = arith.constant 0 : i32
    %c0_i32_0 = arith.constant 0 : i32
    %c0_i32_1 = arith.constant 0 : i32
    return %c0_i32, %c0_i32_0 : i32, i32
  }
  func.func @transform_2(%arg0: i32, %arg1: i32) -> (i32, i32) {
    %c0_i32 = arith.constant 0 : i32
    %c0_i32_0 = arith.constant 0 : i32
    %c0_i32_1 = arith.constant 0 : i32
    return %c0_i32, %c0_i32_0 : i32, i32
  }
  func.func @transform_3(%arg0: i32, %arg1: i32) -> (i32, i32) {
    %c0_i32 = arith.constant 0 : i32
    %c0_i32_0 = arith.constant 0 : i32
    return %c0_i32, %arg1 : i32, i32
  }
  func.func @transform_4(%arg0: i32, %arg1: i32) -> (i32, i32) {
    %c0_i32 = arith.constant 0 : i32
    return %arg0, %arg1 : i32, i32
  }
}

module attributes {stable_mosaic.version = 11 : i64} {
  func.func @_tanh_kernel(%arg0: i32, %arg1: memref<6x1024xf32, #tpu.memory_space<vmem>>, %arg2: memref<6x1024xf32, #tpu.memory_space<vmem>>) attributes {dimension_semantics = [#tpu.dimension_semantics<parallel>], iteration_bounds = array<i64: 1>, scalar_prefetch = 0 : i64, scratch_operands = 0 : i64, tpu.core_type = #tpu.core_type<tc>, window_params = [{transform_indices = @transform_0, window_bounds = array<i64: 6, 1024>}, {transform_indices = @transform_1, window_bounds = array<i64: 6, 1024>}]} {
    %c0 = arith.constant 0 : index
    %c0_0 = arith.constant 0 : index
    %0 = vector.load %arg1[%c0, %c0_0] : memref<6x1024xf32, #tpu.memory_space<vmem>>, vector<6x1024xf32>
    %1 = math.tanh %0 : vector<6x1024xf32>
    %c0_1 = arith.constant 0 : index
    %c0_2 = arith.constant 0 : index
    %2 = vector.load %arg2[%c0_1, %c0_2] : memref<6x1024xf32, #tpu.memory_space<vmem>>, vector<6x1024xf32>
    tpu.vector_store %arg2[%c0_1, %c0_2], %1 {strides = array<i32>} : memref<6x1024xf32, #tpu.memory_space<vmem>>, vector<6x1024xf32>,
    return
  }
  func.func @transform_0(%arg0: i32) -> (i32, i32) {
    %c0_i32 = arith.constant 0 : i32
    %c0_i32_0 = arith.constant 0 : i32
    return %arg0, %c0_i32 : i32, i32
  }
  func.func @transform_1(%arg0: i32) -> (i32, i32) {
    %c0_i32 = arith.constant 0 : i32
    %c0_i32_0 = arith.constant 0 : i32
    return %arg0, %c0_i32 : i32, i32
  }
}

</mosaic_0001>

<bundles_post_ra>
// kernel: generator_forward.5
= control target key start
LH: loop header
LB: loop body
LE: loop exit
PB: predicated region body
PF: predicated region fallthrough
CT: control target
= control target key end

     0   :  { %s1144_s9 = smov 0   ;;  %s1146_s10 = smov 0   ;;  %s1400_s0 = inlined_call_operand.vmem [shape: f32[2,112], index: 0, kind: input, shape index: {}]   ;;  %s1401_s1 = inlined_call_operand.vmem [shape: bf16[112,4096], index: 1, kind: input, shape index: {}]   ;;  %s1402_s2 = inlined_call_operand.vmem [shape: f32[2,4096], index: 2, kind: output, shape index: {}]  }
   0x1   :  { %s1148_s11 = smov 0   ;;  %s1150_s12 = smov 0  }
   0x2   :  { %s1152_s13 = smov 0  }
   0x3 LB: > { %s21_s14 = sadd.s32 1, %s1121_s12  ;;  %p64_p1 = scmp.ne.s32.totalorder %s1113_s10, %s1109_s9  ;;  %s1125_s13 = sphi %s1152_s13, %s12_s13   ;;  %s1121_s12 = sphi %s1150_s12, %s1406_s12   ;;  %s1117_s11 = sphi %s1148_s11, %s1405_s11   ;;  %s1113_s10 = sphi %s1146_s10, %s1404_s10   ;;  %s1109_s9 = sphi %s1144_s9, %s1403_s9  }
   0x4   : > { %p22_p0 = scmp.ge.s32.totalorder %s21_s14, 4  ;;  %p65_p2 = scmp.eq.s32.totalorder %s1125_s13, 0 }
   0x5   : > { %s57_s16 = sadd.s32 1, %s1113_s10  ;;  %p974_p5 = scmp.ge.s32.totalorder %s1125_s13, 4 }
   0x6   : > { %s1408_s14 = smov (%p22_p0, %s21_s14), 0  ;;  %p66_p3 = por %p65_p2, %p64_p1 }
   0x7   : > { %s54_s15 = ssub.s32 %s1121_s12, %s1408_s14  ;;  %125 = sbr.rel (%p974_p5) target bundleno = 47 (0x2f), region = 20 }
   0x8   : > { %p55_p4 = scmp.eq.s32.totalorder %s54_s15, 0 }
   0xa   : > { %s1179_s17 = scalar_select %p55_p4, %s1113_s10, %s57_s16  }
   0xe   : > { %128 = sbr.rel (!%p66_p3) target bundleno = 47 (0x2f), region = 24  ;;  %s130_s18 = sand.u32 (%p66_p3), 1, %s1113_s10  }
   0xf   : > { %s1042_s19 = sshll.u32 (%p66_p3), %s1121_s12, 5  ;;  %s1043_s20 = smul.u32 (%p66_p3), 448, %s130_s18 }
  0x10   : > { %s1187_s23 = scalar_lea.vmem (%p66_p3), %s1401_s1, %s1042_s19 }
  0x11   : > { %v148_v0 = vld [vmem:[%s1187_s23] sm:$0xff] (%p66_p3)  ;;  %v150_v1 = vld [vmem:[%s1187_s23 + $0x8] sm:$0xff] (%p66_p3)  ;;  %v152_v2 = vld [vmem:[%s1187_s23 + $0x10] sm:$0xff] (%p66_p3)  ;;  %s1195_s24 = scalar_lea.vmem (%p66_p3), [#allocation2], %s1043_s20 }
  0x12   : > { %v154_v3 = vld [vmem:[%s1187_s23 + $0x18] sm:$0xff] (%p66_p3)  ;;  %v156_v4 = vld [vmem:[%s1187_s23 + $0x80] sm:$0xff] (%p66_p3)  ;;  %v158_v5 = vld [vmem:[%s1187_s23 + $0x88] sm:$0xff] (%p66_p3)  ;;  %149 = vst [vmem:[%s1195_s24] sm:$0xff] (%p66_p3), %v148_v0 }
  0x13   : > { %151 = vst [vmem:[%s1195_s24 + $0x8] sm:$0xff] (%p66_p3), %v150_v1  ;;  %153 = vst [vmem:[%s1195_s24 + $0x10] sm:$0xff] (%p66_p3), %v152_v2  ;;  %v160_v6 = vld [vmem:[%s1187_s23 + $0x90] sm:$0xff] (%p66_p3)  ;;  %v162_v7 = vld [vmem:[%s1187_s23 + $0x98] sm:$0xff] (%p66_p3) }
  0x14   : > { %155 = vst [vmem:[%s1195_s24 + $0x18] sm:$0xff] (%p66_p3), %v154_v3  ;;  %157 = vst [vmem:[%s1195_s24 + $0x20] sm:$0xff] (%p66_p3), %v156_v4  ;;  %v164_v8 = vld [vmem:[%s1187_s23 + $0x100] sm:$0xff] (%p66_p3)  ;;  %v166_v9 = vld [vmem:[%s1187_s23 + $0x108] sm:$0xff] (%p66_p3) }
  0x15   : > { %159 = vst [vmem:[%s1195_s24 + $0x28] sm:$0xff] %v158_v5  ;;  %161 = vst [vmem:[%s1195_s24 + $0x30] sm:$0xff] %v160_v6  ;;  %v168_v10 = vld [vmem:[%s1187_s23 + $0x110] sm:$0xff]  ;;  %v170_v11 = vld [vmem:[%s1187_s23 + $0x118] sm:$0xff] }
  0x16   : > { %163 = vst [vmem:[%s1195_s24 + $0x38] sm:$0xff] %v162_v7  ;;  %165 = vst [vmem:[%s1195_s24 + $0x40] sm:$0xff] %v164_v8  ;;  %v172_v12 = vld [vmem:[%s1187_s23 + $0x180] sm:$0xff]  ;;  %v174_v13 = vld [vmem:[%s1187_s23 + $0x188] sm:$0xff] }
  0x17   : > { %167 = vst [vmem:[%s1195_s24 + $0x48] sm:$0xff] %v166_v9  ;;  %169 = vst [vmem:[%s1195_s24 + $0x50] sm:$0xff] %v168_v10  ;;  %v176_v14 = vld [vmem:[%s1187_s23 + $0x190] sm:$0xff]  ;;  %v178_v15 = vld [vmem:[%s1187_s23 + $0x198] sm:$0xff] }
  0x18   : > { %171 = vst [vmem:[%s1195_s24 + $0x58] sm:$0xff] %v170_v11  ;;  %173 = vst [vmem:[%s1195_s24 + $0x60] sm:$0xff] %v172_v12  ;;  %v180_v16 = vld [vmem:[%s1187_s23 + $0x200] sm:$0xff]  ;;  %v182_v17 = vld [vmem:[%s1187_s23 + $0x208] sm:$0xff] }
  0x19   : > { %175 = vst [vmem:[%s1195_s24 + $0x68] sm:$0xff] %v174_v13  ;;  %177 = vst [vmem:[%s1195_s24 + $0x70] sm:$0xff] %v176_v14  ;;  %v184_v18 = vld [vmem:[%s1187_s23 + $0x210] sm:$0xff]  ;;  %v186_v19 = vld [vmem:[%s1187_s23 + $0x218] sm:$0xff] }
  0x1a   : > { %179 = vst [vmem:[%s1195_s24 + $0x78] sm:$0xff] %v178_v15  ;;  %181 = vst [vmem:[%s1195_s24 + $0x80] sm:$0xff] %v180_v16  ;;  %v188_v20 = vld [vmem:[%s1187_s23 + $0x280] sm:$0xff]  ;;  %v190_v21 = vld [vmem:[%s1187_s23 + $0x288] sm:$0xff] }
  0x1b   : > { %183 = vst [vmem:[%s1195_s24 + $0x88] sm:$0xff] %v182_v17  ;;  %185 = vst [vmem:[%s1195_s24 + $0x90] sm:$0xff] %v184_v18  ;;  %v192_v22 = vld [vmem:[%s1187_s23 + $0x290] sm:$0xff]  ;;  %v194_v23 = vld [vmem:[%s1187_s23 + $0x298] sm:$0xff] }
  0x1c   : > { %187 = vst [vmem:[%s1195_s24 + $0x98] sm:$0xff] %v186_v19  ;;  %189 = vst [vmem:[%s1195_s24 + $0xa0] sm:$0xff] %v188_v20  ;;  %v196_v24 = vld [vmem:[%s1187_s23 + $0x300] sm:$0xff]  ;;  %v198_v25 = vld [vmem:[%s1187_s23 + $0x308] sm:$0xff] }
  0x1d   : > { %191 = vst [vmem:[%s1195_s24 + $0xa8] sm:$0xff] %v190_v21  ;;  %193 = vst [vmem:[%s1195_s24 + $0xb0] sm:$0xff] %v192_v22  ;;  %v200_v26 = vld [vmem:[%s1187_s23 + $0x310] sm:$0xff]  ;;  %v202_v27 = vld [vmem:[%s1187_s23 + $0x318] sm:$0xff] }
  0x1e   : > { %195 = vst [vmem:[%s1195_s24 + $0xb8] sm:$0xff] %v194_v23  ;;  %197 = vst [vmem:[%s1195_s24 + $0xc0] sm:$0xff] %v196_v24  ;;  %v204_v28 = vld [vmem:[%s1187_s23 + $0x380] sm:$0xff]  ;;  %v206_v29 = vld [vmem:[%s1187_s23 + $0x388] sm:$0xff] }
  0x1f   : > { %199 = vst [vmem:[%s1195_s24 + $0xc8] sm:$0xff] %v198_v25  ;;  %201 = vst [vmem:[%s1195_s24 + $0xd0] sm:$0xff] %v200_v26  ;;  %v208_v30 = vld [vmem:[%s1187_s23 + $0x390] sm:$0xff]  ;;  %v210_v31 = vld [vmem:[%s1187_s23 + $0x398] sm:$0xff] }
  0x20   : > { %203 = vst [vmem:[%s1195_s24 + $0xd8] sm:$0xff] %v202_v27  ;;  %205 = vst [vmem:[%s1195_s24 + $0xe0] sm:$0xff] %v204_v28  ;;  %v212_v32 = vld [vmem:[%s1187_s23 + $0x400] sm:$0xff]  ;;  %v214_v33 = vld [vmem:[%s1187_s23 + $0x408] sm:$0xff] }
  0x21   : > { %207 = vst [vmem:[%s1195_s24 + $0xe8] sm:$0xff] %v206_v29  ;;  %209 = vst [vmem:[%s1195_s24 + $0xf0] sm:$0xff] %v208_v30  ;;  %v216_v34 = vld [vmem:[%s1187_s23 + $0x410] sm:$0xff]  ;;  %v218_v35 = vld [vmem:[%s1187_s23 + $0x418] sm:$0xff] }
  0x22   : > { %211 = vst [vmem:[%s1195_s24 + $0xf8] sm:$0xff] %v210_v31  ;;  %213 = vst [vmem:[%s1195_s24 + $0x100] sm:$0xff] %v212_v32  ;;  %v220_v36 = vld [vmem:[%s1187_s23 + $0x480] sm:$0xff]  ;;  %v222_v37 = vld [vmem:[%s1187_s23 + $0x488] sm:$0xff] }
  0x23   : > { %215 = vst [vmem:[%s1195_s24 + $0x108] sm:$0xff] %v214_v33  ;;  %217 = vst [vmem:[%s1195_s24 + $0x110] sm:$0xff] %v216_v34  ;;  %v224_v38 = vld [vmem:[%s1187_s23 + $0x490] sm:$0xff]  ;;  %v226_v39 = vld [vmem:[%s1187_s23 + $0x498] sm:$0xff] }
  0x24   : > { %219 = vst [vmem:[%s1195_s24 + $0x118] sm:$0xff] %v218_v35  ;;  %221 = vst [vmem:[%s1195_s24 + $0x120] sm:$0xff] %v220_v36  ;;  %v228_v40 = vld [vmem:[%s1187_s23 + $0x500] sm:$0xff]  ;;  %v230_v41 = vld [vmem:[%s1187_s23 + $0x508] sm:$0xff] }
  0x25   : > { %223 = vst [vmem:[%s1195_s24 + $0x128] sm:$0xff] %v222_v37  ;;  %225 = vst [vmem:[%s1195_s24 + $0x130] sm:$0xff] %v224_v38  ;;  %v232_v42 = vld [vmem:[%s1187_s23 + $0x510] sm:$0xff]  ;;  %v234_v43 = vld [vmem:[%s1187_s23 + $0x518] sm:$0xff] }
  0x26   : > { %227 = vst [vmem:[%s1195_s24 + $0x138] sm:$0xff] %v226_v39  ;;  %229 = vst [vmem:[%s1195_s24 + $0x140] sm:$0xff] %v228_v40  ;;  %v236_v44 = vld [vmem:[%s1187_s23 + $0x580] sm:$0xff]  ;;  %v238_v45 = vld [vmem:[%s1187_s23 + $0x588] sm:$0xff] }
  0x27   : > { %231 = vst [vmem:[%s1195_s24 + $0x148] sm:$0xff] %v230_v41  ;;  %233 = vst [vmem:[%s1195_s24 + $0x150] sm:$0xff] %v232_v42  ;;  %v240_v46 = vld [vmem:[%s1187_s23 + $0x590] sm:$0xff]  ;;  %v242_v47 = vld [vmem:[%s1187_s23 + $0x598] sm:$0xff] }
  0x28   : > { %235 = vst [vmem:[%s1195_s24 + $0x158] sm:$0xff] %v234_v43  ;;  %237 = vst [vmem:[%s1195_s24 + $0x160] sm:$0xff] %v236_v44  ;;  %v244_v48 = vld [vmem:[%s1187_s23 + $0x600] sm:$0xff]  ;;  %v246_v49 = vld [vmem:[%s1187_s23 + $0x608] sm:$0xff] }
  0x29   : > { %239 = vst [vmem:[%s1195_s24 + $0x168] sm:$0xff] %v238_v45  ;;  %241 = vst [vmem:[%s1195_s24 + $0x170] sm:$0xff] %v240_v46  ;;  %v248_v50 = vld [vmem:[%s1187_s23 + $0x610] sm:$0xff]  ;;  %v250_v51 = vld [vmem:[%s1187_s23 + $0x618] sm:$0xff] }
  0x2a   : > { %243 = vst [vmem:[%s1195_s24 + $0x178] sm:$0xff] %v242_v47  ;;  %245 = vst [vmem:[%s1195_s24 + $0x180] sm:$0xff] %v244_v48  ;;  %v252_v52 = vld [vmem:[%s1187_s23 + $0x680] sm:$0xff]  ;;  %v254_v53 = vld [vmem:[%s1187_s23 + $0x688] sm:$0xff] }
  0x2b   : > { %247 = vst [vmem:[%s1195_s24 + $0x188] sm:$0xff] %v246_v49  ;;  %249 = vst [vmem:[%s1195_s24 + $0x190] sm:$0xff] %v248_v50  ;;  %v256_v54 = vld [vmem:[%s1187_s23 + $0x690] sm:$0xff]  ;;  %v258_v55 = vld [vmem:[%s1187_s23 + $0x698] sm:$0xff] }
  0x2c   : > { %251 = vst [vmem:[%s1195_s24 + $0x198] sm:$0xff] %v250_v51  ;;  %253 = vst [vmem:[%s1195_s24 + $0x1a0] sm:$0xff] %v252_v52 }
  0x2d   : > { %255 = vst [vmem:[%s1195_s24 + $0x1a8] sm:$0xff] %v254_v53  ;;  %257 = vst [vmem:[%s1195_s24 + $0x1b0] sm:$0xff] %v256_v54 }
  0x2e   : > { %259 = vst [vmem:[%s1195_s24 + $0x1b8] sm:$0xff] %v258_v55 }
  0x2f PF: > { %p977_p6 = scmp.ge.s32.totalorder %s1125_s13, 1  ;;  %p264_p7 = scmp.lt.s32.totalorder %s1125_s13, 5 }
  0x31   : > { %p265_p8 = pnand %p977_p6, %p264_p7 }
  0x32   : > { %s271_s25 = sand.u32 (!%p265_p8), 1, %s1109_s9   ;;  %v1127_v56 = vmov (!%p265_p8), 0   ;;  %v316_v52 = vld [vmem:[%s1400_s0] sm:$0x3] (!%p265_p8)  ;;  %vm654_vm0 = vcmask (!%p265_p8), 916480   ;;  %s978_s30 = sshll.u32 (!%p265_p8), %s1117_s11, 3 }
  0x33   : > { %268 = sbr.rel (%p265_p8) target bundleno = 335 (0x14f), region = 47  ;;  %690 = vmatprep.mubr.bf16.mxu0 (!%p265_p8), %v1127_v56  ;;  %731 = vmatprep.mubr.bf16.mxu1 (!%p265_p8), %v1127_v56  ;;  %p308_p9 = scmp.lt.s32.totalorder (!%p265_p8), %s978_s30, 31 }
  0x34   : > { %s1044_s26 = smul.u32 (!%p265_p8), 448, %s271_s25 }
  0x36   : > { %s1308_s27 = scalar_lea.vmem (!%p265_p8), [#allocation2], %s1044_s26 }
  0x37   : > { %v318_v57 = vld [vmem:[%s1308_s27] sm:$0xff] (!%p265_p8)  ;;  %v319_v59 = vld [vmem:[%s1308_s27 + $0x8] sm:$0xff] (!%p265_p8)  ;;  %v320_v47 = vld [vmem:[%s1308_s27 + $0x10] sm:$0xff] (!%p265_p8) }
  0x38   : > { %v322_v58 = vld [vmem:[%s1308_s27 + $0x20] sm:$0xff] (!%p265_p8)  ;;  %v323_v61 = vld [vmem:[%s1308_s27 + $0x28] sm:$0xff] (!%p265_p8)  ;;  %v324_v48 = vld [vmem:[%s1308_s27 + $0x30] sm:$0xff] (!%p265_p8) }
  0x39   : > { %v981_v60 = vcombine.high (!%p265_p8), %v318_v57, %v322_v58  ;;  %v980_v62 = vcombine.low (!%p265_p8), %v318_v57, %v322_v58  ;;  %v326_v63 = vld [vmem:[%s1308_s27 + $0x40] sm:$0xff] (!%p265_p8)  ;;  %v983_v1 = vcombine.high (!%p265_p8), %v319_v59, %v323_v61  ;;  %v982_v2 = vcombine.low (!%p265_p8), %v319_v59, %v323_v61  ;;  %v327_v4 = vld [vmem:[%s1308_s27 + $0x48] sm:$0xff] (!%p265_p8)  ;;  %v321_v49 = vld [vmem:[%s1308_s27 + $0x18] sm:$0xff] (!%p265_p8) }
  0x3a   : > { %v330_v0 = vld [vmem:[%s1308_s27 + $0x60] sm:$0xff]  ;;  %v331_v5 = vld [vmem:[%s1308_s27 + $0x68] sm:$0xff]  ;;  %v325_v50 = vld [vmem:[%s1308_s27 + $0x38] sm:$0xff]  ;;  %v985_v54 = vcombine.high %v320_v47, %v324_v48  ;;  %v1347_v59 = vpack.c.bf16 %v316_v52, %v316_v52  ;;  %s1410_s30 = smov (!%p308_p9, %s978_s30), 31 }
  0x3b   : > { %v989_v3 = vcombine.high %v326_v63, %v330_v0  ;;  %v334_v6 = vld [vmem:[%s1308_s27 + $0x80] sm:$0xff]  ;;  %658 = vmatprep.subr.bf16.mxu0 %v981_v60  ;;  %v991_v7 = vcombine.high %v327_v4, %v331_v5  ;;  %v335_v9 = vld [vmem:[%s1308_s27 + $0x88] sm:$0xff]  ;;  %699 = vmatprep.subr.bf16.mxu1 %v983_v1  ;;  %v988_v11 = vcombine.low %v326_v63, %v330_v0  ;;  %v328_v57 = vld [vmem:[%s1308_s27 + $0x50] sm:$0xff]  ;;  %s979_s3 = sshll.u32 %s1410_s30, 1 }
  0x3c   : > { %v338_v8 = vld [vmem:[%s1308_s27 + $0xa0] sm:$0xff]  ;;  %v339_v10 = vld [vmem:[%s1308_s27 + $0xa8] sm:$0xff]  ;;  %659 = vmatpush1.bf16.msra.mxu0 %v980_v62  ;;  %700 = vmatpush1.bf16.msra.mxu1 %v982_v2  ;;  %v990_v12 = vcombine.low %v327_v4, %v331_v5  ;;  %v987_v55 = vcombine.high %v321_v49, %v325_v50  ;;  %v332_v58 = vld [vmem:[%s1308_s27 + $0x70] sm:$0xff]  ;;  %v984_v62 = vcombine.low %v320_v47, %v324_v48  ;;  %s313_s6 = scalar_lea.vmem %s1402_s2, %s979_s3 }
  0x3d   : > { %660 = vmatprep.subr.bf16.mxu0 %v989_v3  ;;  %v997_v13 = vcombine.high %v334_v6, %v338_v8  ;;  %701 = vmatprep.subr.bf16.mxu1 %v991_v7  ;;  %v999_v14 = vcombine.high %v335_v9, %v339_v10  ;;  %v342_v15 = vld [vmem:[%s1308_s27 + $0xc0] sm:$0xff]  ;;  %v343_v17 = vld [vmem:[%s1308_s27 + $0xc8] sm:$0xff]  ;;  %v996_v19 = vcombine.low %v334_v6, %v338_v8  ;;  %v329_v60 = vld [vmem:[%s1308_s27 + $0x58] sm:$0xff] }
  0x3e   : > { %v346_v16 = vld [vmem:[%s1308_s27 + $0xe0] sm:$0xff]  ;;  %v347_v18 = vld [vmem:[%s1308_s27 + $0xe8] sm:$0xff]  ;;  %v998_v20 = vcombine.low %v335_v9, %v339_v10  ;;  %v333_v61 = vld [vmem:[%s1308_s27 + $0x78] sm:$0xff]  ;;  %v986_v63 = vcombine.low %v321_v49, %v325_v50  ;;  %v993_v0 = vcombine.high %v328_v57, %v332_v58  ;;  %v992_v6 = vcombine.low %v328_v57, %v332_v58 }
  0x3f   : > { %v1005_v21 = vcombine.high %v342_v15, %v346_v16  ;;  %v1007_v22 = vcombine.high %v343_v17, %v347_v18  ;;  %v350_v23 = vld [vmem:[%s1308_s27 + $0x100] sm:$0xff]  ;;  %v351_v25 = vld [vmem:[%s1308_s27 + $0x108] sm:$0xff]  ;;  %v1004_v27 = vcombine.low %v342_v15, %v346_v16  ;;  %v1006_v28 = vcombine.low %v343_v17, %v347_v18  ;;  %v336_v2 = vld [vmem:[%s1308_s27 + $0x90] sm:$0xff] }
  0x40   : > { %661 = vmatpush1.bf16.msra.mxu0 %v988_v11  ;;  %702 = vmatpush1.bf16.msra.mxu1 %v990_v12  ;;  %v354_v24 = vld [vmem:[%s1308_s27 + $0x120] sm:$0xff]  ;;  %v355_v26 = vld [vmem:[%s1308_s27 + $0x128] sm:$0xff]  ;;  %v995_v1 = vcombine.high %v329_v60, %v333_v61  ;;  %v340_v3 = vld [vmem:[%s1308_s27 + $0xb0] sm:$0xff]  ;;  %v994_v7 = vcombine.low %v329_v60, %v333_v61 }
  0x41   : > { %662 = vmatprep.subr.bf16.mxu0 %v997_v13  ;;  %703 = vmatprep.subr.bf16.mxu1 %v999_v14  ;;  %v1013_v29 = vcombine.high %v350_v23, %v354_v24  ;;  %v1015_v30 = vcombine.high %v351_v25, %v355_v26  ;;  %v358_v31 = vld [vmem:[%s1308_s27 + $0x140] sm:$0xff]  ;;  %v359_v33 = vld [vmem:[%s1308_s27 + $0x148] sm:$0xff]  ;;  %v1012_v35 = vcombine.low %v350_v23, %v354_v24  ;;  %v337_v4 = vld [vmem:[%s1308_s27 + $0x98] sm:$0xff] }
  0x42   : > { %v362_v32 = vld [vmem:[%s1308_s27 + $0x160] sm:$0xff]  ;;  %v363_v34 = vld [vmem:[%s1308_s27 + $0x168] sm:$0xff]  ;;  %v1014_v36 = vcombine.low %v351_v25, %v355_v26  ;;  %v341_v5 = vld [vmem:[%s1308_s27 + $0xb8] sm:$0xff]  ;;  %v1001_v8 = vcombine.high %v336_v2, %v340_v3  ;;  %v1000_v14 = vcombine.low %v336_v2, %v340_v3 }
  0x43   : > { %v1021_v37 = vcombine.high %v358_v31, %v362_v32  ;;  %v1023_v38 = vcombine.high %v359_v33, %v363_v34  ;;  %v366_v39 = vld [vmem:[%s1308_s27 + $0x180] sm:$0xff]  ;;  %v367_v41 = vld [vmem:[%s1308_s27 + $0x188] sm:$0xff]  ;;  %v1020_v43 = vcombine.low %v358_v31, %v362_v32  ;;  %v1022_v44 = vcombine.low %v359_v33, %v363_v34  ;;  %v344_v10 = vld [vmem:[%s1308_s27 + $0xd0] sm:$0xff] }
  0x44   : > { %663 = vmatpush1.bf16.msra.mxu0 %v996_v19  ;;  %704 = vmatpush1.bf16.msra.mxu1 %v998_v20  ;;  %v370_v40 = vld [vmem:[%s1308_s27 + $0x1a0] sm:$0xff]  ;;  %v371_v42 = vld [vmem:[%s1308_s27 + $0x1a8] sm:$0xff]  ;;  %v1003_v9 = vcombine.high %v337_v4, %v341_v5  ;;  %v348_v11 = vld [vmem:[%s1308_s27 + $0xf0] sm:$0xff]  ;;  %v1002_v15 = vcombine.low %v337_v4, %v341_v5 }
  0x45   : > { %664 = vmatprep.subr.bf16.mxu0 %v1005_v21  ;;  %705 = vmatprep.subr.bf16.mxu1 %v1007_v22  ;;  %v1029_v45 = vcombine.high %v366_v39, %v370_v40  ;;  %v1031_v46 = vcombine.high %v367_v41, %v371_v42  ;;  %v1028_v51 = vcombine.low %v366_v39, %v370_v40  ;;  %v345_v12 = vld [vmem:[%s1308_s27 + $0xd8] sm:$0xff]  ;;  %v352_v18 = vld [vmem:[%s1308_s27 + $0x110] sm:$0xff] }
  0x46   : > { %v1030_v53 = vcombine.low %v367_v41, %v371_v42  ;;  %v349_v13 = vld [vmem:[%s1308_s27 + $0xf8] sm:$0xff]  ;;  %v1009_v16 = vcombine.high %v344_v10, %v348_v11  ;;  %v356_v19 = vld [vmem:[%s1308_s27 + $0x130] sm:$0xff]  ;;  %v1008_v22 = vcombine.low %v344_v10, %v348_v11 }
  0x47   : > { %v1011_v17 = vcombine.high %v345_v12, %v349_v13  ;;  %v353_v20 = vld [vmem:[%s1308_s27 + $0x118] sm:$0xff]  ;;  %v1017_v23 = vcombine.high %v352_v18, %v356_v19  ;;  %v360_v25 = vld [vmem:[%s1308_s27 + $0x150] sm:$0xff] }
  0x48   : > { %665 = vmatpush1.bf16.msra.mxu0 %v1004_v27  ;;  %706 = vmatpush1.bf16.msra.mxu1 %v1006_v28  ;;  %v357_v21 = vld [vmem:[%s1308_s27 + $0x138] sm:$0xff]  ;;  %v364_v26 = vld [vmem:[%s1308_s27 + $0x170] sm:$0xff] }
  0x49   : > { %666 = vmatprep.subr.bf16.mxu0 %v1013_v29  ;;  %707 = vmatprep.subr.bf16.mxu1 %v1015_v30  ;;  %v1019_v24 = vcombine.high %v353_v20, %v357_v21  ;;  %v361_v27 = vld [vmem:[%s1308_s27 + $0x158] sm:$0xff]  ;;  %v1016_v29 = vcombine.low %v352_v18, %v356_v19  ;;  %v1018_v30 = vcombine.low %v353_v20, %v357_v21  ;;  %v368_v33 = vld [vmem:[%s1308_s27 + $0x190] sm:$0xff] }
  0x4a   : > { %v365_v28 = vld [vmem:[%s1308_s27 + $0x178] sm:$0xff]  ;;  %v1025_v31 = vcombine.high %v360_v25, %v364_v26  ;;  %v372_v34 = vld [vmem:[%s1308_s27 + $0x1b0] sm:$0xff] }
  0x4b   : > { %v1027_v32 = vcombine.high %v361_v27, %v365_v28  ;;  %v1033_v39 = vcombine.high %v368_v33, %v372_v34  ;;  %v1032_v41 = vcombine.low %v368_v33, %v372_v34 }
  0x4c   : > { %667 = vmatpush1.bf16.msra.mxu0 %v1012_v35  ;;  %708 = vmatpush1.bf16.msra.mxu1 %v1014_v36  ;;  %v369_v35 = vld [vmem:[%s1308_s27 + $0x198] sm:$0xff] }
  0x4d   : > { %668 = vmatprep.subr.bf16.mxu0 %v1021_v37  ;;  %709 = vmatprep.subr.bf16.mxu1 %v1023_v38  ;;  %v373_v36 = vld [vmem:[%s1308_s27 + $0x1b8] sm:$0xff]  ;;  %v1024_v37 = vcombine.low %v360_v25, %v364_v26  ;;  %v1026_v38 = vcombine.low %v361_v27, %v365_v28 }
  0x4e   : > { %v1035_v40 = vcombine.high %v369_v35, %v373_v36  ;;  %v1034_v42 = vcombine.low %v369_v35, %v373_v36 }
  0x50   : > { %669 = vmatpush1.bf16.msra.mxu0 %v1020_v43  ;;  %710 = vmatpush1.bf16.msra.mxu1 %v1022_v44  ;;  %v1128_v43 = vmov 1983009808  }
  0x51   : > { %670 = vmatprep.subr.bf16.mxu0 %v1029_v45  ;;  %711 = vmatprep.subr.bf16.mxu1 %v1031_v46  ;;  %v833_v44 = vunpack.c.l.s4 %v1128_v43  ;;  %v835_v45 = vlaneseq }
  0x53   : > { %v834_v46 = vunpack.c.0.s8 %v833_v44  ;;  %v836_v47 = vshrl.u32 %v835_v45, 7 }
  0x54   : > { %671 = vmatpush1.bf16.msra.mxu0 %v1028_v51  ;;  %712 = vmatpush1.bf16.msra.mxu1 %v1030_v53 }
  0x55   : > { %740 = vmatprep.subr.bf16.mxu0 %v985_v54  ;;  %781 = vmatprep.subr.bf16.mxu1 %v987_v55  ;;  %v837_v49 = vsub.s32 %v834_v46, %v836_v47 }
  0x57   : > { %1036 = vmatmul.mubr.msk.bf16.vlgmr.msra.gmra.mrb[0].mxu0 %vm654_vm0, %v1347_v59  ;;  %1037 = vmatmul.mubr.msk.bf16.vlgmr.msra.gmra.mrb[0].mxu1 %vm654_vm0, %v1347_v59 }
  0x58   : > { %741 = vmatpush1.bf16.msra.mxu0 %v984_v62  ;;  %782 = vmatpush1.bf16.msra.mxu1 %v986_v63 }
  0x59   : > { %742 = vmatprep.subr.bf16.mxu0 %v993_v0  ;;  %783 = vmatprep.subr.bf16.mxu1 %v995_v1 }
  0x5a   : > { %772 = vmatprep.mubr.bf16.mxu0 %v1127_v56  ;;  %813 = vmatprep.mubr.bf16.mxu1 %v1127_v56  ;;  %v1010_v56 = vcombine.low %v345_v12, %v349_v13 }
  0x5c   : > { %743 = vmatpush1.bf16.msra.mxu0 %v992_v6  ;;  %784 = vmatpush1.bf16.msra.mxu1 %v994_v7 }
  0x5d   : > { %744 = vmatprep.subr.bf16.mxu0 %v1001_v8  ;;  %785 = vmatprep.subr.bf16.mxu1 %v1003_v9 }
  0x60   : > { %745 = vmatpush1.bf16.msra.mxu0 %v1000_v14  ;;  %786 = vmatpush1.bf16.msra.mxu1 %v1002_v15 }
  0x61   : > { %746 = vmatprep.subr.bf16.mxu0 %v1009_v16  ;;  %787 = vmatprep.subr.bf16.mxu1 %v1011_v17 }
  0x64   : > { %747 = vmatpush1.bf16.msra.mxu0 %v1008_v22  ;;  %788 = vmatpush1.bf16.msra.mxu1 %v1010_v56 }
  0x65   : > { %748 = vmatprep.subr.bf16.mxu0 %v1017_v23  ;;  %789 = vmatprep.subr.bf16.mxu1 %v1019_v24 }
  0x68   : > { %749 = vmatpush1.bf16.msra.mxu0 %v1016_v29  ;;  %790 = vmatpush1.bf16.msra.mxu1 %v1018_v30 }
  0x69   : > { %750 = vmatprep.subr.bf16.mxu0 %v1025_v31  ;;  %791 = vmatprep.subr.bf16.mxu1 %v1027_v32 }
  0x6c   : > { %751 = vmatpush1.bf16.msra.mxu0 %v1024_v37  ;;  %792 = vmatpush1.bf16.msra.mxu1 %v1026_v38 }
  0x6d   : > { %752 = vmatprep.subr.bf16.mxu0 %v1033_v39  ;;  %793 = vmatprep.subr.bf16.mxu1 %v1035_v40 }
  0x70   : > { %753 = vmatpush1.bf16.msra.mxu0 %v1032_v41  ;;  %794 = vmatpush1.bf16.msra.mxu1 %v1034_v42 }
  0x73   : > { %1038 = vmatmul.mubr.msk.bf16.vlgmr.msra.gmra.mrb[4].mxu0 %vm654_vm0, %v1347_v59  ;;  %1039 = vmatmul.mubr.msk.bf16.vlgmr.msra.gmra.mrb[4].mxu1 %vm654_vm0, %v1347_v59 }
 0x12a   : > { %v692_v48 = vpop.f32.mrb[0].mxu0  ;;  %v733_v50 = vpop.f32.mrb[0].mxu1 }
 0x12b   : > { %v694_v51 = vpop.f32.mrb[1].mxu0  ;;  %v735_v53 = vpop.f32.mrb[1].mxu1 }
 0x12c   : > { %v830_v52 = vcombine.low %v692_v48, %v694_v51  ;;  %v696_v54 = vpop.f32.mrb[2].mxu0  ;;  %v831_v55 = vcombine.low %v733_v50, %v735_v53  ;;  %v737_v57 = vpop.f32.mrb[2].mxu1 }
 0x12d   : > { %v697_v58 = vpop.f32.mrb[3].mxu0  ;;  %v738_v60 = vpop.f32.mrb[3].mxu1 }
 0x12e   : > { %v838_v59 = vrot.slane %v830_v52, %v837_v49  ;;  %v845_v61 = vrot.slane %v831_v55, %v837_v49 }
 0x130   : > { %v846_v62 = vcombine.low %v838_v59, %v845_v61 }
 0x132   : > { %866 = vst [vmem:[%s313_s6] sm:$0xff] %v846_v62 }
 0x146   : > { %v774_v63 = vpop.f32.mrb[4].mxu0  ;;  %v815_v0 = vpop.f32.mrb[4].mxu1 }
 0x147   : > { %v776_v1 = vpop.f32.mrb[5].mxu0  ;;  %v817_v3 = vpop.f32.mrb[5].mxu1 }
 0x148   : > { %v847_v2 = vcombine.low %v774_v63, %v776_v1  ;;  %v778_v4 = vpop.f32.mrb[6].mxu0  ;;  %v848_v5 = vcombine.low %v815_v0, %v817_v3  ;;  %v819_v6 = vpop.f32.mrb[6].mxu1 }
 0x149   : > { %v779_v7 = vpop.f32.mrb[7].mxu0  ;;  %v820_v9 = vpop.f32.mrb[7].mxu1 }
 0x14a   : > { %v855_v8 = vrot.slane %v847_v2, %v837_v49  ;;  %v862_v10 = vrot.slane %v848_v5, %v837_v49 }
 0x14c   : > { %v863_v11 = vcombine.low %v855_v8, %v862_v10 }
 0x14e   : > { %867 = vst [vmem:[%s313_s6 + $0x8] sm:$0xff] %v863_v11 }
 0x14f PF: > { %s12_s13 = sadd.s32 1, %s1125_s13   ;;  %s1403_s9 = smov %s1113_s10 }
 0x150   : > { %p9_p10 = scmp.ge.s32.totalorder %s12_s13, 6   ;;  %s1404_s10 = smov %s1179_s17 }
 0x151   : > { %s1405_s11 = smov %s1121_s12  ;;  %s1406_s12 = smov %s1408_s14 }
 0x152   :  { %11 = sbr.rel (!%p9_p10) target bundleno = 3 (0x3), region = 89 }

// kernel: generator_forward.6
= control target key start
LH: loop header
LB: loop body
LE: loop exit
PB: predicated region body
PF: predicated region fallthrough
CT: control target
= control target key end

     0   :  { %s2006_s15 = smov 0   ;;  %s2008_s16 = smov 0   ;;  %s2650_s0 = inlined_call_operand.vmem [shape: f32[32,256], index: 0, kind: input, shape index: {}]   ;;  %s2651_s1 = inlined_call_operand.vmem [shape: f32[1,256], index: 1, kind: input, shape index: {}]   ;;  %s2652_s2 = inlined_call_operand.vmem [shape: f32[1,256], index: 2, kind: input, shape index: {}]   ;;  %s2653_s3 = inlined_call_operand.vmem [shape: bf16[256,2048], index: 3, kind: input, shape index: {}]   ;;  %s2654_s4 = inlined_call_operand.vmem [shape: f32[32,2048], index: 4, kind: output, shape index: {}]  }
   0x1   :  { %s2010_s17 = smov 0   ;;  %s2012_s18 = smov 0  }
   0x2   :  { %s2014_s19 = smov 0  }
   0x3 LB: > { %s23_s20 = sadd.s32 1, %s1975_s18  ;;  %s1755_s21 = sadd.s32 4294967295, %s1979_s19   ;;  %s1979_s19 = sphi %s2014_s19, %s14_s19   ;;  %s1975_s18 = sphi %s2012_s18, %s2659_s18   ;;  %s1971_s17 = sphi %s2010_s17, %s2658_s17   ;;  %s1967_s16 = sphi %s2008_s16, %s2657_s16   ;;  %s1963_s15 = sphi %s2006_s15, %s2656_s15  }
   0x4   : > { %p24_p0 = scmp.ge.s32.totalorder %s23_s20, 2  ;;  %p108_p1 = scmp.ne.s32.totalorder %s1967_s16, %s1963_s15 }
   0x5   : > { %p109_p2 = scmp.eq.s32.totalorder %s1979_s19, 0  ;;  %p140_p4 = scmp.eq.s32.totalorder %s1755_s21, 1 }
   0x6   : > { %s2661_s20 = smov (%p24_p0, %s23_s20), 0  ;;  %s101_s23 = sadd.s32 1, %s1967_s16 }
   0x7   : > { %p110_p3 = por %p109_p2, %p108_p1  ;;  %s98_s22 = ssub.s32 %s1975_s18, %s2661_s20 }
   0x8   : > { %p99_p5 = scmp.eq.s32.totalorder %s98_s22, 0  ;;  %p2041_p6 = por %p140_p4, %p108_p1 }
   0x9   : > { %p1759_p7 = scmp.ge.s32.totalorder %s1979_s19, 2 }
   0xa   : > { %s2046_s25 = scalar_select %p99_p5, %s1967_s16, %s101_s23  }
   0xb   : > { %178 = sbr.rel (%p1759_p7) target bundleno = 86 (0x56), region = 28 }
  0x12   : > { %181 = sbr.rel (!%p110_p3) target bundleno = 86 (0x56), region = 32  ;;  %s183_s26 = sand.u32 (%p110_p3), 1, %s1967_s16  }
  0x13   : > { %s1899_s27 = sshll.u32 (%p110_p3), %s1975_s18, 5  ;;  %s1760_s28 = sshll.u32 (%p110_p3), %s183_s26, 10 }
  0x14   : > { %s2054_s5 = scalar_lea.vmem (%p110_p3), %s2653_s3, %s1899_s27  ;;  %s2059_s6 = scalar_lea.vmem (%p110_p3), [#allocation2], %s1760_s28 }
  0x15   : > { %v201_v0 = vld [vmem:[%s2054_s5] sm:$0xff] (%p110_p3)  ;;  %v203_v1 = vld [vmem:[%s2054_s5 + $0x8] sm:$0xff] (%p110_p3)  ;;  %v205_v2 = vld [vmem:[%s2054_s5 + $0x10] sm:$0xff] (%p110_p3) }
  0x16   : > { %202 = vst [vmem:[%s2059_s6] sm:$0xff] (%p110_p3), %v201_v0  ;;  %204 = vst [vmem:[%s2059_s6 + $0x8] sm:$0xff] (%p110_p3), %v203_v1  ;;  %v207_v3 = vld [vmem:[%s2054_s5 + $0x18] sm:$0xff] (%p110_p3)  ;;  %v209_v4 = vld [vmem:[%s2054_s5 + $0x40] sm:$0xff] (%p110_p3) }
  0x17   : > { %206 = vst [vmem:[%s2059_s6 + $0x10] sm:$0xff] (%p110_p3), %v205_v2  ;;  %v211_v5 = vld [vmem:[%s2054_s5 + $0x48] sm:$0xff] (%p110_p3)  ;;  %208 = vst [vmem:[%s2059_s6 + $0x18] sm:$0xff] (%p110_p3), %v207_v3  ;;  %v213_v6 = vld [vmem:[%s2054_s5 + $0x50] sm:$0xff] (%p110_p3) }
  0x18   : > { %210 = vst [vmem:[%s2059_s6 + $0x20] sm:$0xff] (%p110_p3), %v209_v4  ;;  %212 = vst [vmem:[%s2059_s6 + $0x28] sm:$0xff] (%p110_p3), %v211_v5  ;;  %v215_v7 = vld [vmem:[%s2054_s5 + $0x58] sm:$0xff] (%p110_p3)  ;;  %v217_v8 = vld [vmem:[%s2054_s5 + $0x80] sm:$0xff] (%p110_p3) }
  0x19   : > { %214 = vst [vmem:[%s2059_s6 + $0x30] sm:$0xff] %v213_v6  ;;  %216 = vst [vmem:[%s2059_s6 + $0x38] sm:$0xff] %v215_v7  ;;  %v219_v9 = vld [vmem:[%s2054_s5 + $0x88] sm:$0xff]  ;;  %v221_v10 = vld [vmem:[%s2054_s5 + $0x90] sm:$0xff] }
  0x1a   : > { %218 = vst [vmem:[%s2059_s6 + $0x40] sm:$0xff] %v217_v8  ;;  %v223_v11 = vld [vmem:[%s2054_s5 + $0x98] sm:$0xff]  ;;  %220 = vst [vmem:[%s2059_s6 + $0x48] sm:$0xff] %v219_v9  ;;  %v225_v12 = vld [vmem:[%s2054_s5 + $0xc0] sm:$0xff] }
  0x1b   : > { %222 = vst [vmem:[%s2059_s6 + $0x50] sm:$0xff] %v221_v10  ;;  %224 = vst [vmem:[%s2059_s6 + $0x58] sm:$0xff] %v223_v11  ;;  %v227_v13 = vld [vmem:[%s2054_s5 + $0xc8] sm:$0xff]  ;;  %v229_v14 = vld [vmem:[%s2054_s5 + $0xd0] sm:$0xff] }
  0x1c   : > { %226 = vst [vmem:[%s2059_s6 + $0x60] sm:$0xff] %v225_v12  ;;  %228 = vst [vmem:[%s2059_s6 + $0x68] sm:$0xff] %v227_v13  ;;  %v231_v15 = vld [vmem:[%s2054_s5 + $0xd8] sm:$0xff]  ;;  %v233_v16 = vld [vmem:[%s2054_s5 + $0x100] sm:$0xff] }
  0x1d   : > { %230 = vst [vmem:[%s2059_s6 + $0x70] sm:$0xff] %v229_v14  ;;  %v235_v17 = vld [vmem:[%s2054_s5 + $0x108] sm:$0xff]  ;;  %232 = vst [vmem:[%s2059_s6 + $0x78] sm:$0xff] %v231_v15  ;;  %v237_v18 = vld [vmem:[%s2054_s5 + $0x110] sm:$0xff] }
  0x1e   : > { %234 = vst [vmem:[%s2059_s6 + $0x80] sm:$0xff] %v233_v16  ;;  %236 = vst [vmem:[%s2059_s6 + $0x88] sm:$0xff] %v235_v17  ;;  %v239_v19 = vld [vmem:[%s2054_s5 + $0x118] sm:$0xff]  ;;  %v241_v20 = vld [vmem:[%s2054_s5 + $0x140] sm:$0xff] }
  0x1f   : > { %238 = vst [vmem:[%s2059_s6 + $0x90] sm:$0xff] %v237_v18  ;;  %240 = vst [vmem:[%s2059_s6 + $0x98] sm:$0xff] %v239_v19  ;;  %v243_v21 = vld [vmem:[%s2054_s5 + $0x148] sm:$0xff]  ;;  %v245_v22 = vld [vmem:[%s2054_s5 + $0x150] sm:$0xff] }
  0x20   : > { %242 = vst [vmem:[%s2059_s6 + $0xa0] sm:$0xff] %v241_v20  ;;  %v247_v23 = vld [vmem:[%s2054_s5 + $0x158] sm:$0xff]  ;;  %244 = vst [vmem:[%s2059_s6 + $0xa8] sm:$0xff] %v243_v21  ;;  %v249_v24 = vld [vmem:[%s2054_s5 + $0x180] sm:$0xff] }
  0x21   : > { %246 = vst [vmem:[%s2059_s6 + $0xb0] sm:$0xff] %v245_v22  ;;  %248 = vst [vmem:[%s2059_s6 + $0xb8] sm:$0xff] %v247_v23  ;;  %v251_v25 = vld [vmem:[%s2054_s5 + $0x188] sm:$0xff]  ;;  %v253_v26 = vld [vmem:[%s2054_s5 + $0x190] sm:$0xff] }
  0x22   : > { %250 = vst [vmem:[%s2059_s6 + $0xc0] sm:$0xff] %v249_v24  ;;  %252 = vst [vmem:[%s2059_s6 + $0xc8] sm:$0xff] %v251_v25  ;;  %v255_v27 = vld [vmem:[%s2054_s5 + $0x198] sm:$0xff]  ;;  %v257_v28 = vld [vmem:[%s2054_s5 + $0x1c0] sm:$0xff] }
  0x23   : > { %254 = vst [vmem:[%s2059_s6 + $0xd0] sm:$0xff] %v253_v26  ;;  %v259_v29 = vld [vmem:[%s2054_s5 + $0x1c8] sm:$0xff]  ;;  %256 = vst [vmem:[%s2059_s6 + $0xd8] sm:$0xff] %v255_v27  ;;  %v261_v30 = vld [vmem:[%s2054_s5 + $0x1d0] sm:$0xff] }
  0x24   : > { %258 = vst [vmem:[%s2059_s6 + $0xe0] sm:$0xff] %v257_v28  ;;  %260 = vst [vmem:[%s2059_s6 + $0xe8] sm:$0xff] %v259_v29  ;;  %v263_v31 = vld [vmem:[%s2054_s5 + $0x1d8] sm:$0xff]  ;;  %v265_v32 = vld [vmem:[%s2054_s5 + $0x200] sm:$0xff] }
  0x25   : > { %262 = vst [vmem:[%s2059_s6 + $0xf0] sm:$0xff] %v261_v30  ;;  %264 = vst [vmem:[%s2059_s6 + $0xf8] sm:$0xff] %v263_v31  ;;  %v267_v33 = vld [vmem:[%s2054_s5 + $0x208] sm:$0xff]  ;;  %v269_v34 = vld [vmem:[%s2054_s5 + $0x210] sm:$0xff] }
  0x26   : > { %266 = vst [vmem:[%s2059_s6 + $0x100] sm:$0xff] %v265_v32  ;;  %v271_v35 = vld [vmem:[%s2054_s5 + $0x218] sm:$0xff]  ;;  %268 = vst [vmem:[%s2059_s6 + $0x108] sm:$0xff] %v267_v33  ;;  %v273_v36 = vld [vmem:[%s2054_s5 + $0x240] sm:$0xff] }
  0x27   : > { %270 = vst [vmem:[%s2059_s6 + $0x110] sm:$0xff] %v269_v34  ;;  %272 = vst [vmem:[%s2059_s6 + $0x118] sm:$0xff] %v271_v35  ;;  %v275_v37 = vld [vmem:[%s2054_s5 + $0x248] sm:$0xff]  ;;  %v277_v38 = vld [vmem:[%s2054_s5 + $0x250] sm:$0xff] }
  0x28   : > { %274 = vst [vmem:[%s2059_s6 + $0x120] sm:$0xff] %v273_v36  ;;  %276 = vst [vmem:[%s2059_s6 + $0x128] sm:$0xff] %v275_v37  ;;  %v279_v39 = vld [vmem:[%s2054_s5 + $0x258] sm:$0xff]  ;;  %v281_v40 = vld [vmem:[%s2054_s5 + $0x280] sm:$0xff] }
  0x29   : > { %278 = vst [vmem:[%s2059_s6 + $0x130] sm:$0xff] %v277_v38  ;;  %v283_v41 = vld [vmem:[%s2054_s5 + $0x288] sm:$0xff]  ;;  %280 = vst [vmem:[%s2059_s6 + $0x138] sm:$0xff] %v279_v39  ;;  %v285_v42 = vld [vmem:[%s2054_s5 + $0x290] sm:$0xff] }
  0x2a   : > { %282 = vst [vmem:[%s2059_s6 + $0x140] sm:$0xff] %v281_v40  ;;  %284 = vst [vmem:[%s2059_s6 + $0x148] sm:$0xff] %v283_v41  ;;  %v287_v43 = vld [vmem:[%s2054_s5 + $0x298] sm:$0xff]  ;;  %v289_v44 = vld [vmem:[%s2054_s5 + $0x2c0] sm:$0xff] }
  0x2b   : > { %286 = vst [vmem:[%s2059_s6 + $0x150] sm:$0xff] %v285_v42  ;;  %288 = vst [vmem:[%s2059_s6 + $0x158] sm:$0xff] %v287_v43  ;;  %v291_v45 = vld [vmem:[%s2054_s5 + $0x2c8] sm:$0xff]  ;;  %v293_v46 = vld [vmem:[%s2054_s5 + $0x2d0] sm:$0xff] }
  0x2c   : > { %290 = vst [vmem:[%s2059_s6 + $0x160] sm:$0xff] %v289_v44  ;;  %v295_v47 = vld [vmem:[%s2054_s5 + $0x2d8] sm:$0xff]  ;;  %292 = vst [vmem:[%s2059_s6 + $0x168] sm:$0xff] %v291_v45  ;;  %v297_v48 = vld [vmem:[%s2054_s5 + $0x300] sm:$0xff] }
  0x2d   : > { %294 = vst [vmem:[%s2059_s6 + $0x170] sm:$0xff] %v293_v46  ;;  %296 = vst [vmem:[%s2059_s6 + $0x178] sm:$0xff] %v295_v47  ;;  %v299_v49 = vld [vmem:[%s2054_s5 + $0x308] sm:$0xff]  ;;  %v301_v50 = vld [vmem:[%s2054_s5 + $0x310] sm:$0xff] }
  0x2e   : > { %298 = vst [vmem:[%s2059_s6 + $0x180] sm:$0xff] %v297_v48  ;;  %300 = vst [vmem:[%s2059_s6 + $0x188] sm:$0xff] %v299_v49  ;;  %v303_v51 = vld [vmem:[%s2054_s5 + $0x318] sm:$0xff]  ;;  %v305_v52 = vld [vmem:[%s2054_s5 + $0x340] sm:$0xff] }
  0x2f   : > { %302 = vst [vmem:[%s2059_s6 + $0x190] sm:$0xff] %v301_v50  ;;  %v307_v53 = vld [vmem:[%s2054_s5 + $0x348] sm:$0xff]  ;;  %304 = vst [vmem:[%s2059_s6 + $0x198] sm:$0xff] %v303_v51  ;;  %v309_v54 = vld [vmem:[%s2054_s5 + $0x350] sm:$0xff] }
  0x30   : > { %306 = vst [vmem:[%s2059_s6 + $0x1a0] sm:$0xff] %v305_v52  ;;  %308 = vst [vmem:[%s2059_s6 + $0x1a8] sm:$0xff] %v307_v53  ;;  %v311_v55 = vld [vmem:[%s2054_s5 + $0x358] sm:$0xff]  ;;  %v313_v56 = vld [vmem:[%s2054_s5 + $0x380] sm:$0xff] }
  0x31   : > { %310 = vst [vmem:[%s2059_s6 + $0x1b0] sm:$0xff] %v309_v54  ;;  %312 = vst [vmem:[%s2059_s6 + $0x1b8] sm:$0xff] %v311_v55  ;;  %v315_v57 = vld [vmem:[%s2054_s5 + $0x388] sm:$0xff]  ;;  %v317_v58 = vld [vmem:[%s2054_s5 + $0x390] sm:$0xff] }
  0x32   : > { %314 = vst [vmem:[%s2059_s6 + $0x1c0] sm:$0xff] %v313_v56  ;;  %v319_v59 = vld [vmem:[%s2054_s5 + $0x398] sm:$0xff]  ;;  %316 = vst [vmem:[%s2059_s6 + $0x1c8] sm:$0xff] %v315_v57  ;;  %v321_v60 = vld [vmem:[%s2054_s5 + $0x3c0] sm:$0xff] }
  0x33   : > { %318 = vst [vmem:[%s2059_s6 + $0x1d0] sm:$0xff] %v317_v58  ;;  %320 = vst [vmem:[%s2059_s6 + $0x1d8] sm:$0xff] %v319_v59  ;;  %v323_v61 = vld [vmem:[%s2054_s5 + $0x3c8] sm:$0xff]  ;;  %v325_v62 = vld [vmem:[%s2054_s5 + $0x3d0] sm:$0xff] }
  0x34   : > { %322 = vst [vmem:[%s2059_s6 + $0x1e0] sm:$0xff] %v321_v60  ;;  %324 = vst [vmem:[%s2059_s6 + $0x1e8] sm:$0xff] %v323_v61  ;;  %v327_v63 = vld [vmem:[%s2054_s5 + $0x3d8] sm:$0xff]  ;;  %v329_v0 = vld [vmem:[%s2054_s5 + $0x400] sm:$0xff] }
  0x35   : > { %326 = vst [vmem:[%s2059_s6 + $0x1f0] sm:$0xff] %v325_v62  ;;  %v331_v1 = vld [vmem:[%s2054_s5 + $0x408] sm:$0xff]  ;;  %328 = vst [vmem:[%s2059_s6 + $0x1f8] sm:$0xff] %v327_v63  ;;  %v333_v2 = vld [vmem:[%s2054_s5 + $0x410] sm:$0xff] }
  0x36   : > { %330 = vst [vmem:[%s2059_s6 + $0x200] sm:$0xff] %v329_v0  ;;  %332 = vst [vmem:[%s2059_s6 + $0x208] sm:$0xff] %v331_v1  ;;  %v335_v3 = vld [vmem:[%s2054_s5 + $0x418] sm:$0xff]  ;;  %v337_v4 = vld [vmem:[%s2054_s5 + $0x440] sm:$0xff] }
  0x37   : > { %334 = vst [vmem:[%s2059_s6 + $0x210] sm:$0xff] %v333_v2  ;;  %336 = vst [vmem:[%s2059_s6 + $0x218] sm:$0xff] %v335_v3  ;;  %v339_v5 = vld [vmem:[%s2054_s5 + $0x448] sm:$0xff]  ;;  %v341_v6 = vld [vmem:[%s2054_s5 + $0x450] sm:$0xff] }
  0x38   : > { %338 = vst [vmem:[%s2059_s6 + $0x220] sm:$0xff] %v337_v4  ;;  %v343_v7 = vld [vmem:[%s2054_s5 + $0x458] sm:$0xff]  ;;  %340 = vst [vmem:[%s2059_s6 + $0x228] sm:$0xff] %v339_v5  ;;  %v345_v8 = vld [vmem:[%s2054_s5 + $0x480] sm:$0xff] }
  0x39   : > { %342 = vst [vmem:[%s2059_s6 + $0x230] sm:$0xff] %v341_v6  ;;  %344 = vst [vmem:[%s2059_s6 + $0x238] sm:$0xff] %v343_v7  ;;  %v347_v9 = vld [vmem:[%s2054_s5 + $0x488] sm:$0xff]  ;;  %v349_v10 = vld [vmem:[%s2054_s5 + $0x490] sm:$0xff] }
  0x3a   : > { %346 = vst [vmem:[%s2059_s6 + $0x240] sm:$0xff] %v345_v8  ;;  %348 = vst [vmem:[%s2059_s6 + $0x248] sm:$0xff] %v347_v9  ;;  %v351_v11 = vld [vmem:[%s2054_s5 + $0x498] sm:$0xff]  ;;  %v353_v12 = vld [vmem:[%s2054_s5 + $0x4c0] sm:$0xff] }
  0x3b   : > { %350 = vst [vmem:[%s2059_s6 + $0x250] sm:$0xff] %v349_v10  ;;  %v355_v13 = vld [vmem:[%s2054_s5 + $0x4c8] sm:$0xff]  ;;  %352 = vst [vmem:[%s2059_s6 + $0x258] sm:$0xff] %v351_v11  ;;  %v357_v14 = vld [vmem:[%s2054_s5 + $0x4d0] sm:$0xff] }
  0x3c   : > { %354 = vst [vmem:[%s2059_s6 + $0x260] sm:$0xff] %v353_v12  ;;  %356 = vst [vmem:[%s2059_s6 + $0x268] sm:$0xff] %v355_v13  ;;  %v359_v15 = vld [vmem:[%s2054_s5 + $0x4d8] sm:$0xff]  ;;  %v361_v16 = vld [vmem:[%s2054_s5 + $0x500] sm:$0xff] }
  0x3d   : > { %358 = vst [vmem:[%s2059_s6 + $0x270] sm:$0xff] %v357_v14  ;;  %360 = vst [vmem:[%s2059_s6 + $0x278] sm:$0xff] %v359_v15  ;;  %v363_v17 = vld [vmem:[%s2054_s5 + $0x508] sm:$0xff]  ;;  %v365_v18 = vld [vmem:[%s2054_s5 + $0x510] sm:$0xff] }
  0x3e   : > { %362 = vst [vmem:[%s2059_s6 + $0x280] sm:$0xff] %v361_v16  ;;  %v367_v19 = vld [vmem:[%s2054_s5 + $0x518] sm:$0xff]  ;;  %364 = vst [vmem:[%s2059_s6 + $0x288] sm:$0xff] %v363_v17  ;;  %v369_v20 = vld [vmem:[%s2054_s5 + $0x540] sm:$0xff] }
  0x3f   : > { %366 = vst [vmem:[%s2059_s6 + $0x290] sm:$0xff] %v365_v18  ;;  %368 = vst [vmem:[%s2059_s6 + $0x298] sm:$0xff] %v367_v19  ;;  %v371_v21 = vld [vmem:[%s2054_s5 + $0x548] sm:$0xff]  ;;  %v373_v22 = vld [vmem:[%s2054_s5 + $0x550] sm:$0xff] }
  0x40   : > { %370 = vst [vmem:[%s2059_s6 + $0x2a0] sm:$0xff] %v369_v20  ;;  %372 = vst [vmem:[%s2059_s6 + $0x2a8] sm:$0xff] %v371_v21  ;;  %v375_v23 = vld [vmem:[%s2054_s5 + $0x558] sm:$0xff]  ;;  %v377_v24 = vld [vmem:[%s2054_s5 + $0x580] sm:$0xff] }
  0x41   : > { %374 = vst [vmem:[%s2059_s6 + $0x2b0] sm:$0xff] %v373_v22  ;;  %v379_v25 = vld [vmem:[%s2054_s5 + $0x588] sm:$0xff]  ;;  %376 = vst [vmem:[%s2059_s6 + $0x2b8] sm:$0xff] %v375_v23  ;;  %v381_v26 = vld [vmem:[%s2054_s5 + $0x590] sm:$0xff] }
  0x42   : > { %378 = vst [vmem:[%s2059_s6 + $0x2c0] sm:$0xff] %v377_v24  ;;  %380 = vst [vmem:[%s2059_s6 + $0x2c8] sm:$0xff] %v379_v25  ;;  %v383_v27 = vld [vmem:[%s2054_s5 + $0x598] sm:$0xff]  ;;  %v385_v28 = vld [vmem:[%s2054_s5 + $0x5c0] sm:$0xff] }
  0x43   : > { %382 = vst [vmem:[%s2059_s6 + $0x2d0] sm:$0xff] %v381_v26  ;;  %384 = vst [vmem:[%s2059_s6 + $0x2d8] sm:$0xff] %v383_v27  ;;  %v387_v29 = vld [vmem:[%s2054_s5 + $0x5c8] sm:$0xff]  ;;  %v389_v30 = vld [vmem:[%s2054_s5 + $0x5d0] sm:$0xff] }
  0x44   : > { %386 = vst [vmem:[%s2059_s6 + $0x2e0] sm:$0xff] %v385_v28  ;;  %v391_v31 = vld [vmem:[%s2054_s5 + $0x5d8] sm:$0xff]  ;;  %388 = vst [vmem:[%s2059_s6 + $0x2e8] sm:$0xff] %v387_v29  ;;  %v393_v32 = vld [vmem:[%s2054_s5 + $0x600] sm:$0xff] }
  0x45   : > { %390 = vst [vmem:[%s2059_s6 + $0x2f0] sm:$0xff] %v389_v30  ;;  %392 = vst [vmem:[%s2059_s6 + $0x2f8] sm:$0xff] %v391_v31  ;;  %v395_v33 = vld [vmem:[%s2054_s5 + $0x608] sm:$0xff]  ;;  %v397_v34 = vld [vmem:[%s2054_s5 + $0x610] sm:$0xff] }
  0x46   : > { %394 = vst [vmem:[%s2059_s6 + $0x300] sm:$0xff] %v393_v32  ;;  %396 = vst [vmem:[%s2059_s6 + $0x308] sm:$0xff] %v395_v33  ;;  %v399_v35 = vld [vmem:[%s2054_s5 + $0x618] sm:$0xff]  ;;  %v401_v36 = vld [vmem:[%s2054_s5 + $0x640] sm:$0xff] }
  0x47   : > { %398 = vst [vmem:[%s2059_s6 + $0x310] sm:$0xff] %v397_v34  ;;  %v403_v37 = vld [vmem:[%s2054_s5 + $0x648] sm:$0xff]  ;;  %400 = vst [vmem:[%s2059_s6 + $0x318] sm:$0xff] %v399_v35  ;;  %v405_v38 = vld [vmem:[%s2054_s5 + $0x650] sm:$0xff] }
  0x48   : > { %402 = vst [vmem:[%s2059_s6 + $0x320] sm:$0xff] %v401_v36  ;;  %404 = vst [vmem:[%s2059_s6 + $0x328] sm:$0xff] %v403_v37  ;;  %v407_v39 = vld [vmem:[%s2054_s5 + $0x658] sm:$0xff]  ;;  %v409_v40 = vld [vmem:[%s2054_s5 + $0x680] sm:$0xff] }
  0x49   : > { %406 = vst [vmem:[%s2059_s6 + $0x330] sm:$0xff] %v405_v38  ;;  %408 = vst [vmem:[%s2059_s6 + $0x338] sm:$0xff] %v407_v39  ;;  %v411_v41 = vld [vmem:[%s2054_s5 + $0x688] sm:$0xff]  ;;  %v413_v42 = vld [vmem:[%s2054_s5 + $0x690] sm:$0xff] }
  0x4a   : > { %410 = vst [vmem:[%s2059_s6 + $0x340] sm:$0xff] %v409_v40  ;;  %v415_v43 = vld [vmem:[%s2054_s5 + $0x698] sm:$0xff]  ;;  %412 = vst [vmem:[%s2059_s6 + $0x348] sm:$0xff] %v411_v41  ;;  %v417_v44 = vld [vmem:[%s2054_s5 + $0x6c0] sm:$0xff] }
  0x4b   : > { %414 = vst [vmem:[%s2059_s6 + $0x350] sm:$0xff] %v413_v42  ;;  %416 = vst [vmem:[%s2059_s6 + $0x358] sm:$0xff] %v415_v43  ;;  %v419_v45 = vld [vmem:[%s2054_s5 + $0x6c8] sm:$0xff]  ;;  %v421_v46 = vld [vmem:[%s2054_s5 + $0x6d0] sm:$0xff] }
  0x4c   : > { %418 = vst [vmem:[%s2059_s6 + $0x360] sm:$0xff] %v417_v44  ;;  %420 = vst [vmem:[%s2059_s6 + $0x368] sm:$0xff] %v419_v45  ;;  %v423_v47 = vld [vmem:[%s2054_s5 + $0x6d8] sm:$0xff]  ;;  %v425_v48 = vld [vmem:[%s2054_s5 + $0x700] sm:$0xff] }
  0x4d   : > { %422 = vst [vmem:[%s2059_s6 + $0x370] sm:$0xff] %v421_v46  ;;  %v427_v49 = vld [vmem:[%s2054_s5 + $0x708] sm:$0xff]  ;;  %424 = vst [vmem:[%s2059_s6 + $0x378] sm:$0xff] %v423_v47  ;;  %v429_v50 = vld [vmem:[%s2054_s5 + $0x710] sm:$0xff] }
  0x4e   : > { %426 = vst [vmem:[%s2059_s6 + $0x380] sm:$0xff] %v425_v48  ;;  %428 = vst [vmem:[%s2059_s6 + $0x388] sm:$0xff] %v427_v49  ;;  %v431_v51 = vld [vmem:[%s2054_s5 + $0x718] sm:$0xff]  ;;  %v433_v52 = vld [vmem:[%s2054_s5 + $0x740] sm:$0xff] }
  0x4f   : > { %430 = vst [vmem:[%s2059_s6 + $0x390] sm:$0xff] %v429_v50  ;;  %432 = vst [vmem:[%s2059_s6 + $0x398] sm:$0xff] %v431_v51  ;;  %v435_v53 = vld [vmem:[%s2054_s5 + $0x748] sm:$0xff]  ;;  %v437_v54 = vld [vmem:[%s2054_s5 + $0x750] sm:$0xff] }
  0x50   : > { %434 = vst [vmem:[%s2059_s6 + $0x3a0] sm:$0xff] %v433_v52  ;;  %v439_v55 = vld [vmem:[%s2054_s5 + $0x758] sm:$0xff]  ;;  %436 = vst [vmem:[%s2059_s6 + $0x3a8] sm:$0xff] %v435_v53  ;;  %v441_v56 = vld [vmem:[%s2054_s5 + $0x780] sm:$0xff] }
  0x51   : > { %438 = vst [vmem:[%s2059_s6 + $0x3b0] sm:$0xff] %v437_v54  ;;  %440 = vst [vmem:[%s2059_s6 + $0x3b8] sm:$0xff] %v439_v55  ;;  %v443_v57 = vld [vmem:[%s2054_s5 + $0x788] sm:$0xff]  ;;  %v445_v58 = vld [vmem:[%s2054_s5 + $0x790] sm:$0xff] }
  0x52   : > { %442 = vst [vmem:[%s2059_s6 + $0x3c0] sm:$0xff] %v441_v56  ;;  %444 = vst [vmem:[%s2059_s6 + $0x3c8] sm:$0xff] %v443_v57  ;;  %v447_v59 = vld [vmem:[%s2054_s5 + $0x798] sm:$0xff]  ;;  %v449_v60 = vld [vmem:[%s2054_s5 + $0x7c0] sm:$0xff] }
  0x53   : > { %446 = vst [vmem:[%s2059_s6 + $0x3d0] sm:$0xff] %v445_v58  ;;  %v451_v61 = vld [vmem:[%s2054_s5 + $0x7c8] sm:$0xff]  ;;  %448 = vst [vmem:[%s2059_s6 + $0x3d8] sm:$0xff] %v447_v59  ;;  %v453_v62 = vld [vmem:[%s2054_s5 + $0x7d0] sm:$0xff] }
  0x54   : > { %450 = vst [vmem:[%s2059_s6 + $0x3e0] sm:$0xff] %v449_v60  ;;  %452 = vst [vmem:[%s2059_s6 + $0x3e8] sm:$0xff] %v451_v61  ;;  %v455_v63 = vld [vmem:[%s2054_s5 + $0x7d8] sm:$0xff] }
  0x55   : > { %454 = vst [vmem:[%s2059_s6 + $0x3f0] sm:$0xff] %v453_v62  ;;  %456 = vst [vmem:[%s2059_s6 + $0x3f8] sm:$0xff] %v455_v63 }
  0x56 PF: > { %p1763_p8 = scmp.ge.s32.totalorder %s1979_s19, 1  ;;  %p461_p9 = scmp.lt.s32.totalorder %s1979_s19, 3 }
  0x58   : > { %p462_p10 = pnand %p1763_p8, %p461_p9 }
  0x59   : > { %s468_s7 = sand.u32 (!%p462_p10), 1, %s1963_s15   ;;  %v518_v0 = vlaneseq (!%p462_p10)  ;;  %v2322_v1 = vld [vmem:[%s2651_s1] sm:$0x3] (!%p462_p10)  ;;  %v509_v25 = vld [vmem:[%s2650_s0 + $0x8] sm:$0xff] (!%p462_p10)  ;;  %v511_v26 = vld [vmem:[%s2650_s0 + $0x18] sm:$0xff] (!%p462_p10) }
  0x5a   : > { %465 = sbr.rel (%p462_p10) target bundleno = 456 (0x1c8), region = 55  ;;  %s1764_s8 = sshll.u32 (!%p462_p10), %s468_s7, 10  ;;  %v2334_v6 = vld [vmem:[%s2652_s2] sm:$0x3] (!%p462_p10) }
  0x5b   : > { %v2324_v2 = vshrl.u32 (!%p462_p10), %v518_v0, 7  ;;  %s2326_s11 = scalar_lea.vmem (!%p462_p10), [#allocation2], %s1764_s8 }
  0x5c   : > { %v568_v3 = vld [vmem:[%s2326_s11] sm:$0xff] (!%p462_p10)  ;;  %v569_v5 = vld [vmem:[%s2326_s11 + $0x8] sm:$0xff] (!%p462_p10) }
  0x5d   : > { %v572_v4 = vld [vmem:[%s2326_s11 + $0x20] sm:$0xff] (!%p462_p10)  ;;  %v573_v8 = vld [vmem:[%s2326_s11 + $0x28] sm:$0xff] (!%p462_p10)  ;;  %v524_v12 = vsub.s32 (!%p462_p10), 1, %v2324_v2 }
  0x5e   : > { %v1767_v7 = vcombine.high (!%p462_p10), %v568_v3, %v572_v4  ;;  %v1766_v9 = vcombine.low (!%p462_p10), %v568_v3, %v572_v4  ;;  %v576_v10 = vld [vmem:[%s2326_s11 + $0x40] sm:$0xff] (!%p462_p10)  ;;  %v1769_v13 = vcombine.high (!%p462_p10), %v569_v5, %v573_v8  ;;  %v1768_v14 = vcombine.low (!%p462_p10), %v569_v5, %v573_v8  ;;  %v577_v16 = vld [vmem:[%s2326_s11 + $0x48] sm:$0xff] (!%p462_p10) }
  0x5f   : > { %v580_v11 = vld [vmem:[%s2326_s11 + $0x60] sm:$0xff] (!%p462_p10)  ;;  %v581_v17 = vld [vmem:[%s2326_s11 + $0x68] sm:$0xff] (!%p462_p10)  ;;  %v2347_v23 = vrot.slane (!%p462_p10), %v2322_v1, %v524_v12  ;;  %v2356_v29 = vrot.slane (!%p462_p10), %v2334_v6, %v524_v12 }
  0x60   : > { %v1775_v15 = vcombine.high (!%p462_p10), %v576_v10, %v580_v11  ;;  %v584_v18 = vld [vmem:[%s2326_s11 + $0x80] sm:$0xff] (!%p462_p10)  ;;  %1336 = vmatprep.subr.bf16.mxu0 (!%p462_p10), %v1767_v7  ;;  %v1777_v19 = vcombine.high (!%p462_p10), %v577_v16, %v581_v17  ;;  %v585_v21 = vld [vmem:[%s2326_s11 + $0x88] sm:$0xff] (!%p462_p10)  ;;  %1389 = vmatprep.subr.bf16.mxu1 (!%p462_p10), %v1769_v13  ;;  %v1774_v24 = vcombine.low (!%p462_p10), %v576_v10, %v580_v11 }
  0x61   : > { %v588_v20 = vld [vmem:[%s2326_s11 + $0xa0] sm:$0xff]  ;;  %v589_v22 = vld [vmem:[%s2326_s11 + $0xa8] sm:$0xff]  ;;  %1337 = vmatpush1.bf16.msra.mxu0 %v1766_v9  ;;  %1390 = vmatpush1.bf16.msra.mxu1 %v1768_v14  ;;  %v1776_v27 = vcombine.low %v577_v16, %v581_v17  ;;  %v529_v35 = vmul.f32 %v2347_v23, %v509_v25  ;;  %v531_v36 = vmul.f32 %v2347_v23, %v511_v26  ;;  %s1900_s15 = sshll.u32 (%p2041_p6), %s1971_s17, 6 }
  0x62   : > { %1338 = vmatprep.subr.bf16.mxu0 %v1775_v15  ;;  %v1783_v28 = vcombine.high %v584_v18, %v588_v20  ;;  %1391 = vmatprep.subr.bf16.mxu1 %v1777_v19  ;;  %v1785_v30 = vcombine.high %v585_v21, %v589_v22  ;;  %v592_v31 = vld [vmem:[%s2326_s11 + $0xc0] sm:$0xff]  ;;  %v593_v33 = vld [vmem:[%s2326_s11 + $0xc8] sm:$0xff]  ;;  %v1782_v37 = vcombine.low %v584_v18, %v588_v20  ;;  %s2572_s22 = scalar_lea.vmem (%p2041_p6), %s2654_s4, %s1900_s15 }
  0x63   : > { %v596_v32 = vld [vmem:[%s2326_s11 + $0xe0] sm:$0xff]  ;;  %v597_v34 = vld [vmem:[%s2326_s11 + $0xe8] sm:$0xff]  ;;  %v1784_v38 = vcombine.low %v585_v21, %v589_v22  ;;  %v549_v40 = vadd.f32 %v2356_v29, %v529_v35  ;;  %v551_v46 = vadd.f32 %v2356_v29, %v531_v36 }
  0x64   : > { %v1791_v39 = vcombine.high %v592_v31, %v596_v32  ;;  %v1793_v41 = vcombine.high %v593_v33, %v597_v34  ;;  %v600_v42 = vld [vmem:[%s2326_s11 + $0x100] sm:$0xff]  ;;  %v601_v44 = vld [vmem:[%s2326_s11 + $0x108] sm:$0xff]  ;;  %v1790_v48 = vcombine.low %v592_v31, %v596_v32  ;;  %v1792_v49 = vcombine.low %v593_v33, %v597_v34 }
  0x65   : > { %1339 = vmatpush1.bf16.msra.mxu0 %v1774_v24  ;;  %1392 = vmatpush1.bf16.msra.mxu1 %v1776_v27  ;;  %v604_v43 = vld [vmem:[%s2326_s11 + $0x120] sm:$0xff]  ;;  %v605_v45 = vld [vmem:[%s2326_s11 + $0x128] sm:$0xff]  ;;  %v557_v47 = vmax.f32 %v549_v40, 0.0  ;;  %v559_v51 = vmax.f32 %v551_v46, 0.0 }
  0x66   : > { %1340 = vmatprep.subr.bf16.mxu0 %v1783_v28  ;;  %1393 = vmatprep.subr.bf16.mxu1 %v1785_v30  ;;  %v1799_v50 = vcombine.high %v600_v42, %v604_v43  ;;  %v1801_v52 = vcombine.high %v601_v44, %v605_v45  ;;  %v608_v53 = vld [vmem:[%s2326_s11 + $0x140] sm:$0xff]  ;;  %v609_v55 = vld [vmem:[%s2326_s11 + $0x148] sm:$0xff]  ;;  %v1798_v58 = vcombine.low %v600_v42, %v604_v43 }
  0x67   : > { %v612_v54 = vld [vmem:[%s2326_s11 + $0x160] sm:$0xff]  ;;  %v613_v56 = vld [vmem:[%s2326_s11 + $0x168] sm:$0xff]  ;;  %v2374_v57 = vpack.c.bf16 %v559_v51, %v557_v47  ;;  %v1800_v59 = vcombine.low %v601_v44, %v605_v45 }
  0x68   : > { %v1807_v60 = vcombine.high %v608_v53, %v612_v54  ;;  %v1809_v61 = vcombine.high %v609_v55, %v613_v56  ;;  %v616_v62 = vld [vmem:[%s2326_s11 + $0x180] sm:$0xff]  ;;  %v617_v0 = vld [vmem:[%s2326_s11 + $0x188] sm:$0xff]  ;;  %v1806_v4 = vcombine.low %v608_v53, %v612_v54  ;;  %v1808_v5 = vcombine.low %v609_v55, %v613_v56 }
  0x69   : > { %1341 = vmatpush1.bf16.msra.mxu0 %v1782_v37  ;;  %1394 = vmatpush1.bf16.msra.mxu1 %v1784_v38  ;;  %v620_v63 = vld [vmem:[%s2326_s11 + $0x1a0] sm:$0xff]  ;;  %v621_v3 = vld [vmem:[%s2326_s11 + $0x1a8] sm:$0xff]  ;;  %v520_v55 = vsub.s32 0, %v2324_v2 }
  0x6a   : > { %1342 = vmatprep.subr.bf16.mxu0 %v1791_v39  ;;  %1395 = vmatprep.subr.bf16.mxu1 %v1793_v41  ;;  %v1815_v7 = vcombine.high %v616_v62, %v620_v63  ;;  %v1817_v8 = vcombine.high %v617_v0, %v621_v3  ;;  %v624_v9 = vld [vmem:[%s2326_s11 + $0x1c0] sm:$0xff]  ;;  %v625_v11 = vld [vmem:[%s2326_s11 + $0x1c8] sm:$0xff]  ;;  %v1814_v13 = vcombine.low %v616_v62, %v620_v63 }
  0x6b   : > { %1368 = vmatprep.mubr.bf16.mxu0 %v2374_v57  ;;  %1421 = vmatprep.mubr.bf16.mxu1 %v2374_v57  ;;  %v628_v10 = vld [vmem:[%s2326_s11 + $0x1e0] sm:$0xff]  ;;  %v629_v12 = vld [vmem:[%s2326_s11 + $0x1e8] sm:$0xff]  ;;  %v1816_v14 = vcombine.low %v617_v0, %v621_v3  ;;  %v521_v3 = vrot.slane %v2322_v1, %v520_v55 }
  0x6c   : > { %v1823_v15 = vcombine.high %v624_v9, %v628_v10  ;;  %v1825_v16 = vcombine.high %v625_v11, %v629_v12  ;;  %v632_v17 = vld [vmem:[%s2326_s11 + $0x200] sm:$0xff]  ;;  %v633_v19 = vld [vmem:[%s2326_s11 + $0x208] sm:$0xff]  ;;  %v1822_v21 = vcombine.low %v624_v9, %v628_v10  ;;  %v1824_v22 = vcombine.low %v625_v11, %v629_v12 }
  0x6d   : > { %1343 = vmatpush1.bf16.msra.mxu0 %v1790_v48  ;;  %1396 = vmatpush1.bf16.msra.mxu1 %v1792_v49  ;;  %v636_v18 = vld [vmem:[%s2326_s11 + $0x220] sm:$0xff]  ;;  %v637_v20 = vld [vmem:[%s2326_s11 + $0x228] sm:$0xff] }
  0x6e   : > { %1344 = vmatprep.subr.bf16.mxu0 %v1799_v50  ;;  %1397 = vmatprep.subr.bf16.mxu1 %v1801_v52  ;;  %v1831_v24 = vcombine.high %v632_v17, %v636_v18  ;;  %v1833_v25 = vcombine.high %v633_v19, %v637_v20  ;;  %v640_v26 = vld [vmem:[%s2326_s11 + $0x240] sm:$0xff]  ;;  %v641_v28 = vld [vmem:[%s2326_s11 + $0x248] sm:$0xff]  ;;  %v1830_v31 = vcombine.low %v632_v17, %v636_v18  ;;  %v515_v17 = vld [vmem:[%s2650_s0 + $0x38] sm:$0xff] }
  0x6f   : > { %v644_v27 = vld [vmem:[%s2326_s11 + $0x260] sm:$0xff]  ;;  %v645_v30 = vld [vmem:[%s2326_s11 + $0x268] sm:$0xff]  ;;  %v1832_v32 = vcombine.low %v633_v19, %v637_v20 }
  0x70   : > { %v1839_v33 = vcombine.high %v640_v26, %v644_v27  ;;  %v1841_v34 = vcombine.high %v641_v28, %v645_v30  ;;  %v648_v35 = vld [vmem:[%s2326_s11 + $0x280] sm:$0xff]  ;;  %v649_v37 = vld [vmem:[%s2326_s11 + $0x288] sm:$0xff]  ;;  %v1838_v39 = vcombine.low %v640_v26, %v644_v27  ;;  %v1840_v40 = vcombine.low %v641_v28, %v645_v30 }
  0x71   : > { %1345 = vmatpush1.bf16.msra.mxu0 %v1798_v58  ;;  %1398 = vmatpush1.bf16.msra.mxu1 %v1800_v59  ;;  %v652_v36 = vld [vmem:[%s2326_s11 + $0x2a0] sm:$0xff]  ;;  %v653_v38 = vld [vmem:[%s2326_s11 + $0x2a8] sm:$0xff]  ;;  %v535_v26 = vmul.f32 %v2347_v23, %v515_v17 }
  0x72   : > { %1346 = vmatprep.subr.bf16.mxu0 %v1807_v60  ;;  %1399 = vmatprep.subr.bf16.mxu1 %v1809_v61  ;;  %v1847_v41 = vcombine.high %v648_v35, %v652_v36  ;;  %v1849_v42 = vcombine.high %v649_v37, %v653_v38  ;;  %v656_v43 = vld [vmem:[%s2326_s11 + $0x2c0] sm:$0xff]  ;;  %v657_v45 = vld [vmem:[%s2326_s11 + $0x2c8] sm:$0xff]  ;;  %v1846_v47 = vcombine.low %v648_v35, %v652_v36  ;;  %v570_v36 = vld [vmem:[%s2326_s11 + $0x10] sm:$0xff] }
  0x73   : > { %v660_v44 = vld [vmem:[%s2326_s11 + $0x2e0] sm:$0xff]  ;;  %v661_v46 = vld [vmem:[%s2326_s11 + $0x2e8] sm:$0xff]  ;;  %v1848_v48 = vcombine.low %v649_v37, %v653_v38  ;;  %v574_v37 = vld [vmem:[%s2326_s11 + $0x30] sm:$0xff] }
  0x74   : > { %v1855_v49 = vcombine.high %v656_v43, %v660_v44  ;;  %v1857_v50 = vcombine.high %v657_v45, %v661_v46  ;;  %v664_v51 = vld [vmem:[%s2326_s11 + $0x300] sm:$0xff]  ;;  %v665_v53 = vld [vmem:[%s2326_s11 + $0x308] sm:$0xff]  ;;  %v1854_v56 = vcombine.low %v656_v43, %v660_v44  ;;  %v1856_v58 = vcombine.low %v657_v45, %v661_v46  ;;  %v575_v43 = vld [vmem:[%s2326_s11 + $0x38] sm:$0xff] }
  0x75   : > { %1347 = vmatpush1.bf16.msra.mxu0 %v1806_v4  ;;  %1400 = vmatpush1.bf16.msra.mxu1 %v1808_v5  ;;  %v668_v52 = vld [vmem:[%s2326_s11 + $0x320] sm:$0xff]  ;;  %v669_v54 = vld [vmem:[%s2326_s11 + $0x328] sm:$0xff]  ;;  %v510_v5 = vld [vmem:[%s2650_s0 + $0x10] sm:$0xff] }
  0x76   : > { %1348 = vmatprep.subr.bf16.mxu0 %v1815_v7  ;;  %1401 = vmatprep.subr.bf16.mxu1 %v1817_v8  ;;  %v1863_v59 = vcombine.high %v664_v51, %v668_v52  ;;  %v1865_v60 = vcombine.high %v665_v53, %v669_v54  ;;  %v672_v61 = vld [vmem:[%s2326_s11 + $0x340] sm:$0xff]  ;;  %v673_v63 = vld [vmem:[%s2326_s11 + $0x348] sm:$0xff]  ;;  %v1862_v2 = vcombine.low %v664_v51, %v668_v52  ;;  %v582_v51 = vld [vmem:[%s2326_s11 + $0x70] sm:$0xff] }
  0x77   : > { %v676_v62 = vld [vmem:[%s2326_s11 + $0x360] sm:$0xff]  ;;  %v677_v0 = vld [vmem:[%s2326_s11 + $0x368] sm:$0xff]  ;;  %v1864_v7 = vcombine.low %v665_v53, %v669_v54  ;;  %v579_v54 = vld [vmem:[%s2326_s11 + $0x58] sm:$0xff] }
  0x78   : > { %v508_v4 = vld [vmem:[%s2650_s0] sm:$0xff]  ;;  %v1871_v8 = vcombine.high %v672_v61, %v676_v62  ;;  %v1873_v9 = vcombine.high %v673_v63, %v677_v0  ;;  %v513_v1 = vld [vmem:[%s2650_s0 + $0x28] sm:$0xff]  ;;  %v1870_v18 = vcombine.low %v672_v61, %v676_v62  ;;  %v1872_v19 = vcombine.low %v673_v63, %v677_v0  ;;  %v586_v63 = vld [vmem:[%s2326_s11 + $0x90] sm:$0xff] }
  0x79   : > { %1349 = vmatpush1.bf16.msra.mxu0 %v1814_v13  ;;  %1402 = vmatpush1.bf16.msra.mxu1 %v1816_v14  ;;  %v680_v10 = vld [vmem:[%s2326_s11 + $0x380] sm:$0xff]  ;;  %v681_v12 = vld [vmem:[%s2326_s11 + $0x388] sm:$0xff]  ;;  %v528_v14 = vmul.f32 %v521_v3, %v508_v4  ;;  %v590_v0 = vld [vmem:[%s2326_s11 + $0xb0] sm:$0xff] }
  0x7a   : > { %1350 = vmatprep.subr.bf16.mxu0 %v1823_v15  ;;  %1403 = vmatprep.subr.bf16.mxu1 %v1825_v16  ;;  %v684_v11 = vld [vmem:[%s2326_s11 + $0x3a0] sm:$0xff]  ;;  %v685_v13 = vld [vmem:[%s2326_s11 + $0x3a8] sm:$0xff]  ;;  %v530_v15 = vmul.f32 %v521_v3, %v510_v5  ;;  %v541_v16 = vrot.slane %v2334_v6, %v520_v55  ;;  %v583_v55 = vld [vmem:[%s2326_s11 + $0x78] sm:$0xff] }
  0x7b   : > { %v1879_v20 = vcombine.high %v680_v10, %v684_v11  ;;  %v689_v6 = vld [vmem:[%s2326_s11 + $0x3c8] sm:$0xff]  ;;  %v1781_v62 = vcombine.high %v579_v54, %v583_v55  ;;  %v591_v4 = vld [vmem:[%s2326_s11 + $0xb8] sm:$0xff] }
  0x7c   : > { %v693_v27 = vld [vmem:[%s2326_s11 + $0x3e8] sm:$0xff]  ;;  %v548_v28 = vadd.f32 %v541_v16, %v528_v14  ;;  %v550_v30 = vadd.f32 %v541_v16, %v530_v15  ;;  %v599_v14 = vld [vmem:[%s2326_s11 + $0xf8] sm:$0xff] }
  0x7d   : > { %1351 = vmatpush1.bf16.msra.mxu0 %v1822_v21  ;;  %1404 = vmatpush1.bf16.msra.mxu1 %v1824_v22  ;;  %v1881_v21 = vcombine.high %v681_v12, %v685_v13  ;;  %v688_v22 = vld [vmem:[%s2326_s11 + $0x3c0] sm:$0xff]  ;;  %v1889_v35 = vcombine.high %v689_v6, %v693_v27 }
  0x7e   : > { %1352 = vmatprep.subr.bf16.mxu0 %v1831_v24  ;;  %1405 = vmatprep.subr.bf16.mxu1 %v1833_v25  ;;  %v692_v24 = vld [vmem:[%s2326_s11 + $0x3e0] sm:$0xff]  ;;  %v533_v25 = vmul.f32 %v2347_v23, %v513_v1  ;;  %v1880_v23 = vcombine.low %v681_v12, %v685_v13  ;;  %v594_v1 = vld [vmem:[%s2326_s11 + $0xd0] sm:$0xff]  ;;  %v595_v13 = vld [vmem:[%s2326_s11 + $0xd8] sm:$0xff] }
  0x7f   : > { %v1886_v46 = vcombine.low %v688_v22, %v692_v24  ;;  %v598_v12 = vld [vmem:[%s2326_s11 + $0xf0] sm:$0xff] }
  0x80   : > { %v553_v38 = vadd.f32 %v2356_v29, %v533_v25  ;;  %v1794_v25 = vcombine.low %v594_v1, %v598_v12 }
  0x81   : > { %1353 = vmatpush1.bf16.msra.mxu0 %v1830_v31  ;;  %1406 = vmatpush1.bf16.msra.mxu1 %v1832_v32  ;;  %v1878_v31 = vcombine.low %v680_v10, %v684_v11  ;;  %v512_v32 = vld [vmem:[%s2650_s0 + $0x20] sm:$0xff]  ;;  %v1787_v10 = vcombine.high %v586_v63, %v590_v0 }
  0x82   : > { %1354 = vmatprep.subr.bf16.mxu0 %v1839_v33  ;;  %1407 = vmatprep.subr.bf16.mxu1 %v1841_v34  ;;  %v514_v33 = vld [vmem:[%s2650_s0 + $0x30] sm:$0xff]  ;;  %v1887_v34 = vcombine.high %v688_v22, %v692_v24  ;;  %v532_v44 = vmul.f32 %v521_v3, %v512_v32  ;;  %v603_v22 = vld [vmem:[%s2326_s11 + $0x118] sm:$0xff] }
  0x83   : > { %v534_v45 = vmul.f32 %v521_v3, %v514_v33  ;;  %v607_v24 = vld [vmem:[%s2326_s11 + $0x138] sm:$0xff] }
  0x84   : > { %v615_v32 = vld [vmem:[%s2326_s11 + $0x178] sm:$0xff] }
  0x85   : > { %1355 = vmatpush1.bf16.msra.mxu0 %v1838_v39  ;;  %1408 = vmatpush1.bf16.msra.mxu1 %v1840_v40  ;;  %v555_v39 = vadd.f32 %v2356_v29, %v535_v26  ;;  %v556_v40 = vmax.f32 %v548_v28, 0.0  ;;  %v561_v29 = vmax.f32 %v553_v38, 0.0  ;;  %v1796_v26 = vcombine.low %v595_v13, %v599_v14  ;;  %v610_v28 = vld [vmem:[%s2326_s11 + $0x150] sm:$0xff]  ;;  %v619_v38 = vld [vmem:[%s2326_s11 + $0x198] sm:$0xff] }
  0x86   : > { %1356 = vmatprep.subr.bf16.mxu0 %v1847_v41  ;;  %1409 = vmatprep.subr.bf16.mxu1 %v1849_v42  ;;  %v558_v41 = vmax.f32 %v550_v30, 0.0  ;;  %v571_v42 = vld [vmem:[%s2326_s11 + $0x18] sm:$0xff]  ;;  %v614_v30 = vld [vmem:[%s2326_s11 + $0x170] sm:$0xff] }
  0x87   : > { %v563_v52 = vmax.f32 %v555_v39, 0.0  ;;  %v623_v39 = vld [vmem:[%s2326_s11 + $0x1b8] sm:$0xff] }
  0x88   : > { %v2449_v53 = vpack.c.bf16 %v558_v41, %v556_v40  ;;  %v1810_v40 = vcombine.low %v610_v28, %v614_v30 }
  0x89   : > { %1357 = vmatpush1.bf16.msra.mxu0 %v1846_v47  ;;  %1410 = vmatpush1.bf16.msra.mxu1 %v1848_v48  ;;  %v1888_v47 = vcombine.low %v689_v6, %v693_v27  ;;  %v1771_v48 = vcombine.high %v570_v36, %v574_v37  ;;  %v2455_v3 = vpack.c.bf16 %v563_v52, %v561_v29  ;;  %v638_v29 = vld [vmem:[%s2326_s11 + $0x230] sm:$0xff]  ;;  %v635_v52 = vld [vmem:[%s2326_s11 + $0x218] sm:$0xff] }
  0x8a   : > { %1358 = vmatprep.subr.bf16.mxu0 %v1855_v49  ;;  %1411 = vmatprep.subr.bf16.mxu1 %v1857_v50  ;;  %v1773_v49 = vcombine.high %v571_v42, %v575_v43  ;;  %v578_v50 = vld [vmem:[%s2326_s11 + $0x50] sm:$0xff]  ;;  %v1805_v27 = vcombine.high %v603_v22, %v607_v24 }
  0x8b   : > { %v1779_v61 = vcombine.high %v578_v50, %v582_v51 }
  0x8d   : > { %1359 = vmatpush1.bf16.msra.mxu0 %v1854_v56  ;;  %1412 = vmatpush1.bf16.msra.mxu1 %v1856_v58  ;;  %v552_v56 = vadd.f32 %v541_v16, %v532_v44  ;;  %v554_v58 = vadd.f32 %v541_v16, %v534_v45  ;;  %v1786_v16 = vcombine.low %v586_v63, %v590_v0  ;;  %v630_v44 = vld [vmem:[%s2326_s11 + $0x1f0] sm:$0xff]  ;;  %v627_v45 = vld [vmem:[%s2326_s11 + $0x1d8] sm:$0xff] }
  0x8e   : > { %1360 = vmatprep.subr.bf16.mxu0 %v1863_v59  ;;  %1413 = vmatprep.subr.bf16.mxu1 %v1865_v60  ;;  %v1770_v59 = vcombine.low %v570_v36, %v574_v37  ;;  %v1772_v60 = vcombine.low %v571_v42, %v575_v43  ;;  %v618_v36 = vld [vmem:[%s2326_s11 + $0x190] sm:$0xff]  ;;  %v1821_v42 = vcombine.high %v619_v38, %v623_v39  ;;  %v647_v63 = vld [vmem:[%s2326_s11 + $0x278] sm:$0xff] }
  0x8f   : > { %v560_v5 = vmax.f32 %v552_v56, 0.0  ;;  %v622_v37 = vld [vmem:[%s2326_s11 + $0x1b0] sm:$0xff] }
  0x90   : > { %v1819_v41 = vcombine.high %v618_v36, %v622_v37  ;;  %v626_v43 = vld [vmem:[%s2326_s11 + $0x1d0] sm:$0xff] }
  0x91   : > { %1361 = vmatpush1.bf16.msra.mxu0 %v1862_v2  ;;  %1414 = vmatpush1.bf16.msra.mxu1 %v1864_v7  ;;  %v587_v2 = vld [vmem:[%s2326_s11 + $0x98] sm:$0xff]  ;;  %v562_v7 = vmax.f32 %v554_v58, 0.0 }
  0x92   : > { %1362 = vmatprep.subr.bf16.mxu0 %v1871_v8  ;;  %1415 = vmatprep.subr.bf16.mxu1 %v1873_v9  ;;  %v1778_v8 = vcombine.low %v578_v50, %v582_v51  ;;  %v1780_v9 = vcombine.low %v579_v54, %v583_v55  ;;  %v1789_v11 = vcombine.high %v587_v2, %v591_v4  ;;  %v634_v51 = vld [vmem:[%s2326_s11 + $0x210] sm:$0xff]  ;;  %v639_v54 = vld [vmem:[%s2326_s11 + $0x238] sm:$0xff] }
  0x93   : > { %v2467_v15 = vpack.c.bf16 %v562_v7, %v560_v5  ;;  %v1788_v17 = vcombine.low %v587_v2, %v591_v4  ;;  %v1826_v55 = vcombine.low %v626_v43, %v630_v44  ;;  %v1835_v58 = vcombine.high %v634_v51, %v638_v29  ;;  %v650_v7 = vld [vmem:[%s2326_s11 + $0x290] sm:$0xff] }
  0x94   : > { %v1834_v0 = vcombine.low %v634_v51, %v638_v29  ;;  %v1836_v2 = vcombine.low %v635_v52, %v639_v54 }
  0x95   : > { %1363 = vmatpush1.bf16.msra.mxu0 %v1870_v18  ;;  %1416 = vmatpush1.bf16.msra.mxu1 %v1872_v19  ;;  %v1795_v18 = vcombine.high %v594_v1, %v598_v12  ;;  %v1797_v19 = vcombine.high %v595_v13, %v599_v14  ;;  %v658_v14 = vld [vmem:[%s2326_s11 + $0x2d0] sm:$0xff] }
  0x96   : > { %1364 = vmatprep.subr.bf16.mxu0 %v1879_v20  ;;  %1417 = vmatprep.subr.bf16.mxu1 %v1881_v21  ;;  %v602_v20 = vld [vmem:[%s2326_s11 + $0x110] sm:$0xff] }
  0x97   : > { %v606_v21 = vld [vmem:[%s2326_s11 + $0x130] sm:$0xff] }
  0x98   : > { %v1803_v6 = vcombine.high %v602_v20, %v606_v21  ;;  %v1802_v33 = vcombine.low %v602_v20, %v606_v21 }
  0x99   : > { %1365 = vmatpush1.bf16.msra.mxu0 %v1878_v31  ;;  %1418 = vmatpush1.bf16.msra.mxu1 %v1880_v23  ;;  %v611_v31 = vld [vmem:[%s2326_s11 + $0x158] sm:$0xff]  ;;  %v1804_v23 = vcombine.low %v603_v22, %v607_v24  ;;  %v666_v24 = vld [vmem:[%s2326_s11 + $0x310] sm:$0xff] }
  0x9a   : > { %1366 = vmatprep.subr.bf16.mxu0 %v1887_v34  ;;  %1419 = vmatprep.subr.bf16.mxu1 %v1889_v35  ;;  %v1811_v34 = vcombine.high %v610_v28, %v614_v30  ;;  %v1813_v35 = vcombine.high %v611_v31, %v615_v32 }
  0x9d   : > { %1367 = vmatpush1.bf16.msra.mxu0 %v1886_v46  ;;  %1420 = vmatpush1.bf16.msra.mxu1 %v1888_v47  ;;  %v631_v46 = vld [vmem:[%s2326_s11 + $0x1f8] sm:$0xff]  ;;  %v1818_v47 = vcombine.low %v618_v36, %v622_v37 }
  0x9e   : > { %1442 = vmatprep.subr.bf16.mxu0 %v1771_v48  ;;  %1495 = vmatprep.subr.bf16.mxu1 %v1773_v49  ;;  %v1820_v48 = vcombine.low %v619_v38, %v623_v39  ;;  %v1827_v49 = vcombine.high %v626_v43, %v630_v44  ;;  %v1829_v50 = vcombine.high %v627_v45, %v631_v46  ;;  %v682_v39 = vld [vmem:[%s2326_s11 + $0x390] sm:$0xff] }
  0x9f   : > { %v1828_v56 = vcombine.low %v627_v45, %v631_v46  ;;  %v690_v46 = vld [vmem:[%s2326_s11 + $0x3d0] sm:$0xff] }
  0xa0   : > { %1369 = vmatmul.mubr.bf16.vlgmr.msra.gmra.mrb[0].mxu0 %v2449_v53  ;;  %1422 = vmatmul.mubr.bf16.vlgmr.msra.gmra.mrb[0].mxu1 %v2449_v53 }
  0xa1   : > { %1443 = vmatpush1.bf16.msra.mxu0 %v1770_v59  ;;  %1496 = vmatpush1.bf16.msra.mxu1 %v1772_v60  ;;  %v1837_v59 = vcombine.high %v635_v52, %v639_v54  ;;  %v642_v60 = vld [vmem:[%s2326_s11 + $0x250] sm:$0xff] }
  0xa2   : > { %1444 = vmatprep.subr.bf16.mxu0 %v1779_v61  ;;  %1497 = vmatprep.subr.bf16.mxu1 %v1781_v62  ;;  %v646_v61 = vld [vmem:[%s2326_s11 + $0x270] sm:$0xff]  ;;  %v643_v62 = vld [vmem:[%s2326_s11 + $0x258] sm:$0xff] }
  0xa3   : > { %1378 = vmatprep.mubr.bf16.mxu0 %v2455_v3  ;;  %1431 = vmatprep.mubr.bf16.mxu1 %v2455_v3  ;;  %v1843_v4 = vcombine.high %v642_v60, %v646_v61  ;;  %v1845_v5 = vcombine.high %v643_v62, %v647_v63  ;;  %v1844_v1 = vcombine.low %v643_v62, %v647_v63 }
  0xa5   : > { %1445 = vmatpush1.bf16.msra.mxu0 %v1778_v8  ;;  %1498 = vmatpush1.bf16.msra.mxu1 %v1780_v9  ;;  %v654_v8 = vld [vmem:[%s2326_s11 + $0x2b0] sm:$0xff]  ;;  %v651_v9 = vld [vmem:[%s2326_s11 + $0x298] sm:$0xff] }
  0xa6   : > { %1446 = vmatprep.subr.bf16.mxu0 %v1787_v10  ;;  %1499 = vmatprep.subr.bf16.mxu1 %v1789_v11  ;;  %v655_v10 = vld [vmem:[%s2326_s11 + $0x2b8] sm:$0xff]  ;;  %v1842_v11 = vcombine.low %v642_v60, %v646_v61  ;;  %v1851_v12 = vcombine.high %v650_v7, %v654_v8 }
  0xa7   : > { %v1853_v13 = vcombine.high %v651_v9, %v655_v10  ;;  %v1852_v20 = vcombine.low %v651_v9, %v655_v10 }
  0xa8   : > { %1379 = vmatmul.mubr.bf16.gmra.mrb[4].mxu0 %v2467_v15  ;;  %1432 = vmatmul.mubr.bf16.gmra.mrb[4].mxu1 %v2467_v15 }
  0xa9   : > { %1447 = vmatpush1.bf16.msra.mxu0 %v1786_v16  ;;  %1500 = vmatpush1.bf16.msra.mxu1 %v1788_v17  ;;  %v662_v16 = vld [vmem:[%s2326_s11 + $0x2f0] sm:$0xff]  ;;  %v659_v17 = vld [vmem:[%s2326_s11 + $0x2d8] sm:$0xff] }
  0xaa   : > { %1448 = vmatprep.subr.bf16.mxu0 %v1795_v18  ;;  %1501 = vmatprep.subr.bf16.mxu1 %v1797_v19  ;;  %v663_v18 = vld [vmem:[%s2326_s11 + $0x2f8] sm:$0xff]  ;;  %v1850_v19 = vcombine.low %v650_v7, %v654_v8  ;;  %v1859_v21 = vcombine.high %v658_v14, %v662_v16 }
  0xab   : > { %1474 = vmatprep.mubr.bf16.mxu0 %v2374_v57  ;;  %1527 = vmatprep.mubr.bf16.mxu1 %v2374_v57  ;;  %v1812_v57 = vcombine.low %v611_v31, %v615_v32  ;;  %v1861_v22 = vcombine.high %v659_v17, %v663_v18  ;;  %v1860_v28 = vcombine.low %v659_v17, %v663_v18  ;;  %v674_v32 = vld [vmem:[%s2326_s11 + $0x350] sm:$0xff] }
  0xad   : > { %1449 = vmatpush1.bf16.msra.mxu0 %v1794_v25  ;;  %1502 = vmatpush1.bf16.msra.mxu1 %v1796_v26  ;;  %v670_v25 = vld [vmem:[%s2326_s11 + $0x330] sm:$0xff]  ;;  %v667_v26 = vld [vmem:[%s2326_s11 + $0x318] sm:$0xff] }
  0xae   : > { %1450 = vmatprep.subr.bf16.mxu0 %v1803_v6  ;;  %1503 = vmatprep.subr.bf16.mxu1 %v1805_v27  ;;  %v671_v6 = vld [vmem:[%s2326_s11 + $0x338] sm:$0xff]  ;;  %v1858_v27 = vcombine.low %v658_v14, %v662_v16  ;;  %v1867_v30 = vcombine.high %v666_v24, %v670_v25 }
  0xaf   : > { %v1869_v31 = vcombine.high %v667_v26, %v671_v6  ;;  %v1868_v36 = vcombine.low %v667_v26, %v671_v6 }
  0xb1   : > { %1451 = vmatpush1.bf16.msra.mxu0 %v1802_v33  ;;  %1504 = vmatpush1.bf16.msra.mxu1 %v1804_v23  ;;  %v678_v33 = vld [vmem:[%s2326_s11 + $0x370] sm:$0xff]  ;;  %v675_v23 = vld [vmem:[%s2326_s11 + $0x358] sm:$0xff] }
  0xb2   : > { %1452 = vmatprep.subr.bf16.mxu0 %v1811_v34  ;;  %1505 = vmatprep.subr.bf16.mxu1 %v1813_v35  ;;  %v679_v34 = vld [vmem:[%s2326_s11 + $0x378] sm:$0xff]  ;;  %v1866_v35 = vcombine.low %v666_v24, %v670_v25  ;;  %v1875_v37 = vcombine.high %v674_v32, %v678_v33 }
  0xb3   : > { %v1877_v38 = vcombine.high %v675_v23, %v679_v34  ;;  %v1876_v43 = vcombine.low %v675_v23, %v679_v34 }
  0xb5   : > { %1453 = vmatpush1.bf16.msra.mxu0 %v1810_v40  ;;  %1506 = vmatpush1.bf16.msra.mxu1 %v1812_v57  ;;  %v686_v40 = vld [vmem:[%s2326_s11 + $0x3b0] sm:$0xff]  ;;  %v683_v57 = vld [vmem:[%s2326_s11 + $0x398] sm:$0xff] }
  0xb6   : > { %1454 = vmatprep.subr.bf16.mxu0 %v1819_v41  ;;  %1507 = vmatprep.subr.bf16.mxu1 %v1821_v42  ;;  %v687_v41 = vld [vmem:[%s2326_s11 + $0x3b8] sm:$0xff]  ;;  %v1874_v42 = vcombine.low %v674_v32, %v678_v33  ;;  %v1883_v44 = vcombine.high %v682_v39, %v686_v40 }
  0xb7   : > { %v1885_v45 = vcombine.high %v683_v57, %v687_v41  ;;  %v1884_v51 = vcombine.low %v683_v57, %v687_v41 }
  0xb9   : > { %1455 = vmatpush1.bf16.msra.mxu0 %v1818_v47  ;;  %1508 = vmatpush1.bf16.msra.mxu1 %v1820_v48  ;;  %v694_v47 = vld [vmem:[%s2326_s11 + $0x3f0] sm:$0xff]  ;;  %v691_v48 = vld [vmem:[%s2326_s11 + $0x3d8] sm:$0xff] }
  0xba   : > { %1456 = vmatprep.subr.bf16.mxu0 %v1827_v49  ;;  %1509 = vmatprep.subr.bf16.mxu1 %v1829_v50  ;;  %v695_v49 = vld [vmem:[%s2326_s11 + $0x3f8] sm:$0xff]  ;;  %v1882_v50 = vcombine.low %v682_v39, %v686_v40  ;;  %v1891_v29 = vcombine.high %v690_v46, %v694_v47  ;;  %v1890_v54 = vcombine.low %v690_v46, %v694_v47  ;;  %s1765_s11 = sshll.u32 %s468_s7, 8 }
  0xbb   : > { %v1893_v52 = vcombine.high %v691_v48, %v695_v49  ;;  %s2529_s14 = scalar_lea.vmem [#allocation3], %s1765_s11 }
  0xbd   : > { %1457 = vmatpush1.bf16.msra.mxu0 %v1826_v55  ;;  %1510 = vmatpush1.bf16.msra.mxu1 %v1828_v56  ;;  %v1892_v55 = vcombine.low %v691_v48, %v695_v49 }
  0xbe   : > { %1458 = vmatprep.subr.bf16.mxu0 %v1835_v58  ;;  %1511 = vmatprep.subr.bf16.mxu1 %v1837_v59 }
  0xc1   : > { %1459 = vmatpush1.bf16.msra.mxu0 %v1834_v0  ;;  %1512 = vmatpush1.bf16.msra.mxu1 %v1836_v2 }
  0xc2   : > { %1460 = vmatprep.subr.bf16.mxu0 %v1843_v4  ;;  %1513 = vmatprep.subr.bf16.mxu1 %v1845_v5 }
  0xc5   : > { %1461 = vmatpush1.bf16.msra.mxu0 %v1842_v11  ;;  %1514 = vmatpush1.bf16.msra.mxu1 %v1844_v1 }
  0xc6   : > { %1462 = vmatprep.subr.bf16.mxu0 %v1851_v12  ;;  %1515 = vmatprep.subr.bf16.mxu1 %v1853_v13 }
  0xc9   : > { %1463 = vmatpush1.bf16.msra.mxu0 %v1850_v19  ;;  %1516 = vmatpush1.bf16.msra.mxu1 %v1852_v20 }
  0xca   : > { %1464 = vmatprep.subr.bf16.mxu0 %v1859_v21  ;;  %1517 = vmatprep.subr.bf16.mxu1 %v1861_v22 }
  0xcd   : > { %1465 = vmatpush1.bf16.msra.mxu0 %v1858_v27  ;;  %1518 = vmatpush1.bf16.msra.mxu1 %v1860_v28 }
  0xce   : > { %1466 = vmatprep.subr.bf16.mxu0 %v1867_v30  ;;  %1519 = vmatprep.subr.bf16.mxu1 %v1869_v31 }
  0xd1   : > { %1467 = vmatpush1.bf16.msra.mxu0 %v1866_v35  ;;  %1520 = vmatpush1.bf16.msra.mxu1 %v1868_v36 }
  0xd2   : > { %1468 = vmatprep.subr.bf16.mxu0 %v1875_v37  ;;  %1521 = vmatprep.subr.bf16.mxu1 %v1877_v38 }
  0xd5   : > { %1469 = vmatpush1.bf16.msra.mxu0 %v1874_v42  ;;  %1522 = vmatpush1.bf16.msra.mxu1 %v1876_v43 }
  0xd6   : > { %1470 = vmatprep.subr.bf16.mxu0 %v1883_v44  ;;  %1523 = vmatprep.subr.bf16.mxu1 %v1885_v45 }
  0xd9   : > { %1471 = vmatpush1.bf16.msra.mxu0 %v1882_v50  ;;  %1524 = vmatpush1.bf16.msra.mxu1 %v1884_v51 }
  0xda   : > { %1472 = vmatprep.subr.bf16.mxu0 %v1891_v29  ;;  %1525 = vmatprep.subr.bf16.mxu1 %v1893_v52 }
  0xdd   : > { %1473 = vmatpush1.bf16.msra.mxu0 %v1890_v54  ;;  %1526 = vmatpush1.bf16.msra.mxu1 %v1892_v55 }
  0xe0   : > { %1475 = vmatmul.mubr.bf16.vlgmr.msra.gmra.mrb[8].mxu0 %v2449_v53  ;;  %1528 = vmatmul.mubr.bf16.vlgmr.msra.gmra.mrb[8].mxu1 %v2449_v53 }
  0xe1   : > { %1484 = vmatprep.mubr.bf16.mxu0 %v2455_v3  ;;  %1537 = vmatprep.mubr.bf16.mxu1 %v2455_v3 }
  0xe8   : > { %1485 = vmatmul.mubr.bf16.gmra.mrb[12].mxu0 %v2467_v15  ;;  %1538 = vmatmul.mubr.bf16.gmra.mrb[12].mxu1 %v2467_v15 }
 0x173   : > { %v1370_v56 = vpop.f32.mrb[0].mxu0  ;;  %v1423_v53 = vpop.f32.mrb[0].mxu1 }
 0x174   : > { %1548 = vst [vmem:[%s2529_s14] sm:$0xff] %v1370_v56  ;;  %v1372_v3 = vpop.f32.mrb[1].mxu0  ;;  %1550 = vst [vmem:[%s2529_s14 + $0x10] sm:$0xff] %v1423_v53  ;;  %v1425_v15 = vpop.f32.mrb[1].mxu1 }
 0x175   : > { %1549 = vst [vmem:[%s2529_s14 + $0x8] sm:$0xff] %v1372_v3  ;;  %v1374_v58 = vpop.f32.mrb[2].mxu0  ;;  %1551 = vst [vmem:[%s2529_s14 + $0x18] sm:$0xff] %v1425_v15  ;;  %v1427_v59 = vpop.f32.mrb[2].mxu1 }
 0x176   : > { %1556 = vst [vmem:[%s2529_s14 + $0x40] sm:$0xff] %v1374_v58  ;;  %v1376_v60 = vpop.f32.mrb[3].mxu0  ;;  %1558 = vst [vmem:[%s2529_s14 + $0x50] sm:$0xff] %v1427_v59  ;;  %v1429_v61 = vpop.f32.mrb[3].mxu1 }
 0x177   : > { %1557 = vst [vmem:[%s2529_s14 + $0x48] sm:$0xff] %v1376_v60  ;;  %1559 = vst [vmem:[%s2529_s14 + $0x58] sm:$0xff] %v1429_v61 }
 0x17b   : > { %v1380_v62 = vpop.f32.mrb[4].mxu0  ;;  %v1433_v63 = vpop.f32.mrb[4].mxu1  ;;  %v1605_v26 = vld [vmem:[%s2529_s14] sm:$0xff] (%p2041_p6)  ;;  %v1609_v27 = vld [vmem:[%s2529_s14 + $0x10] sm:$0xff] (%p2041_p6) }
 0x17c   : > { %1564 = vst [vmem:[%s2529_s14 + $0x80] sm:$0xff] %v1380_v62  ;;  %v1382_v0 = vpop.f32.mrb[5].mxu0  ;;  %1566 = vst [vmem:[%s2529_s14 + $0x90] sm:$0xff] %v1433_v63  ;;  %v1435_v2 = vpop.f32.mrb[5].mxu1  ;;  %v1607_v6 = vld [vmem:[%s2529_s14 + $0x8] sm:$0xff] (%p2041_p6)  ;;  %v1611_v28 = vld [vmem:[%s2529_s14 + $0x18] sm:$0xff] (%p2041_p6) }
 0x17d   : > { %1565 = vst [vmem:[%s2529_s14 + $0x88] sm:$0xff] %v1382_v0  ;;  %v1384_v4 = vpop.f32.mrb[6].mxu0  ;;  %1567 = vst [vmem:[%s2529_s14 + $0x98] sm:$0xff] %v1435_v2  ;;  %v1437_v5 = vpop.f32.mrb[6].mxu1  ;;  %v1621_v23 = vld [vmem:[%s2529_s14 + $0x40] sm:$0xff] (%p2041_p6)  ;;  %v1625_v35 = vld [vmem:[%s2529_s14 + $0x50] sm:$0xff] (%p2041_p6) }
 0x17e   : > { %1572 = vst [vmem:[%s2529_s14 + $0xc0] sm:$0xff] %v1384_v4  ;;  %v1386_v7 = vpop.f32.mrb[7].mxu0  ;;  %1574 = vst [vmem:[%s2529_s14 + $0xd0] sm:$0xff] %v1437_v5  ;;  %v1439_v8 = vpop.f32.mrb[7].mxu1  ;;  %v1623_v34 = vld [vmem:[%s2529_s14 + $0x48] sm:$0xff] (%p2041_p6)  ;;  %v1627_v36 = vld [vmem:[%s2529_s14 + $0x58] sm:$0xff] (%p2041_p6) }
 0x17f   : > { %1573 = vst [vmem:[%s2529_s14 + $0xc8] sm:$0xff] %v1386_v7  ;;  %1575 = vst [vmem:[%s2529_s14 + $0xd8] sm:$0xff] %v1439_v8 }
 0x180   : > { %1606 = vst [vmem:[%s2572_s22] sm:$0xff] (%p2041_p6), %v1605_v26  ;;  %1608 = vst [vmem:[%s2572_s22 + $0x8] sm:$0xff] (%p2041_p6), %v1607_v6 }
 0x181   : > { %1610 = vst [vmem:[%s2572_s22 + $0x10] sm:$0xff] (%p2041_p6), %v1609_v27  ;;  %1612 = vst [vmem:[%s2572_s22 + $0x18] sm:$0xff] (%p2041_p6), %v1611_v28 }
 0x182   : > { %1622 = vst [vmem:[%s2572_s22 + $0x80] sm:$0xff] (%p2041_p6), %v1621_v23  ;;  %1624 = vst [vmem:[%s2572_s22 + $0x88] sm:$0xff] (%p2041_p6), %v1623_v34 }
 0x183   : > { %1626 = vst [vmem:[%s2572_s22 + $0x90] sm:$0xff] (%p2041_p6), %v1625_v35  ;;  %1628 = vst [vmem:[%s2572_s22 + $0x98] sm:$0xff] (%p2041_p6), %v1627_v36  ;;  %v1637_v57 = vld [vmem:[%s2529_s14 + $0x80] sm:$0xff] (%p2041_p6)  ;;  %v1641_v42 = vld [vmem:[%s2529_s14 + $0x90] sm:$0xff] (%p2041_p6) }
 0x184   : > { %v1639_v41 = vld [vmem:[%s2529_s14 + $0x88] sm:$0xff] (%p2041_p6)  ;;  %1638 = vst [vmem:[%s2572_s22 + $0x100] sm:$0xff] (%p2041_p6), %v1637_v57  ;;  %v1643_v43 = vld [vmem:[%s2529_s14 + $0x98] sm:$0xff] (%p2041_p6)  ;;  %1642 = vst [vmem:[%s2572_s22 + $0x110] sm:$0xff] (%p2041_p6), %v1641_v42 }
 0x185   : > { %1640 = vst [vmem:[%s2572_s22 + $0x108] sm:$0xff] (%p2041_p6), %v1639_v41  ;;  %1644 = vst [vmem:[%s2572_s22 + $0x118] sm:$0xff] (%p2041_p6), %v1643_v43  ;;  %v1653_v48 = vld [vmem:[%s2529_s14 + $0xc0] sm:$0xff] (%p2041_p6)  ;;  %v1657_v50 = vld [vmem:[%s2529_s14 + $0xd0] sm:$0xff] (%p2041_p6) }
 0x186   : > { %v1655_v49 = vld [vmem:[%s2529_s14 + $0xc8] sm:$0xff] (%p2041_p6)  ;;  %1654 = vst [vmem:[%s2572_s22 + $0x180] sm:$0xff] (%p2041_p6), %v1653_v48  ;;  %1658 = vst [vmem:[%s2572_s22 + $0x190] sm:$0xff] (%p2041_p6), %v1657_v50  ;;  %v1659_v51 = vld [vmem:[%s2529_s14 + $0xd8] sm:$0xff] (%p2041_p6) }
 0x187   : > { %1656 = vst [vmem:[%s2572_s22 + $0x188] sm:$0xff] (%p2041_p6), %v1655_v49  ;;  %1660 = vst [vmem:[%s2572_s22 + $0x198] sm:$0xff] (%p2041_p6), %v1659_v51 }
 0x1b3   : > { %v1476_v9 = vpop.f32.mrb[8].mxu0  ;;  %v1529_v10 = vpop.f32.mrb[8].mxu1 }
 0x1b4   : > { %1552 = vst [vmem:[%s2529_s14 + $0x20] sm:$0xff] %v1476_v9  ;;  %v1478_v11 = vpop.f32.mrb[9].mxu0  ;;  %1554 = vst [vmem:[%s2529_s14 + $0x30] sm:$0xff] %v1529_v10  ;;  %v1531_v1 = vpop.f32.mrb[9].mxu1 }
 0x1b5   : > { %1553 = vst [vmem:[%s2529_s14 + $0x28] sm:$0xff] %v1478_v11  ;;  %v1480_v12 = vpop.f32.mrb[10].mxu0  ;;  %1555 = vst [vmem:[%s2529_s14 + $0x38] sm:$0xff] %v1531_v1  ;;  %v1533_v13 = vpop.f32.mrb[10].mxu1 }
 0x1b6   : > { %1560 = vst [vmem:[%s2529_s14 + $0x60] sm:$0xff] %v1480_v12  ;;  %v1482_v14 = vpop.f32.mrb[11].mxu0  ;;  %1562 = vst [vmem:[%s2529_s14 + $0x70] sm:$0xff] %v1533_v13  ;;  %v1535_v16 = vpop.f32.mrb[11].mxu1 }
 0x1b7   : > { %1561 = vst [vmem:[%s2529_s14 + $0x68] sm:$0xff] %v1482_v14  ;;  %1563 = vst [vmem:[%s2529_s14 + $0x78] sm:$0xff] %v1535_v16 }
 0x1b9   : > { %1586 = sbr.rel (!%p2041_p6) target bundleno = 456 (0x1c8), region = 63 }
 0x1bb   : > { %v1486_v17 = vpop.f32.mrb[12].mxu0  ;;  %v1539_v18 = vpop.f32.mrb[12].mxu1  ;;  %v1613_v30 = vld [vmem:[%s2529_s14 + $0x20] sm:$0xff] (%p2041_p6)  ;;  %v1617_v32 = vld [vmem:[%s2529_s14 + $0x30] sm:$0xff] (%p2041_p6) }
 0x1bc   : > { %1568 = vst [vmem:[%s2529_s14 + $0xa0] sm:$0xff] %v1486_v17  ;;  %v1488_v19 = vpop.f32.mrb[13].mxu0  ;;  %1570 = vst [vmem:[%s2529_s14 + $0xb0] sm:$0xff] %v1539_v18  ;;  %v1541_v20 = vpop.f32.mrb[13].mxu1  ;;  %v1615_v31 = vld [vmem:[%s2529_s14 + $0x28] sm:$0xff] (%p2041_p6)  ;;  %v1619_v33 = vld [vmem:[%s2529_s14 + $0x38] sm:$0xff] (%p2041_p6) }
 0x1bd   : > { %1569 = vst [vmem:[%s2529_s14 + $0xa8] sm:$0xff] %v1488_v19  ;;  %v1490_v21 = vpop.f32.mrb[14].mxu0  ;;  %1571 = vst [vmem:[%s2529_s14 + $0xb8] sm:$0xff] %v1541_v20  ;;  %v1543_v22 = vpop.f32.mrb[14].mxu1  ;;  %v1629_v37 = vld [vmem:[%s2529_s14 + $0x60] sm:$0xff] (%p2041_p6)  ;;  %v1633_v39 = vld [vmem:[%s2529_s14 + $0x70] sm:$0xff] (%p2041_p6) }
 0x1be   : > { %1576 = vst [vmem:[%s2529_s14 + $0xe0] sm:$0xff] %v1490_v21  ;;  %v1492_v24 = vpop.f32.mrb[15].mxu0  ;;  %1578 = vst [vmem:[%s2529_s14 + $0xf0] sm:$0xff] %v1543_v22  ;;  %v1545_v25 = vpop.f32.mrb[15].mxu1  ;;  %v1631_v38 = vld [vmem:[%s2529_s14 + $0x68] sm:$0xff] (%p2041_p6)  ;;  %v1635_v40 = vld [vmem:[%s2529_s14 + $0x78] sm:$0xff] (%p2041_p6) }
 0x1bf   : > { %1577 = vst [vmem:[%s2529_s14 + $0xe8] sm:$0xff] %v1492_v24  ;;  %1579 = vst [vmem:[%s2529_s14 + $0xf8] sm:$0xff] %v1545_v25 }
 0x1c0   : > { %1614 = vst [vmem:[%s2572_s22 + $0x20] sm:$0xff] %v1613_v30  ;;  %1616 = vst [vmem:[%s2572_s22 + $0x28] sm:$0xff] %v1615_v31 }
 0x1c1   : > { %1618 = vst [vmem:[%s2572_s22 + $0x30] sm:$0xff] %v1617_v32  ;;  %1620 = vst [vmem:[%s2572_s22 + $0x38] sm:$0xff] %v1619_v33 }
 0x1c2   : > { %1630 = vst [vmem:[%s2572_s22 + $0xa0] sm:$0xff] %v1629_v37  ;;  %1632 = vst [vmem:[%s2572_s22 + $0xa8] sm:$0xff] %v1631_v38 }
 0x1c3   : > { %1634 = vst [vmem:[%s2572_s22 + $0xb0] sm:$0xff] %v1633_v39  ;;  %1636 = vst [vmem:[%s2572_s22 + $0xb8] sm:$0xff] %v1635_v40  ;;  %v1645_v44 = vld [vmem:[%s2529_s14 + $0xa0] sm:$0xff]  ;;  %v1649_v46 = vld [vmem:[%s2529_s14 + $0xb0] sm:$0xff] }
 0x1c4   : > { %1646 = vst [vmem:[%s2572_s22 + $0x120] sm:$0xff] %v1645_v44  ;;  %v1647_v45 = vld [vmem:[%s2529_s14 + $0xa8] sm:$0xff]  ;;  %v1651_v47 = vld [vmem:[%s2529_s14 + $0xb8] sm:$0xff]  ;;  %1650 = vst [vmem:[%s2572_s22 + $0x130] sm:$0xff] %v1649_v46 }
 0x1c5   : > { %1648 = vst [vmem:[%s2572_s22 + $0x128] sm:$0xff] %v1647_v45  ;;  %1652 = vst [vmem:[%s2572_s22 + $0x138] sm:$0xff] %v1651_v47  ;;  %v1661_v29 = vld [vmem:[%s2529_s14 + $0xe0] sm:$0xff]  ;;  %v1665_v54 = vld [vmem:[%s2529_s14 + $0xf0] sm:$0xff] }
 0x1c6   : > { %v1663_v52 = vld [vmem:[%s2529_s14 + $0xe8] sm:$0xff]  ;;  %1662 = vst [vmem:[%s2572_s22 + $0x1a0] sm:$0xff] %v1661_v29  ;;  %v1667_v55 = vld [vmem:[%s2529_s14 + $0xf8] sm:$0xff]  ;;  %1666 = vst [vmem:[%s2572_s22 + $0x1b0] sm:$0xff] %v1665_v54 }
 0x1c7   : > { %1664 = vst [vmem:[%s2572_s22 + $0x1a8] sm:$0xff] %v1663_v52  ;;  %1668 = vst [vmem:[%s2572_s22 + $0x1b8] sm:$0xff] %v1667_v55 }
 0x1c8 PF: > { %s14_s19 = sadd.s32 1, %s1979_s19   ;;  %s2656_s15 = smov %s1967_s16 }
 0x1c9   : > { %p11_p11 = scmp.ge.s32.totalorder %s14_s19, 4   ;;  %s2657_s16 = smov %s2046_s25 }
 0x1ca   : > { %s2658_s17 = smov %s1975_s18  ;;  %s2659_s18 = smov %s2661_s20 }
 0x1cb   :  { %13 = sbr.rel (!%p11_p11) target bundleno = 3 (0x3), region = 120 }

// kernel: generator_forward.7
= control target key start
LH: loop header
LB: loop body
LE: loop exit
PB: predicated region body
PF: predicated region fallthrough
CT: control target
= control target key end

     0   :  { %s1328_s15 = smov 0   ;;  %s1330_s16 = smov 0   ;;  %s1808_s0 = inlined_call_operand.vmem [shape: f32[128,128], index: 0, kind: input, shape index: {}]   ;;  %s1809_s1 = inlined_call_operand.vmem [shape: f32[1,128], index: 1, kind: input, shape index: {}]   ;;  %s1810_s2 = inlined_call_operand.vmem [shape: f32[1,128], index: 2, kind: input, shape index: {}]   ;;  %s1811_s3 = inlined_call_operand.vmem [shape: bf16[128,1024], index: 3, kind: input, shape index: {}]   ;;  %s1812_s4 = inlined_call_operand.vmem [shape: f32[128,1024], index: 4, kind: output, shape index: {}]  }
   0x1   :  { %s1332_s17 = smov 0   ;;  %s1334_s18 = smov 0  }
   0x2   :  { %s1336_s19 = smov 0  }
   0x3 LB: > { %s23_s20 = sadd.s32 1, %s1296_s18  ;;  %s1121_s21 = sadd.s32 4294967295, %s1300_s19   ;;  %s1300_s19 = sphi %s1336_s19, %s14_s19   ;;  %s1296_s18 = sphi %s1334_s18, %s1817_s18   ;;  %s1292_s17 = sphi %s1332_s17, %s1816_s17   ;;  %s1288_s16 = sphi %s1330_s16, %s1815_s16   ;;  %s1284_s15 = sphi %s1328_s15, %s1814_s15  }
   0x4   : > { %p24_p0 = scmp.ge.s32.totalorder %s23_s20, 2  ;;  %p108_p1 = scmp.ne.s32.totalorder %s1288_s16, %s1284_s15 }
   0x5   : > { %p109_p2 = scmp.eq.s32.totalorder %s1300_s19, 0  ;;  %p140_p4 = scmp.eq.s32.totalorder %s1121_s21, 1 }
   0x6   : > { %s1819_s20 = smov (%p24_p0, %s23_s20), 0  ;;  %s101_s23 = sadd.s32 1, %s1288_s16 }
   0x7   : > { %p110_p3 = por %p109_p2, %p108_p1  ;;  %s98_s22 = ssub.s32 %s1296_s18, %s1819_s20 }
   0x8   : > { %p99_p5 = scmp.eq.s32.totalorder %s98_s22, 0  ;;  %p1363_p6 = por %p140_p4, %p108_p1 }
   0x9   : > { %p1125_p7 = scmp.ge.s32.totalorder %s1300_s19, 2 }
   0xa   : > { %s1368_s25 = scalar_select %p99_p5, %s1288_s16, %s101_s23  }
   0xb   : > { %177 = sbr.rel (%p1125_p7) target bundleno = 38 (0x26), region = 28 }
  0x12   : > { %180 = sbr.rel (!%p110_p3) target bundleno = 38 (0x26), region = 32  ;;  %s182_s26 = sand.u32 (%p110_p3), 1, %s1288_s16  }
  0x13   : > { %s1171_s27 = sshll.u32 (%p110_p3), %s1296_s18, 4  ;;  %s1126_s28 = sshll.u32 (%p110_p3), %s182_s26, 8 }
  0x14   : > { %s1376_s5 = scalar_lea.vmem (%p110_p3), %s1811_s3, %s1171_s27  ;;  %s1381_s6 = scalar_lea.vmem (%p110_p3), [#allocation2], %s1126_s28 }
  0x15   : > { %v200_v0 = vld [vmem:[%s1376_s5] sm:$0xff] (%p110_p3)  ;;  %v202_v1 = vld [vmem:[%s1376_s5 + $0x8] sm:$0xff] (%p110_p3) }
  0x16   : > { %v204_v2 = vld [vmem:[%s1376_s5 + $0x20] sm:$0xff] (%p110_p3)  ;;  %201 = vst [vmem:[%s1381_s6] sm:$0xff] (%p110_p3), %v200_v0  ;;  %203 = vst [vmem:[%s1381_s6 + $0x8] sm:$0xff] (%p110_p3), %v202_v1  ;;  %v206_v3 = vld [vmem:[%s1376_s5 + $0x28] sm:$0xff] (%p110_p3) }
  0x17   : > { %205 = vst [vmem:[%s1381_s6 + $0x10] sm:$0xff] (%p110_p3), %v204_v2  ;;  %v208_v4 = vld [vmem:[%s1376_s5 + $0x40] sm:$0xff] (%p110_p3)  ;;  %v210_v5 = vld [vmem:[%s1376_s5 + $0x48] sm:$0xff] (%p110_p3)  ;;  %207 = vst [vmem:[%s1381_s6 + $0x18] sm:$0xff] (%p110_p3), %v206_v3 }
  0x18   : > { %209 = vst [vmem:[%s1381_s6 + $0x20] sm:$0xff] (%p110_p3), %v208_v4  ;;  %211 = vst [vmem:[%s1381_s6 + $0x28] sm:$0xff] (%p110_p3), %v210_v5  ;;  %v212_v6 = vld [vmem:[%s1376_s5 + $0x60] sm:$0xff] (%p110_p3)  ;;  %v214_v7 = vld [vmem:[%s1376_s5 + $0x68] sm:$0xff] (%p110_p3) }
  0x19   : > { %v216_v8 = vld [vmem:[%s1376_s5 + $0x80] sm:$0xff]  ;;  %213 = vst [vmem:[%s1381_s6 + $0x30] sm:$0xff] %v212_v6  ;;  %215 = vst [vmem:[%s1381_s6 + $0x38] sm:$0xff] %v214_v7  ;;  %v218_v9 = vld [vmem:[%s1376_s5 + $0x88] sm:$0xff] }
  0x1a   : > { %217 = vst [vmem:[%s1381_s6 + $0x40] sm:$0xff] %v216_v8  ;;  %v220_v10 = vld [vmem:[%s1376_s5 + $0xa0] sm:$0xff]  ;;  %v222_v11 = vld [vmem:[%s1376_s5 + $0xa8] sm:$0xff]  ;;  %219 = vst [vmem:[%s1381_s6 + $0x48] sm:$0xff] %v218_v9 }
  0x1b   : > { %221 = vst [vmem:[%s1381_s6 + $0x50] sm:$0xff] %v220_v10  ;;  %223 = vst [vmem:[%s1381_s6 + $0x58] sm:$0xff] %v222_v11  ;;  %v224_v12 = vld [vmem:[%s1376_s5 + $0xc0] sm:$0xff]  ;;  %v226_v13 = vld [vmem:[%s1376_s5 + $0xc8] sm:$0xff] }
  0x1c   : > { %v228_v14 = vld [vmem:[%s1376_s5 + $0xe0] sm:$0xff]  ;;  %225 = vst [vmem:[%s1381_s6 + $0x60] sm:$0xff] %v224_v12  ;;  %227 = vst [vmem:[%s1381_s6 + $0x68] sm:$0xff] %v226_v13  ;;  %v230_v15 = vld [vmem:[%s1376_s5 + $0xe8] sm:$0xff] }
  0x1d   : > { %229 = vst [vmem:[%s1381_s6 + $0x70] sm:$0xff] %v228_v14  ;;  %v232_v16 = vld [vmem:[%s1376_s5 + $0x100] sm:$0xff]  ;;  %v234_v17 = vld [vmem:[%s1376_s5 + $0x108] sm:$0xff]  ;;  %231 = vst [vmem:[%s1381_s6 + $0x78] sm:$0xff] %v230_v15 }
  0x1e   : > { %233 = vst [vmem:[%s1381_s6 + $0x80] sm:$0xff] %v232_v16  ;;  %235 = vst [vmem:[%s1381_s6 + $0x88] sm:$0xff] %v234_v17  ;;  %v236_v18 = vld [vmem:[%s1376_s5 + $0x120] sm:$0xff]  ;;  %v238_v19 = vld [vmem:[%s1376_s5 + $0x128] sm:$0xff] }
  0x1f   : > { %v240_v20 = vld [vmem:[%s1376_s5 + $0x140] sm:$0xff]  ;;  %237 = vst [vmem:[%s1381_s6 + $0x90] sm:$0xff] %v236_v18  ;;  %239 = vst [vmem:[%s1381_s6 + $0x98] sm:$0xff] %v238_v19  ;;  %v242_v21 = vld [vmem:[%s1376_s5 + $0x148] sm:$0xff] }
  0x20   : > { %241 = vst [vmem:[%s1381_s6 + $0xa0] sm:$0xff] %v240_v20  ;;  %v244_v22 = vld [vmem:[%s1376_s5 + $0x160] sm:$0xff]  ;;  %v246_v23 = vld [vmem:[%s1376_s5 + $0x168] sm:$0xff]  ;;  %243 = vst [vmem:[%s1381_s6 + $0xa8] sm:$0xff] %v242_v21 }
  0x21   : > { %245 = vst [vmem:[%s1381_s6 + $0xb0] sm:$0xff] %v244_v22  ;;  %247 = vst [vmem:[%s1381_s6 + $0xb8] sm:$0xff] %v246_v23  ;;  %v248_v24 = vld [vmem:[%s1376_s5 + $0x180] sm:$0xff]  ;;  %v250_v25 = vld [vmem:[%s1376_s5 + $0x188] sm:$0xff] }
  0x22   : > { %v252_v26 = vld [vmem:[%s1376_s5 + $0x1a0] sm:$0xff]  ;;  %249 = vst [vmem:[%s1381_s6 + $0xc0] sm:$0xff] %v248_v24  ;;  %251 = vst [vmem:[%s1381_s6 + $0xc8] sm:$0xff] %v250_v25  ;;  %v254_v27 = vld [vmem:[%s1376_s5 + $0x1a8] sm:$0xff] }
  0x23   : > { %253 = vst [vmem:[%s1381_s6 + $0xd0] sm:$0xff] %v252_v26  ;;  %v256_v28 = vld [vmem:[%s1376_s5 + $0x1c0] sm:$0xff]  ;;  %v258_v29 = vld [vmem:[%s1376_s5 + $0x1c8] sm:$0xff]  ;;  %255 = vst [vmem:[%s1381_s6 + $0xd8] sm:$0xff] %v254_v27 }
  0x24   : > { %257 = vst [vmem:[%s1381_s6 + $0xe0] sm:$0xff] %v256_v28  ;;  %259 = vst [vmem:[%s1381_s6 + $0xe8] sm:$0xff] %v258_v29  ;;  %v260_v30 = vld [vmem:[%s1376_s5 + $0x1e0] sm:$0xff]  ;;  %v262_v31 = vld [vmem:[%s1376_s5 + $0x1e8] sm:$0xff] }
  0x25   : > { %261 = vst [vmem:[%s1381_s6 + $0xf0] sm:$0xff] %v260_v30  ;;  %263 = vst [vmem:[%s1381_s6 + $0xf8] sm:$0xff] %v262_v31 }
  0x26 PF: > { %p1129_p8 = scmp.ge.s32.totalorder %s1300_s19, 1  ;;  %p268_p9 = scmp.lt.s32.totalorder %s1300_s19, 3 }
  0x28   : > { %p269_p10 = pnand %p1129_p8, %p268_p9 }
  0x29   : > { %s275_s7 = sand.u32 (!%p269_p10), 1, %s1284_s15   ;;  %v1302_v32 = vmov (!%p269_p10), 0   ;;  %v314_v51 = vld [vmem:[%s1808_s0] sm:$0xff] (!%p269_p10)  ;;  %v315_v52 = vld [vmem:[%s1808_s0 + $0x8] sm:$0xff] (!%p269_p10)  ;;  %v316_v3 = vld [vmem:[%s1808_s0 + $0x10] sm:$0xff] (!%p269_p10) }
  0x2a   : > { %272 = sbr.rel (%p269_p10) target bundleno = 357 (0x165), region = 55  ;;  %s1130_s8 = sshll.u32 (!%p269_p10), %s275_s7, 8  ;;  %624 = vmatprep.mubr.bf16.mxu0 (!%p269_p10), %v1302_v32  ;;  %737 = vmatprep.mubr.bf16.mxu1 (!%p269_p10), %v1302_v32  ;;  %v1482_v55 = vld [vmem:[%s1809_s1] ss:$0 sm:$0xff] (!%p269_p10)  ;;  %v317_v6 = vld [vmem:[%s1808_s0 + $0x18] sm:$0xff] (!%p269_p10)  ;;  %v319_v19 = vld [vmem:[%s1808_s0 + $0x28] sm:$0xff] (!%p269_p10) }
  0x2b   : > { %s1451_s9 = scalar_lea.vmem (!%p269_p10), [#allocation2], %s1130_s8  ;;  %v337_v58 = vmul.f32 (!%p269_p10), %v1482_v55, %v314_v51  ;;  %v338_v59 = vmul.f32 (!%p269_p10), %v1482_v55, %v315_v52  ;;  %v1491_v60 = vld [vmem:[%s1810_s2] ss:$0 sm:$0xff] (!%p269_p10)  ;;  %v339_v11 = vmul.f32 (!%p269_p10), %v1482_v55, %v316_v3  ;;  %v340_v12 = vmul.f32 (!%p269_p10), %v1482_v55, %v317_v6  ;;  %v320_v27 = vld [vmem:[%s1808_s0 + $0x30] sm:$0xff] (!%p269_p10)  ;;  %v321_v28 = vld [vmem:[%s1808_s0 + $0x38] sm:$0xff] (!%p269_p10)  ;;  %s1131_s12 = sshll.u32 (!%p269_p10), %s275_s7, 9 }
  0x2c   : > { %v1214_v33 = vld [vmem:[%s1451_s9 + $0x4] ss:$16 sps:$4 sm:$0xff] (!%p269_p10)   ;;  %v1216_v34 = vld [vmem:[%s1451_s9 + $0xc] ss:$16 sps:$4 sm:$0xff] (!%p269_p10)   ;;  %v1218_v35 = vld [vmem:[%s1451_s9] ss:$16 sps:$4 sm:$0xff] (!%p269_p10)   ;;  %v342_v23 = vmul.f32 (!%p269_p10), %v1482_v55, %v319_v19  ;;  %v343_v31 = vmul.f32 (!%p269_p10), %v1482_v55, %v320_v27 }
  0x2d   : > { %592 = vmatprep.subr.bf16.mxu0 (!%p269_p10), %v1214_v33  ;;  %v1219_v36 = vld [vmem:[%s1451_s9 + $0x8] ss:$16 sps:$4 sm:$0xff] (!%p269_p10)   ;;  %705 = vmatprep.subr.bf16.mxu1 (!%p269_p10), %v1216_v34  ;;  %v1220_v37 = vld [vmem:[%s1451_s9 + $0x24] ss:$16 sps:$4 sm:$0xff] (!%p269_p10)   ;;  %v1222_v38 = vld [vmem:[%s1451_s9 + $0x2c] ss:$16 sps:$4 sm:$0xff] (!%p269_p10)   ;;  %v360_v1 = vadd.f32 (!%p269_p10), %v1491_v60, %v337_v58  ;;  %v361_v2 = vadd.f32 (!%p269_p10), %v1491_v60, %v338_v59  ;;  %v362_v16 = vadd.f32 (!%p269_p10), %v1491_v60, %v339_v11 }
  0x2e   : > { %593 = vmatpush1.bf16.msra.mxu0 (!%p269_p10), %v1218_v35  ;;  %706 = vmatpush1.bf16.msra.mxu1 (!%p269_p10), %v1219_v36  ;;  %v1224_v39 = vld [vmem:[%s1451_s9 + $0x20] ss:$16 sps:$4 sm:$0xff] (!%p269_p10)   ;;  %v1225_v40 = vld [vmem:[%s1451_s9 + $0x28] ss:$16 sps:$4 sm:$0xff] (!%p269_p10)   ;;  %v1226_v41 = vld [vmem:[%s1451_s9 + $0x44] ss:$16 sps:$4 sm:$0xff] (!%p269_p10)   ;;  %v363_v17 = vadd.f32 (!%p269_p10), %v1491_v60, %v340_v12  ;;  %v365_v26 = vadd.f32 (!%p269_p10), %v1491_v60, %v342_v23  ;;  %v344_v33 = vmul.f32 (!%p269_p10), %v1482_v55, %v321_v28 }
  0x2f   : > { %594 = vmatprep.subr.bf16.mxu0 (!%p269_p10), %v1220_v37  ;;  %707 = vmatprep.subr.bf16.mxu1 (!%p269_p10), %v1222_v38  ;;  %v1228_v42 = vld [vmem:[%s1451_s9 + $0x4c] ss:$16 sps:$4 sm:$0xff] (!%p269_p10)   ;;  %v1230_v43 = vld [vmem:[%s1451_s9 + $0x40] ss:$16 sps:$4 sm:$0xff] (!%p269_p10)   ;;  %v1231_v44 = vld [vmem:[%s1451_s9 + $0x48] ss:$16 sps:$4 sm:$0xff] (!%p269_p10)   ;;  %v366_v35 = vadd.f32 (!%p269_p10), %v1491_v60, %v343_v31 }
  0x30   : > { %v1232_v45 = vld [vmem:[%s1451_s9 + $0x64] ss:$16 sps:$4 sm:$0xff] (!%p269_p10)   ;;  %v1234_v46 = vld [vmem:[%s1451_s9 + $0x6c] ss:$16 sps:$4 sm:$0xff] (!%p269_p10)   ;;  %v1236_v47 = vld [vmem:[%s1451_s9 + $0x60] ss:$16 sps:$4 sm:$0xff] (!%p269_p10)   ;;  %v367_v36 = vadd.f32 (!%p269_p10), %v1491_v60, %v344_v33 }
  0x31   : > { %v1237_v48 = vld [vmem:[%s1451_s9 + $0x68] ss:$16 sps:$4 sm:$0xff]   ;;  %v1238_v49 = vld [vmem:[%s1451_s9 + $0x84] ss:$16 sps:$4 sm:$0xff]   ;;  %v1240_v50 = vld [vmem:[%s1451_s9 + $0x8c] ss:$16 sps:$4 sm:$0xff]  }
  0x32   : > { %595 = vmatpush1.bf16.msra.mxu0 %v1224_v39  ;;  %708 = vmatpush1.bf16.msra.mxu1 %v1225_v40  ;;  %v1242_v53 = vld [vmem:[%s1451_s9 + $0x80] ss:$16 sps:$4 sm:$0xff]   ;;  %v1243_v54 = vld [vmem:[%s1451_s9 + $0x88] ss:$16 sps:$4 sm:$0xff]   ;;  %v1244_v56 = vld [vmem:[%s1451_s9 + $0xa4] ss:$16 sps:$4 sm:$0xff]  }
  0x33   : > { %596 = vmatprep.subr.bf16.mxu0 %v1226_v41  ;;  %709 = vmatprep.subr.bf16.mxu1 %v1228_v42  ;;  %v1246_v57 = vld [vmem:[%s1451_s9 + $0xac] ss:$16 sps:$4 sm:$0xff]   ;;  %v1248_v61 = vld [vmem:[%s1451_s9 + $0xa0] ss:$16 sps:$4 sm:$0xff]   ;;  %v1249_v62 = vld [vmem:[%s1451_s9 + $0xa8] ss:$16 sps:$4 sm:$0xff]  }
  0x34   : > { %v1250_v63 = vld [vmem:[%s1451_s9 + $0xc4] ss:$16 sps:$4 sm:$0xff]   ;;  %v1252_v0 = vld [vmem:[%s1451_s9 + $0xcc] ss:$16 sps:$4 sm:$0xff]   ;;  %v1254_v4 = vld [vmem:[%s1451_s9 + $0xc0] ss:$16 sps:$4 sm:$0xff]  }
  0x35   : > { %v1255_v5 = vld [vmem:[%s1451_s9 + $0xc8] ss:$16 sps:$4 sm:$0xff]   ;;  %v1256_v7 = vld [vmem:[%s1451_s9 + $0xe4] ss:$16 sps:$4 sm:$0xff]   ;;  %v1258_v8 = vld [vmem:[%s1451_s9 + $0xec] ss:$16 sps:$4 sm:$0xff]  }
  0x36   : > { %597 = vmatpush1.bf16.msra.mxu0 %v1230_v43  ;;  %710 = vmatpush1.bf16.msra.mxu1 %v1231_v44  ;;  %v376_v9 = vmax.f32 %v360_v1, 0.0  ;;  %v377_v10 = vmax.f32 %v361_v2, 0.0  ;;  %v1260_v13 = vld [vmem:[%s1451_s9 + $0xe0] ss:$16 sps:$4 sm:$0xff]   ;;  %v1261_v14 = vld [vmem:[%s1451_s9 + $0xe8] ss:$16 sps:$4 sm:$0xff]  }
  0x37   : > { %598 = vmatprep.subr.bf16.mxu0 %v1232_v45  ;;  %711 = vmatprep.subr.bf16.mxu1 %v1234_v46  ;;  %v318_v18 = vld [vmem:[%s1808_s0 + $0x20] sm:$0xff]  ;;  %v378_v20 = vmax.f32 %v362_v16, 0.0  ;;  %v379_v21 = vmax.f32 %v363_v17, 0.0  ;;  %v381_v30 = vmax.f32 %v365_v26, 0.0  ;;  %v323_v38 = vld [vmem:[%s1808_s0 + $0x48] sm:$0xff]  ;;  %v382_v39 = vmax.f32 %v366_v35, 0.0 }
  0x38   : > { %v392_v15 = vpack.c.bf16 %v377_v10, %v376_v9  ;;  %v341_v22 = vmul.f32 %v1482_v55, %v318_v18  ;;  %v322_v37 = vld [vmem:[%s1808_s0 + $0x40] sm:$0xff]  ;;  %v383_v40 = vmax.f32 %v367_v36, 0.0  ;;  %v346_v42 = vmul.f32 %v1482_v55, %v323_v38  ;;  %v324_v46 = vld [vmem:[%s1808_s0 + $0x50] sm:$0xff]  ;;  %v329_v3 = vld [vmem:[%s1808_s0 + $0x78] sm:$0xff]  ;;  %s1591_s13 = scalar_lea.vmem [#allocation3], %s1131_s12  ;;  %s1172_s15 = sshll.u32 (%p1363_p6), %s1292_s17, 5 }
  0x39   : > { %v393_v24 = vpack.c.bf16 %v379_v21, %v378_v20  ;;  %v345_v41 = vmul.f32 %v1482_v55, %v322_v37  ;;  %v328_v2 = vld [vmem:[%s1808_s0 + $0x70] sm:$0xff]  ;;  %s1666_s21 = scalar_lea.vmem (%p1363_p6), %s1812_s4, %s1172_s15 }
  0x3a   : > { %599 = vmatpush1.bf16.msra.mxu0 %v1236_v47  ;;  %712 = vmatpush1.bf16.msra.mxu1 %v1237_v48  ;;  %v364_v25 = vadd.f32 %v1491_v60, %v341_v22  ;;  %v395_v43 = vpack.c.bf16 %v383_v40, %v382_v39  ;;  %v369_v45 = vadd.f32 %v1491_v60, %v346_v42  ;;  %v325_v47 = vld [vmem:[%s1808_s0 + $0x58] sm:$0xff] }
  0x3b   : > { %600 = vmatprep.subr.bf16.mxu0 %v1238_v49  ;;  %713 = vmatprep.subr.bf16.mxu1 %v1240_v50  ;;  %v368_v44 = vadd.f32 %v1491_v60, %v345_v41  ;;  %v347_v50 = vmul.f32 %v1482_v55, %v324_v46  ;;  %v348_v51 = vmul.f32 %v1482_v55, %v325_v47 }
  0x3c   : > { %v380_v29 = vmax.f32 %v364_v25, 0.0  ;;  %v385_v49 = vmax.f32 %v369_v45, 0.0  ;;  %v351_v6 = vmul.f32 %v1482_v55, %v328_v2 }
  0x3d   : > { %v384_v48 = vmax.f32 %v368_v44, 0.0 }
  0x3e   : > { %601 = vmatpush1.bf16.msra.mxu0 %v1242_v53  ;;  %714 = vmatpush1.bf16.msra.mxu1 %v1243_v54  ;;  %v394_v34 = vpack.c.bf16 %v381_v30, %v380_v29  ;;  %v370_v53 = vadd.f32 %v1491_v60, %v347_v50  ;;  %v371_v54 = vadd.f32 %v1491_v60, %v348_v51 }
  0x3f   : > { %602 = vmatprep.subr.bf16.mxu0 %v1244_v56  ;;  %715 = vmatprep.subr.bf16.mxu1 %v1246_v57  ;;  %v396_v52 = vpack.c.bf16 %v385_v49, %v384_v48  ;;  %v326_v56 = vld [vmem:[%s1808_s0 + $0x60] sm:$0xff]  ;;  %v327_v57 = vld [vmem:[%s1808_s0 + $0x68] sm:$0xff]  ;;  %v374_v9 = vadd.f32 %v1491_v60, %v351_v6 }
  0x40   : > { %v386_v58 = vmax.f32 %v370_v53, 0.0  ;;  %v387_v59 = vmax.f32 %v371_v54, 0.0 }
  0x41   : > { %v390_v11 = vmax.f32 %v374_v9, 0.0 }
  0x42   : > { %603 = vmatpush1.bf16.msra.mxu0 %v1248_v61  ;;  %716 = vmatpush1.bf16.msra.mxu1 %v1249_v62  ;;  %v349_v61 = vmul.f32 %v1482_v55, %v326_v56  ;;  %v350_v62 = vmul.f32 %v1482_v55, %v327_v57 }
  0x43   : > { %604 = vmatprep.subr.bf16.mxu0 %v1250_v63  ;;  %717 = vmatprep.subr.bf16.mxu1 %v1252_v0  ;;  %v397_v63 = vpack.c.bf16 %v387_v59, %v386_v58 }
  0x44   : > { %v372_v0 = vadd.f32 %v1491_v60, %v349_v61  ;;  %v373_v1 = vadd.f32 %v1491_v60, %v350_v62 }
  0x46   : > { %605 = vmatpush1.bf16.msra.mxu0 %v1254_v4  ;;  %718 = vmatpush1.bf16.msra.mxu1 %v1255_v5  ;;  %v388_v4 = vmax.f32 %v372_v0, 0.0  ;;  %v389_v5 = vmax.f32 %v373_v1, 0.0 }
  0x47   : > { %606 = vmatprep.subr.bf16.mxu0 %v1256_v7  ;;  %719 = vmatprep.subr.bf16.mxu1 %v1258_v8  ;;  %v352_v7 = vmul.f32 %v1482_v55, %v329_v3 }
  0x48   : > { %v398_v8 = vpack.c.bf16 %v389_v5, %v388_v4 }
  0x49   : > { %v375_v10 = vadd.f32 %v1491_v60, %v352_v7 }
  0x4a   : > { %607 = vmatpush1.bf16.msra.mxu0 %v1260_v13  ;;  %720 = vmatpush1.bf16.msra.mxu1 %v1261_v14 }
  0x4b   : > { %v391_v12 = vmax.f32 %v375_v10, 0.0 }
  0x4d   : > { %625 = vmatmul.mubr.bf16.vlgmr.msra.gmra.mrb[0].mxu0 %v392_v15  ;;  %738 = vmatmul.mubr.bf16.vlgmr.msra.gmra.mrb[0].mxu1 %v392_v15  ;;  %v399_v13 = vpack.c.bf16 %v391_v12, %v390_v11 }
  0x4e   : > { %634 = vmatprep.mubr.bf16.mxu0 %v1302_v32  ;;  %747 = vmatprep.mubr.bf16.mxu1 %v1302_v32 }
  0x55   : > { %635 = vmatmul.mubr.bf16.gmra.mrb[4].mxu0 %v393_v24  ;;  %748 = vmatmul.mubr.bf16.gmra.mrb[4].mxu1 %v393_v24 }
  0x56   : > { %644 = vmatprep.mubr.bf16.mxu0 %v1302_v32  ;;  %757 = vmatprep.mubr.bf16.mxu1 %v1302_v32 }
  0x5d   : > { %645 = vmatmul.mubr.bf16.gmra.mrb[8].mxu0 %v394_v34  ;;  %758 = vmatmul.mubr.bf16.gmra.mrb[8].mxu1 %v394_v34 }
  0x5e   : > { %654 = vmatprep.mubr.bf16.mxu0 %v1302_v32  ;;  %767 = vmatprep.mubr.bf16.mxu1 %v1302_v32 }
  0x65   : > { %655 = vmatmul.mubr.bf16.gmra.mrb[12].mxu0 %v395_v43  ;;  %768 = vmatmul.mubr.bf16.gmra.mrb[12].mxu1 %v395_v43 }
  0x66   : > { %664 = vmatprep.mubr.bf16.mxu0 %v1302_v32  ;;  %777 = vmatprep.mubr.bf16.mxu1 %v1302_v32 }
  0x6d   : > { %665 = vmatmul.mubr.bf16.gmra.mrb[16].mxu0 %v396_v52  ;;  %778 = vmatmul.mubr.bf16.gmra.mrb[16].mxu1 %v396_v52 }
  0x6e   : > { %674 = vmatprep.mubr.bf16.mxu0 %v1302_v32  ;;  %787 = vmatprep.mubr.bf16.mxu1 %v1302_v32 }
  0x75   : > { %675 = vmatmul.mubr.bf16.gmra.mrb[20].mxu0 %v397_v63  ;;  %788 = vmatmul.mubr.bf16.gmra.mrb[20].mxu1 %v397_v63 }
  0x76   : > { %684 = vmatprep.mubr.bf16.mxu0 %v1302_v32  ;;  %797 = vmatprep.mubr.bf16.mxu1 %v1302_v32 }
  0x7d   : > { %685 = vmatmul.mubr.bf16.gmra.mrb[24].mxu0 %v398_v8  ;;  %798 = vmatmul.mubr.bf16.gmra.mrb[24].mxu1 %v398_v8 }
  0x7e   : > { %694 = vmatprep.mubr.bf16.mxu0 %v1302_v32  ;;  %807 = vmatprep.mubr.bf16.mxu1 %v1302_v32 }
  0x85   : > { %695 = vmatmul.mubr.bf16.gmra.mrb[28].mxu0 %v399_v13  ;;  %808 = vmatmul.mubr.bf16.gmra.mrb[28].mxu1 %v399_v13 }
 0x120   : > { %v626_v55 = vpop.f32.mrb[0].mxu0  ;;  %v739_v14 = vpop.f32.mrb[0].mxu1 }
 0x121   : > { %818 = vst [vmem:[%s1591_s13] sm:$0xff] %v626_v55  ;;  %820 = vst [vmem:[%s1591_s13 + $0x10] sm:$0xff] %v739_v14  ;;  %v628_v32 = vpop.f32.mrb[1].mxu0  ;;  %v741_v60 = vpop.f32.mrb[1].mxu1 }
 0x122   : > { %819 = vst [vmem:[%s1591_s13 + $0x8] sm:$0xff] %v628_v32  ;;  %821 = vst [vmem:[%s1591_s13 + $0x18] sm:$0xff] %v741_v60  ;;  %v630_v15 = vpop.f32.mrb[2].mxu0  ;;  %v743_v16 = vpop.f32.mrb[2].mxu1 }
 0x123   : > { %822 = vst [vmem:[%s1591_s13 + $0x20] sm:$0xff] %v630_v15  ;;  %824 = vst [vmem:[%s1591_s13 + $0x30] sm:$0xff] %v743_v16  ;;  %v632_v17 = vpop.f32.mrb[3].mxu0  ;;  %v745_v18 = vpop.f32.mrb[3].mxu1 }
 0x124   : > { %823 = vst [vmem:[%s1591_s13 + $0x28] sm:$0xff] %v632_v17  ;;  %825 = vst [vmem:[%s1591_s13 + $0x38] sm:$0xff] %v745_v18 }
 0x128   : > { %v636_v19 = vpop.f32.mrb[4].mxu0  ;;  %v749_v20 = vpop.f32.mrb[4].mxu1  ;;  %v907_v55 = vld [vmem:[%s1591_s13] sm:$0xff] (%p1363_p6)  ;;  %v911_v32 = vld [vmem:[%s1591_s13 + $0x10] sm:$0xff] (%p1363_p6) }
 0x129   : > { %826 = vst [vmem:[%s1591_s13 + $0x40] sm:$0xff] %v636_v19  ;;  %828 = vst [vmem:[%s1591_s13 + $0x50] sm:$0xff] %v749_v20  ;;  %v638_v21 = vpop.f32.mrb[5].mxu0  ;;  %v751_v22 = vpop.f32.mrb[5].mxu1  ;;  %v909_v14 = vld [vmem:[%s1591_s13 + $0x8] sm:$0xff] (%p1363_p6)  ;;  %v913_v60 = vld [vmem:[%s1591_s13 + $0x18] sm:$0xff] (%p1363_p6) }
 0x12a   : > { %827 = vst [vmem:[%s1591_s13 + $0x48] sm:$0xff] %v638_v21  ;;  %829 = vst [vmem:[%s1591_s13 + $0x58] sm:$0xff] %v751_v22  ;;  %v640_v23 = vpop.f32.mrb[6].mxu0  ;;  %v753_v24 = vpop.f32.mrb[6].mxu1  ;;  %v915_v15 = vld [vmem:[%s1591_s13 + $0x20] sm:$0xff] (%p1363_p6)  ;;  %v919_v17 = vld [vmem:[%s1591_s13 + $0x30] sm:$0xff] (%p1363_p6) }
 0x12b   : > { %830 = vst [vmem:[%s1591_s13 + $0x60] sm:$0xff] %v640_v23  ;;  %832 = vst [vmem:[%s1591_s13 + $0x70] sm:$0xff] %v753_v24  ;;  %v642_v25 = vpop.f32.mrb[7].mxu0  ;;  %v755_v26 = vpop.f32.mrb[7].mxu1  ;;  %v917_v16 = vld [vmem:[%s1591_s13 + $0x28] sm:$0xff] (%p1363_p6)  ;;  %v921_v18 = vld [vmem:[%s1591_s13 + $0x38] sm:$0xff] (%p1363_p6) }
 0x12c   : > { %831 = vst [vmem:[%s1591_s13 + $0x68] sm:$0xff] %v642_v25  ;;  %833 = vst [vmem:[%s1591_s13 + $0x78] sm:$0xff] %v755_v26 }
 0x12d   : > { %908 = vst [vmem:[%s1666_s21] sm:$0xff] (%p1363_p6), %v907_v55  ;;  %910 = vst [vmem:[%s1666_s21 + $0x8] sm:$0xff] (%p1363_p6), %v909_v14 }
 0x12e   : > { %912 = vst [vmem:[%s1666_s21 + $0x10] sm:$0xff] (%p1363_p6), %v911_v32  ;;  %914 = vst [vmem:[%s1666_s21 + $0x18] sm:$0xff] (%p1363_p6), %v913_v60 }
 0x12f   : > { %916 = vst [vmem:[%s1666_s21 + $0x40] sm:$0xff] (%p1363_p6), %v915_v15  ;;  %918 = vst [vmem:[%s1666_s21 + $0x48] sm:$0xff] (%p1363_p6), %v917_v16 }
 0x130   : > { %v646_v27 = vpop.f32.mrb[8].mxu0  ;;  %v759_v28 = vpop.f32.mrb[8].mxu1  ;;  %v923_v19 = vld [vmem:[%s1591_s13 + $0x40] sm:$0xff] (%p1363_p6)  ;;  %920 = vst [vmem:[%s1666_s21 + $0x50] sm:$0xff] (%p1363_p6), %v919_v17  ;;  %922 = vst [vmem:[%s1666_s21 + $0x58] sm:$0xff] (%p1363_p6), %v921_v18  ;;  %v927_v21 = vld [vmem:[%s1591_s13 + $0x50] sm:$0xff] (%p1363_p6) }
 0x131   : > { %834 = vst [vmem:[%s1591_s13 + $0x80] sm:$0xff] %v646_v27  ;;  %836 = vst [vmem:[%s1591_s13 + $0x90] sm:$0xff] %v759_v28  ;;  %v648_v29 = vpop.f32.mrb[9].mxu0  ;;  %v761_v30 = vpop.f32.mrb[9].mxu1  ;;  %v925_v20 = vld [vmem:[%s1591_s13 + $0x48] sm:$0xff] (%p1363_p6)  ;;  %v929_v22 = vld [vmem:[%s1591_s13 + $0x58] sm:$0xff] (%p1363_p6) }
 0x132   : > { %835 = vst [vmem:[%s1591_s13 + $0x88] sm:$0xff] %v648_v29  ;;  %837 = vst [vmem:[%s1591_s13 + $0x98] sm:$0xff] %v761_v30  ;;  %v650_v31 = vpop.f32.mrb[10].mxu0  ;;  %v763_v33 = vpop.f32.mrb[10].mxu1  ;;  %v931_v23 = vld [vmem:[%s1591_s13 + $0x60] sm:$0xff] (%p1363_p6)  ;;  %v935_v25 = vld [vmem:[%s1591_s13 + $0x70] sm:$0xff] (%p1363_p6) }
 0x133   : > { %838 = vst [vmem:[%s1591_s13 + $0xa0] sm:$0xff] %v650_v31  ;;  %840 = vst [vmem:[%s1591_s13 + $0xb0] sm:$0xff] %v763_v33  ;;  %v652_v34 = vpop.f32.mrb[11].mxu0  ;;  %v765_v35 = vpop.f32.mrb[11].mxu1  ;;  %v933_v24 = vld [vmem:[%s1591_s13 + $0x68] sm:$0xff] (%p1363_p6)  ;;  %v937_v26 = vld [vmem:[%s1591_s13 + $0x78] sm:$0xff] (%p1363_p6) }
 0x134   : > { %839 = vst [vmem:[%s1591_s13 + $0xa8] sm:$0xff] %v652_v34  ;;  %841 = vst [vmem:[%s1591_s13 + $0xb8] sm:$0xff] %v765_v35 }
 0x135   : > { %924 = vst [vmem:[%s1666_s21 + $0x80] sm:$0xff] (%p1363_p6), %v923_v19  ;;  %926 = vst [vmem:[%s1666_s21 + $0x88] sm:$0xff] (%p1363_p6), %v925_v20 }
 0x136   : > { %928 = vst [vmem:[%s1666_s21 + $0x90] sm:$0xff] (%p1363_p6), %v927_v21  ;;  %930 = vst [vmem:[%s1666_s21 + $0x98] sm:$0xff] (%p1363_p6), %v929_v22 }
 0x137   : > { %932 = vst [vmem:[%s1666_s21 + $0xc0] sm:$0xff] (%p1363_p6), %v931_v23  ;;  %934 = vst [vmem:[%s1666_s21 + $0xc8] sm:$0xff] (%p1363_p6), %v933_v24 }
 0x138   : > { %v656_v36 = vpop.f32.mrb[12].mxu0  ;;  %v769_v37 = vpop.f32.mrb[12].mxu1  ;;  %936 = vst [vmem:[%s1666_s21 + $0xd0] sm:$0xff] (%p1363_p6), %v935_v25  ;;  %v939_v27 = vld [vmem:[%s1591_s13 + $0x80] sm:$0xff] (%p1363_p6)  ;;  %938 = vst [vmem:[%s1666_s21 + $0xd8] sm:$0xff] (%p1363_p6), %v937_v26  ;;  %v943_v29 = vld [vmem:[%s1591_s13 + $0x90] sm:$0xff] (%p1363_p6) }
 0x139   : > { %842 = vst [vmem:[%s1591_s13 + $0xc0] sm:$0xff] %v656_v36  ;;  %844 = vst [vmem:[%s1591_s13 + $0xd0] sm:$0xff] %v769_v37  ;;  %v658_v38 = vpop.f32.mrb[13].mxu0  ;;  %v771_v39 = vpop.f32.mrb[13].mxu1  ;;  %v941_v28 = vld [vmem:[%s1591_s13 + $0x88] sm:$0xff] (%p1363_p6)  ;;  %v945_v30 = vld [vmem:[%s1591_s13 + $0x98] sm:$0xff] (%p1363_p6) }
 0x13a   : > { %843 = vst [vmem:[%s1591_s13 + $0xc8] sm:$0xff] %v658_v38  ;;  %845 = vst [vmem:[%s1591_s13 + $0xd8] sm:$0xff] %v771_v39  ;;  %v660_v40 = vpop.f32.mrb[14].mxu0  ;;  %v773_v41 = vpop.f32.mrb[14].mxu1  ;;  %v947_v31 = vld [vmem:[%s1591_s13 + $0xa0] sm:$0xff] (%p1363_p6)  ;;  %v951_v34 = vld [vmem:[%s1591_s13 + $0xb0] sm:$0xff] (%p1363_p6) }
 0x13b   : > { %846 = vst [vmem:[%s1591_s13 + $0xe0] sm:$0xff] %v660_v40  ;;  %848 = vst [vmem:[%s1591_s13 + $0xf0] sm:$0xff] %v773_v41  ;;  %v662_v42 = vpop.f32.mrb[15].mxu0  ;;  %v775_v43 = vpop.f32.mrb[15].mxu1  ;;  %v949_v33 = vld [vmem:[%s1591_s13 + $0xa8] sm:$0xff] (%p1363_p6)  ;;  %v953_v35 = vld [vmem:[%s1591_s13 + $0xb8] sm:$0xff] (%p1363_p6) }
 0x13c   : > { %847 = vst [vmem:[%s1591_s13 + $0xe8] sm:$0xff] %v662_v42  ;;  %849 = vst [vmem:[%s1591_s13 + $0xf8] sm:$0xff] %v775_v43 }
 0x13d   : > { %940 = vst [vmem:[%s1666_s21 + $0x100] sm:$0xff] (%p1363_p6), %v939_v27  ;;  %942 = vst [vmem:[%s1666_s21 + $0x108] sm:$0xff] (%p1363_p6), %v941_v28 }
 0x13e   : > { %944 = vst [vmem:[%s1666_s21 + $0x110] sm:$0xff] (%p1363_p6), %v943_v29  ;;  %946 = vst [vmem:[%s1666_s21 + $0x118] sm:$0xff] (%p1363_p6), %v945_v30 }
 0x13f   : > { %948 = vst [vmem:[%s1666_s21 + $0x140] sm:$0xff] (%p1363_p6), %v947_v31  ;;  %950 = vst [vmem:[%s1666_s21 + $0x148] sm:$0xff] (%p1363_p6), %v949_v33 }
 0x140   : > { %v666_v44 = vpop.f32.mrb[16].mxu0  ;;  %v779_v45 = vpop.f32.mrb[16].mxu1  ;;  %952 = vst [vmem:[%s1666_s21 + $0x150] sm:$0xff] (%p1363_p6), %v951_v34  ;;  %954 = vst [vmem:[%s1666_s21 + $0x158] sm:$0xff] (%p1363_p6), %v953_v35  ;;  %v955_v36 = vld [vmem:[%s1591_s13 + $0xc0] sm:$0xff] (%p1363_p6)  ;;  %v959_v38 = vld [vmem:[%s1591_s13 + $0xd0] sm:$0xff] (%p1363_p6) }
 0x141   : > { %850 = vst [vmem:[%s1591_s13 + $0x100] sm:$0xff] %v666_v44  ;;  %852 = vst [vmem:[%s1591_s13 + $0x110] sm:$0xff] %v779_v45  ;;  %v668_v46 = vpop.f32.mrb[17].mxu0  ;;  %v781_v47 = vpop.f32.mrb[17].mxu1  ;;  %v957_v37 = vld [vmem:[%s1591_s13 + $0xc8] sm:$0xff] (%p1363_p6)  ;;  %v961_v39 = vld [vmem:[%s1591_s13 + $0xd8] sm:$0xff] (%p1363_p6) }
 0x142   : > { %851 = vst [vmem:[%s1591_s13 + $0x108] sm:$0xff] %v668_v46  ;;  %853 = vst [vmem:[%s1591_s13 + $0x118] sm:$0xff] %v781_v47  ;;  %v670_v48 = vpop.f32.mrb[18].mxu0  ;;  %v783_v49 = vpop.f32.mrb[18].mxu1  ;;  %v963_v40 = vld [vmem:[%s1591_s13 + $0xe0] sm:$0xff] (%p1363_p6)  ;;  %v967_v42 = vld [vmem:[%s1591_s13 + $0xf0] sm:$0xff] (%p1363_p6) }
 0x143   : > { %854 = vst [vmem:[%s1591_s13 + $0x120] sm:$0xff] %v670_v48  ;;  %856 = vst [vmem:[%s1591_s13 + $0x130] sm:$0xff] %v783_v49  ;;  %v672_v50 = vpop.f32.mrb[19].mxu0  ;;  %v785_v51 = vpop.f32.mrb[19].mxu1  ;;  %v965_v41 = vld [vmem:[%s1591_s13 + $0xe8] sm:$0xff] (%p1363_p6)  ;;  %v969_v43 = vld [vmem:[%s1591_s13 + $0xf8] sm:$0xff] (%p1363_p6) }
 0x144   : > { %855 = vst [vmem:[%s1591_s13 + $0x128] sm:$0xff] %v672_v50  ;;  %857 = vst [vmem:[%s1591_s13 + $0x138] sm:$0xff] %v785_v51 }
 0x145   : > { %956 = vst [vmem:[%s1666_s21 + $0x180] sm:$0xff] (%p1363_p6), %v955_v36  ;;  %958 = vst [vmem:[%s1666_s21 + $0x188] sm:$0xff] (%p1363_p6), %v957_v37 }
 0x146   : > { %960 = vst [vmem:[%s1666_s21 + $0x190] sm:$0xff] (%p1363_p6), %v959_v38  ;;  %962 = vst [vmem:[%s1666_s21 + $0x198] sm:$0xff] (%p1363_p6), %v961_v39 }
 0x147   : > { %964 = vst [vmem:[%s1666_s21 + $0x1c0] sm:$0xff] (%p1363_p6), %v963_v40  ;;  %966 = vst [vmem:[%s1666_s21 + $0x1c8] sm:$0xff] (%p1363_p6), %v965_v41 }
 0x148   : > { %v676_v52 = vpop.f32.mrb[20].mxu0  ;;  %v789_v53 = vpop.f32.mrb[20].mxu1  ;;  %v971_v44 = vld [vmem:[%s1591_s13 + $0x100] sm:$0xff] (%p1363_p6)  ;;  %968 = vst [vmem:[%s1666_s21 + $0x1d0] sm:$0xff] (%p1363_p6), %v967_v42  ;;  %970 = vst [vmem:[%s1666_s21 + $0x1d8] sm:$0xff] (%p1363_p6), %v969_v43  ;;  %v975_v46 = vld [vmem:[%s1591_s13 + $0x110] sm:$0xff] (%p1363_p6) }
 0x149   : > { %858 = vst [vmem:[%s1591_s13 + $0x140] sm:$0xff] %v676_v52  ;;  %860 = vst [vmem:[%s1591_s13 + $0x150] sm:$0xff] %v789_v53  ;;  %v678_v54 = vpop.f32.mrb[21].mxu0  ;;  %v791_v56 = vpop.f32.mrb[21].mxu1  ;;  %v973_v45 = vld [vmem:[%s1591_s13 + $0x108] sm:$0xff] (%p1363_p6)  ;;  %v977_v47 = vld [vmem:[%s1591_s13 + $0x118] sm:$0xff] (%p1363_p6) }
 0x14a   : > { %859 = vst [vmem:[%s1591_s13 + $0x148] sm:$0xff] %v678_v54  ;;  %861 = vst [vmem:[%s1591_s13 + $0x158] sm:$0xff] %v791_v56  ;;  %v680_v57 = vpop.f32.mrb[22].mxu0  ;;  %v793_v58 = vpop.f32.mrb[22].mxu1  ;;  %v979_v48 = vld [vmem:[%s1591_s13 + $0x120] sm:$0xff] (%p1363_p6)  ;;  %v983_v50 = vld [vmem:[%s1591_s13 + $0x130] sm:$0xff] (%p1363_p6) }
 0x14b   : > { %862 = vst [vmem:[%s1591_s13 + $0x160] sm:$0xff] %v680_v57  ;;  %864 = vst [vmem:[%s1591_s13 + $0x170] sm:$0xff] %v793_v58  ;;  %v682_v59 = vpop.f32.mrb[23].mxu0  ;;  %v795_v61 = vpop.f32.mrb[23].mxu1  ;;  %v981_v49 = vld [vmem:[%s1591_s13 + $0x128] sm:$0xff] (%p1363_p6)  ;;  %v985_v51 = vld [vmem:[%s1591_s13 + $0x138] sm:$0xff] (%p1363_p6) }
 0x14c   : > { %863 = vst [vmem:[%s1591_s13 + $0x168] sm:$0xff] %v682_v59  ;;  %865 = vst [vmem:[%s1591_s13 + $0x178] sm:$0xff] %v795_v61 }
 0x14d   : > { %972 = vst [vmem:[%s1666_s21 + $0x200] sm:$0xff] (%p1363_p6), %v971_v44  ;;  %974 = vst [vmem:[%s1666_s21 + $0x208] sm:$0xff] (%p1363_p6), %v973_v45 }
 0x14e   : > { %976 = vst [vmem:[%s1666_s21 + $0x210] sm:$0xff] (%p1363_p6), %v975_v46  ;;  %978 = vst [vmem:[%s1666_s21 + $0x218] sm:$0xff] (%p1363_p6), %v977_v47 }
 0x14f   : > { %980 = vst [vmem:[%s1666_s21 + $0x240] sm:$0xff] (%p1363_p6), %v979_v48  ;;  %982 = vst [vmem:[%s1666_s21 + $0x248] sm:$0xff] (%p1363_p6), %v981_v49 }
 0x150   : > { %v686_v62 = vpop.f32.mrb[24].mxu0  ;;  %v799_v63 = vpop.f32.mrb[24].mxu1  ;;  %984 = vst [vmem:[%s1666_s21 + $0x250] sm:$0xff] (%p1363_p6), %v983_v50  ;;  %v987_v52 = vld [vmem:[%s1591_s13 + $0x140] sm:$0xff] (%p1363_p6)  ;;  %986 = vst [vmem:[%s1666_s21 + $0x258] sm:$0xff] (%p1363_p6), %v985_v51  ;;  %v991_v54 = vld [vmem:[%s1591_s13 + $0x150] sm:$0xff] (%p1363_p6) }
 0x151   : > { %866 = vst [vmem:[%s1591_s13 + $0x180] sm:$0xff] %v686_v62  ;;  %868 = vst [vmem:[%s1591_s13 + $0x190] sm:$0xff] %v799_v63  ;;  %v688_v0 = vpop.f32.mrb[25].mxu0  ;;  %v801_v1 = vpop.f32.mrb[25].mxu1  ;;  %v989_v53 = vld [vmem:[%s1591_s13 + $0x148] sm:$0xff] (%p1363_p6)  ;;  %v993_v56 = vld [vmem:[%s1591_s13 + $0x158] sm:$0xff] (%p1363_p6) }
 0x152   : > { %867 = vst [vmem:[%s1591_s13 + $0x188] sm:$0xff] %v688_v0  ;;  %869 = vst [vmem:[%s1591_s13 + $0x198] sm:$0xff] %v801_v1  ;;  %v690_v2 = vpop.f32.mrb[26].mxu0  ;;  %v803_v3 = vpop.f32.mrb[26].mxu1  ;;  %v995_v57 = vld [vmem:[%s1591_s13 + $0x160] sm:$0xff] (%p1363_p6)  ;;  %v999_v59 = vld [vmem:[%s1591_s13 + $0x170] sm:$0xff] (%p1363_p6) }
 0x153   : > { %870 = vst [vmem:[%s1591_s13 + $0x1a0] sm:$0xff] %v690_v2  ;;  %872 = vst [vmem:[%s1591_s13 + $0x1b0] sm:$0xff] %v803_v3  ;;  %v692_v4 = vpop.f32.mrb[27].mxu0  ;;  %v805_v5 = vpop.f32.mrb[27].mxu1  ;;  %v997_v58 = vld [vmem:[%s1591_s13 + $0x168] sm:$0xff] (%p1363_p6)  ;;  %v1001_v61 = vld [vmem:[%s1591_s13 + $0x178] sm:$0xff] (%p1363_p6) }
 0x154   : > { %871 = vst [vmem:[%s1591_s13 + $0x1a8] sm:$0xff] %v692_v4  ;;  %873 = vst [vmem:[%s1591_s13 + $0x1b8] sm:$0xff] %v805_v5 }
 0x155   : > { %988 = vst [vmem:[%s1666_s21 + $0x280] sm:$0xff] (%p1363_p6), %v987_v52  ;;  %990 = vst [vmem:[%s1666_s21 + $0x288] sm:$0xff] (%p1363_p6), %v989_v53 }
 0x156   : > { %888 = sbr.rel (!%p1363_p6) target bundleno = 357 (0x165), region = 63  ;;  %992 = vst [vmem:[%s1666_s21 + $0x290] sm:$0xff] (%p1363_p6), %v991_v54  ;;  %994 = vst [vmem:[%s1666_s21 + $0x298] sm:$0xff] (%p1363_p6), %v993_v56 }
 0x157   : > { %996 = vst [vmem:[%s1666_s21 + $0x2c0] sm:$0xff] (%p1363_p6), %v995_v57  ;;  %998 = vst [vmem:[%s1666_s21 + $0x2c8] sm:$0xff] (%p1363_p6), %v997_v58 }
 0x158   : > { %v696_v6 = vpop.f32.mrb[28].mxu0  ;;  %v809_v7 = vpop.f32.mrb[28].mxu1  ;;  %1000 = vst [vmem:[%s1666_s21 + $0x2d0] sm:$0xff] (%p1363_p6), %v999_v59  ;;  %1002 = vst [vmem:[%s1666_s21 + $0x2d8] sm:$0xff] (%p1363_p6), %v1001_v61  ;;  %v1003_v62 = vld [vmem:[%s1591_s13 + $0x180] sm:$0xff] (%p1363_p6)  ;;  %v1007_v0 = vld [vmem:[%s1591_s13 + $0x190] sm:$0xff] (%p1363_p6) }
 0x159   : > { %874 = vst [vmem:[%s1591_s13 + $0x1c0] sm:$0xff] %v696_v6  ;;  %876 = vst [vmem:[%s1591_s13 + $0x1d0] sm:$0xff] %v809_v7  ;;  %v698_v8 = vpop.f32.mrb[29].mxu0  ;;  %v811_v9 = vpop.f32.mrb[29].mxu1  ;;  %v1005_v63 = vld [vmem:[%s1591_s13 + $0x188] sm:$0xff] (%p1363_p6)  ;;  %v1009_v1 = vld [vmem:[%s1591_s13 + $0x198] sm:$0xff] (%p1363_p6) }
 0x15a   : > { %875 = vst [vmem:[%s1591_s13 + $0x1c8] sm:$0xff] %v698_v8  ;;  %877 = vst [vmem:[%s1591_s13 + $0x1d8] sm:$0xff] %v811_v9  ;;  %v700_v10 = vpop.f32.mrb[30].mxu0  ;;  %v813_v11 = vpop.f32.mrb[30].mxu1  ;;  %v1011_v2 = vld [vmem:[%s1591_s13 + $0x1a0] sm:$0xff] (%p1363_p6)  ;;  %v1015_v4 = vld [vmem:[%s1591_s13 + $0x1b0] sm:$0xff] (%p1363_p6) }
 0x15b   : > { %878 = vst [vmem:[%s1591_s13 + $0x1e0] sm:$0xff] %v700_v10  ;;  %880 = vst [vmem:[%s1591_s13 + $0x1f0] sm:$0xff] %v813_v11  ;;  %v702_v12 = vpop.f32.mrb[31].mxu0  ;;  %v815_v13 = vpop.f32.mrb[31].mxu1  ;;  %v1013_v3 = vld [vmem:[%s1591_s13 + $0x1a8] sm:$0xff] (%p1363_p6)  ;;  %v1017_v5 = vld [vmem:[%s1591_s13 + $0x1b8] sm:$0xff] (%p1363_p6) }
 0x15c   : > { %879 = vst [vmem:[%s1591_s13 + $0x1e8] sm:$0xff] %v702_v12  ;;  %881 = vst [vmem:[%s1591_s13 + $0x1f8] sm:$0xff] %v815_v13 }
 0x15d   : > { %1004 = vst [vmem:[%s1666_s21 + $0x300] sm:$0xff] %v1003_v62  ;;  %1006 = vst [vmem:[%s1666_s21 + $0x308] sm:$0xff] %v1005_v63 }
 0x15e   : > { %1008 = vst [vmem:[%s1666_s21 + $0x310] sm:$0xff] %v1007_v0  ;;  %1010 = vst [vmem:[%s1666_s21 + $0x318] sm:$0xff] %v1009_v1 }
 0x15f   : > { %1012 = vst [vmem:[%s1666_s21 + $0x340] sm:$0xff] %v1011_v2  ;;  %1014 = vst [vmem:[%s1666_s21 + $0x348] sm:$0xff] %v1013_v3 }
 0x160   : > { %v1019_v6 = vld [vmem:[%s1591_s13 + $0x1c0] sm:$0xff]  ;;  %1016 = vst [vmem:[%s1666_s21 + $0x350] sm:$0xff] %v1015_v4  ;;  %1018 = vst [vmem:[%s1666_s21 + $0x358] sm:$0xff] %v1017_v5  ;;  %v1023_v8 = vld [vmem:[%s1591_s13 + $0x1d0] sm:$0xff] }
 0x161   : > { %1020 = vst [vmem:[%s1666_s21 + $0x380] sm:$0xff] %v1019_v6  ;;  %v1021_v7 = vld [vmem:[%s1591_s13 + $0x1c8] sm:$0xff]  ;;  %v1025_v9 = vld [vmem:[%s1591_s13 + $0x1d8] sm:$0xff]  ;;  %1024 = vst [vmem:[%s1666_s21 + $0x390] sm:$0xff] %v1023_v8 }
 0x162   : > { %1022 = vst [vmem:[%s1666_s21 + $0x388] sm:$0xff] %v1021_v7  ;;  %1026 = vst [vmem:[%s1666_s21 + $0x398] sm:$0xff] %v1025_v9  ;;  %v1027_v10 = vld [vmem:[%s1591_s13 + $0x1e0] sm:$0xff]  ;;  %v1031_v12 = vld [vmem:[%s1591_s13 + $0x1f0] sm:$0xff] }
 0x163   : > { %v1029_v11 = vld [vmem:[%s1591_s13 + $0x1e8] sm:$0xff]  ;;  %1028 = vst [vmem:[%s1666_s21 + $0x3c0] sm:$0xff] %v1027_v10  ;;  %1032 = vst [vmem:[%s1666_s21 + $0x3d0] sm:$0xff] %v1031_v12  ;;  %v1033_v13 = vld [vmem:[%s1591_s13 + $0x1f8] sm:$0xff] }
 0x164   : > { %1030 = vst [vmem:[%s1666_s21 + $0x3c8] sm:$0xff] %v1029_v11  ;;  %1034 = vst [vmem:[%s1666_s21 + $0x3d8] sm:$0xff] %v1033_v13 }
 0x165 PF: > { %s14_s19 = sadd.s32 1, %s1300_s19   ;;  %s1814_s15 = smov %s1288_s16 }
 0x166   : > { %p11_p11 = scmp.ge.s32.totalorder %s14_s19, 4   ;;  %s1815_s16 = smov %s1368_s25 }
 0x167   : > { %s1816_s17 = smov %s1296_s18  ;;  %s1817_s18 = smov %s1819_s20 }
 0x168   :  { %13 = sbr.rel (!%p11_p11) target bundleno = 3 (0x3), region = 120 }

// kernel: generator_forward.8
= control target key start
LH: loop header
LB: loop body
LE: loop exit
PB: predicated region body
PF: predicated region fallthrough
CT: control target
= control target key end

     0   :  { %vm352_vm0 = vcmask 523264   ;;  %vm738_vm1 = vcmask 392192   ;;  %s1620_s3 = inlined_call_operand.vmem [shape: bf16[64,48], index: 3, kind: input, shape index: {}]   ;;  %s1621_s0 = inlined_call_operand.vmem [shape: f32[512,64], index: 0, kind: input, shape index: {}]   ;;  %s1622_s1 = inlined_call_operand.vmem [shape: f32[1,64], index: 1, kind: input, shape index: {}]   ;;  %s1623_s2 = inlined_call_operand.vmem [shape: f32[1,64], index: 2, kind: input, shape index: {}]   ;;  %s1624_s4 = inlined_call_operand.vmem [shape: f32[512,48], index: 4, kind: output, shape index: {}]  }
   0x1   :  { %v961_v0 = vld [vmem:[%s1620_s3] sm:$0xff]   ;;  %v962_v1 = vld [vmem:[%s1620_s3 + $0x8] sm:$0xff]   ;;  %v963_v2 = vld [vmem:[%s1620_s3 + $0x10] sm:$0xff]  }
   0x2   :  { %881 = vmatprep.subr.bf16.mxu0 %v961_v0  ;;  %953 = vmatprep.subr.bf16.mxu1 %v961_v0  ;;  %v18_v3 = vld [vmem:[%s1621_s0] sm:$0xff]  ;;  %v19_v4 = vld [vmem:[%s1621_s0 + $0x8] sm:$0xff]  ;;  %v20_v13 = vld [vmem:[%s1621_s0 + $0x10] sm:$0xff] }
   0x3   :  { %882 = vmatpush3.bf16.msra.mxu0 %v961_v0  ;;  %957 = vmatpush3.bf16.msra.mxu1 %v961_v0  ;;  %v1008_v5 = vld [vmem:[%s1622_s1] ss:$0 sm:$0xff]  ;;  %v51_v10 = vld [vmem:[%s1621_s0 + $0x108] sm:$0xff]  ;;  %v21_v14 = vld [vmem:[%s1621_s0 + $0x18] sm:$0xff] }
   0x4   :  { %883 = vmatprep.subr.bf16.mxu0 %v962_v1  ;;  %954 = vmatprep.subr.bf16.mxu1 %v962_v1  ;;  %v89_v6 = vmul.f32 %v1008_v5, %v18_v3  ;;  %v90_v7 = vmul.f32 %v1008_v5, %v19_v4  ;;  %v1015_v8 = vld [vmem:[%s1623_s2] ss:$0 sm:$0xff]  ;;  %v122_v12 = vmul.f32 %v1008_v5, %v51_v10  ;;  %v52_v15 = vld [vmem:[%s1621_s0 + $0x110] sm:$0xff]  ;;  %v53_v19 = vld [vmem:[%s1621_s0 + $0x118] sm:$0xff] }
   0x5   :  { %v50_v9 = vld [vmem:[%s1621_s0 + $0x100] sm:$0xff]  ;;  %v91_v18 = vmul.f32 %v1008_v5, %v20_v13  ;;  %v964_v20 = vld [vmem:[%s1620_s3 + $0x18] sm:$0xff]   ;;  %v92_v23 = vmul.f32 %v1008_v5, %v21_v14  ;;  %v123_v28 = vmul.f32 %v1008_v5, %v52_v15  ;;  %v23_v29 = vld [vmem:[%s1621_s0 + $0x28] sm:$0xff]  ;;  %v124_v33 = vmul.f32 %v1008_v5, %v53_v19 }
   0x6   :  { %v121_v11 = vmul.f32 %v1008_v5, %v50_v9  ;;  %v160_v16 = vadd.f32 %v1015_v8, %v89_v6  ;;  %v161_v17 = vadd.f32 %v1015_v8, %v90_v7  ;;  %v193_v22 = vadd.f32 %v1015_v8, %v122_v12  ;;  %v22_v24 = vld [vmem:[%s1621_s0 + $0x20] sm:$0xff]  ;;  %v55_v35 = vld [vmem:[%s1621_s0 + $0x128] sm:$0xff]  ;;  %v24_v40 = vld [vmem:[%s1621_s0 + $0x30] sm:$0xff] }
   0x7   :  { %884 = vmatpush3.bf16.msra.mxu0 %v962_v1  ;;  %958 = vmatpush3.bf16.msra.mxu1 %v962_v1  ;;  %v162_v27 = vadd.f32 %v1015_v8, %v91_v18  ;;  %v163_v32 = vadd.f32 %v1015_v8, %v92_v23  ;;  %v54_v34 = vld [vmem:[%s1621_s0 + $0x120] sm:$0xff]  ;;  %v194_v38 = vadd.f32 %v1015_v8, %v123_v28  ;;  %v25_v45 = vld [vmem:[%s1621_s0 + $0x38] sm:$0xff]  ;;  %v56_v50 = vld [vmem:[%s1621_s0 + $0x130] sm:$0xff] }
   0x8   :  { %885 = vmatprep.subr.bf16.mxu0 %v963_v2  ;;  %955 = vmatprep.subr.bf16.mxu1 %v963_v2  ;;  %v192_v21 = vadd.f32 %v1015_v8, %v121_v11  ;;  %v224_v25 = vmax.f32 %v160_v16, 0.0  ;;  %v225_v26 = vmax.f32 %v161_v17, 0.0  ;;  %v257_v31 = vmax.f32 %v193_v22, 0.0  ;;  %v57_v55 = vld [vmem:[%s1621_s0 + $0x138] sm:$0xff]  ;;  %v26_v60 = vld [vmem:[%s1621_s0 + $0x40] sm:$0xff]  ;;  %v27_v1 = vld [vmem:[%s1621_s0 + $0x48] sm:$0xff] }
   0x9   :  { %v226_v37 = vmax.f32 %v162_v27, 0.0  ;;  %v93_v39 = vmul.f32 %v1008_v5, %v22_v24  ;;  %v227_v42 = vmax.f32 %v163_v32, 0.0  ;;  %v195_v43 = vadd.f32 %v1015_v8, %v124_v33  ;;  %v58_v7 = vld [vmem:[%s1621_s0 + $0x140] sm:$0xff]  ;;  %v59_v9 = vld [vmem:[%s1621_s0 + $0x148] sm:$0xff]  ;;  %v28_v14 = vld [vmem:[%s1621_s0 + $0x50] sm:$0xff] }
   0xa   :  { %v256_v30 = vmax.f32 %v192_v21, 0.0  ;;  %v288_v36 = vpack.c.bf16 %v225_v26, %v224_v25  ;;  %v94_v44 = vmul.f32 %v1008_v5, %v23_v29  ;;  %v258_v46 = vmax.f32 %v194_v38, 0.0  ;;  %v29_v19 = vld [vmem:[%s1621_s0 + $0x58] sm:$0xff]  ;;  %v60_v24 = vld [vmem:[%s1621_s0 + $0x150] sm:$0xff] }
   0xb   :  { %886 = vmatpush3.bf16.msra.mxu0 %v963_v2  ;;  %959 = vmatpush3.bf16.msra.mxu1 %v963_v2  ;;  %v164_v47 = vadd.f32 %v1015_v8, %v93_v39  ;;  %v125_v48 = vmul.f32 %v1008_v5, %v54_v34  ;;  %v126_v49 = vmul.f32 %v1008_v5, %v55_v35  ;;  %v259_v52 = vmax.f32 %v195_v43, 0.0  ;;  %v61_v29 = vld [vmem:[%s1621_s0 + $0x158] sm:$0xff]  ;;  %v30_v34 = vld [vmem:[%s1621_s0 + $0x60] sm:$0xff]  ;;  %v31_v39 = vld [vmem:[%s1621_s0 + $0x68] sm:$0xff] }
   0xc   :  { %887 = vmatprep.subr.bf16.mxu0 %v964_v20  ;;  %956 = vmatprep.subr.bf16.mxu1 %v964_v20  ;;  %v304_v41 = vpack.c.bf16 %v257_v31, %v256_v30  ;;  %v289_v51 = vpack.c.bf16 %v227_v42, %v226_v37  ;;  %v165_v53 = vadd.f32 %v1015_v8, %v94_v44  ;;  %v62_v44 = vld [vmem:[%s1621_s0 + $0x160] sm:$0xff] }
   0xd   :  { %889 = vmatprep.mubr.msk.bf16.mxu0 %vm352_vm0, %v288_v36  ;;  %v95_v54 = vmul.f32 %v1008_v5, %v24_v40  ;;  %v228_v56 = vmax.f32 %v164_v47, 0.0  ;;  %v196_v57 = vadd.f32 %v1015_v8, %v125_v48  ;;  %v197_v58 = vadd.f32 %v1015_v8, %v126_v49 }
   0xe   :  { %921 = vmatprep.mubr.msk.bf16.mxu1 %vm352_vm0, %v304_v41  ;;  %v96_v59 = vmul.f32 %v1008_v5, %v25_v45  ;;  %v305_v61 = vpack.c.bf16 %v259_v52, %v258_v46  ;;  %v229_v62 = vmax.f32 %v165_v53, 0.0  ;;  %v127_v0 = vmul.f32 %v1008_v5, %v56_v50  ;;  %v63_v45 = vld [vmem:[%s1621_s0 + $0x168] sm:$0xff]  ;;  %v32_v50 = vld [vmem:[%s1621_s0 + $0x70] sm:$0xff] }
   0xf   :  { %888 = vmatpush3.bf16.msra.mxu0 %v964_v20  ;;  %960 = vmatpush3.bf16.msra.mxu1 %v964_v20  ;;  %v166_v63 = vadd.f32 %v1015_v8, %v95_v54  ;;  %v260_v2 = vmax.f32 %v196_v57, 0.0  ;;  %v261_v3 = vmax.f32 %v197_v58, 0.0  ;;  %v128_v6 = vmul.f32 %v1008_v5, %v57_v55  ;;  %v33_v55 = vld [vmem:[%s1621_s0 + $0x78] sm:$0xff] }
  0x10   :  { %v167_v4 = vadd.f32 %v1015_v8, %v96_v59  ;;  %v290_v10 = vpack.c.bf16 %v229_v62, %v228_v56  ;;  %v198_v12 = vadd.f32 %v1015_v8, %v127_v0  ;;  %v97_v13 = vmul.f32 %v1008_v5, %v26_v60  ;;  %v64_v60 = vld [vmem:[%s1621_s0 + $0x170] sm:$0xff] }
  0x11   :  { %v230_v11 = vmax.f32 %v166_v63, 0.0  ;;  %v306_v15 = vpack.c.bf16 %v261_v3, %v260_v2  ;;  %v199_v17 = vadd.f32 %v1015_v8, %v128_v6  ;;  %v98_v18 = vmul.f32 %v1008_v5, %v27_v1  ;;  %v65_v1 = vld [vmem:[%s1621_s0 + $0x178] sm:$0xff] }
  0x12   :  { %890 = vmatmul.mubr.msk.bf16.vlgmr.msra.gmra.mrb[0].mxu0 %vm352_vm0, %v289_v51  ;;  %922 = vmatmul.mubr.msk.bf16.vlgmr.msra.gmra.mrb[0].mxu1 %vm352_vm0, %v305_v61  ;;  %v231_v16 = vmax.f32 %v167_v4, 0.0  ;;  %v262_v20 = vmax.f32 %v198_v12, 0.0  ;;  %v168_v21 = vadd.f32 %v1015_v8, %v97_v13  ;;  %v129_v22 = vmul.f32 %v1008_v5, %v58_v7  ;;  %v34_v7 = vld [vmem:[%s1621_s0 + $0x80] sm:$0xff]  ;;  %v35_v13 = vld [vmem:[%s1621_s0 + $0x88] sm:$0xff] }
  0x13   :  { %893 = vmatprep.mubr.msk.bf16.mxu0 %vm352_vm0, %v290_v10  ;;  %v130_v23 = vmul.f32 %v1008_v5, %v59_v9  ;;  %925 = vmatprep.mubr.msk.bf16.mxu1 %vm352_vm0, %v306_v15  ;;  %v263_v26 = vmax.f32 %v199_v17, 0.0  ;;  %v169_v27 = vadd.f32 %v1015_v8, %v98_v18  ;;  %v99_v28 = vmul.f32 %v1008_v5, %v28_v14  ;;  %v66_v18 = vld [vmem:[%s1621_s0 + $0x180] sm:$0xff] }
  0x14   :  { %v291_v25 = vpack.c.bf16 %v231_v16, %v230_v11  ;;  %v232_v30 = vmax.f32 %v168_v21, 0.0  ;;  %v200_v31 = vadd.f32 %v1015_v8, %v129_v22  ;;  %v100_v33 = vmul.f32 %v1008_v5, %v29_v19  ;;  %v67_v19 = vld [vmem:[%s1621_s0 + $0x188] sm:$0xff] }
  0x15   :  { %v201_v32 = vadd.f32 %v1015_v8, %v130_v23  ;;  %v307_v35 = vpack.c.bf16 %v263_v26, %v262_v20  ;;  %v233_v36 = vmax.f32 %v169_v27, 0.0  ;;  %v170_v37 = vadd.f32 %v1015_v8, %v99_v28 }
  0x16   :  { %v131_v38 = vmul.f32 %v1008_v5, %v60_v24  ;;  %v264_v40 = vmax.f32 %v200_v31, 0.0  ;;  %v171_v42 = vadd.f32 %v1015_v8, %v100_v33  ;;  %v132_v43 = vmul.f32 %v1008_v5, %v61_v29  ;;  %v36_v24 = vld [vmem:[%s1621_s0 + $0x90] sm:$0xff]  ;;  %v37_v29 = vld [vmem:[%s1621_s0 + $0x98] sm:$0xff] }
  0x17   :  { %v265_v41 = vmax.f32 %v201_v32, 0.0  ;;  %v292_v46 = vpack.c.bf16 %v233_v36, %v232_v30  ;;  %v234_v47 = vmax.f32 %v170_v37, 0.0  ;;  %v101_v49 = vmul.f32 %v1008_v5, %v30_v34  ;;  %v68_v34 = vld [vmem:[%s1621_s0 + $0x190] sm:$0xff] }
  0x18   :  { %v202_v48 = vadd.f32 %v1015_v8, %v131_v38  ;;  %v235_v52 = vmax.f32 %v171_v42, 0.0  ;;  %v203_v53 = vadd.f32 %v1015_v8, %v132_v43  ;;  %v102_v54 = vmul.f32 %v1008_v5, %v31_v39  ;;  %v69_v39 = vld [vmem:[%s1621_s0 + $0x198] sm:$0xff] }
  0x19   :  { %v308_v51 = vpack.c.bf16 %v265_v41, %v264_v40  ;;  %v172_v57 = vadd.f32 %v1015_v8, %v101_v49  ;;  %v133_v58 = vmul.f32 %v1008_v5, %v62_v44  ;;  %v134_v59 = vmul.f32 %v1008_v5, %v63_v45  ;;  %v38_v44 = vld [vmem:[%s1621_s0 + $0xa0] sm:$0xff]  ;;  %v39_v49 = vld [vmem:[%s1621_s0 + $0xa8] sm:$0xff] }
  0x1a   :  { %894 = vmatmul.mubr.msk.bf16.gmra.mrb[4].mxu0 %vm352_vm0, %v291_v25  ;;  %926 = vmatmul.mubr.msk.bf16.gmra.mrb[4].mxu1 %vm352_vm0, %v307_v35  ;;  %v266_v56 = vmax.f32 %v202_v48, 0.0  ;;  %v293_v61 = vpack.c.bf16 %v235_v52, %v234_v47  ;;  %v267_v62 = vmax.f32 %v203_v53, 0.0  ;;  %v173_v63 = vadd.f32 %v1015_v8, %v102_v54  ;;  %v70_v54 = vld [vmem:[%s1621_s0 + $0x1a0] sm:$0xff] }
  0x1b   :  { %897 = vmatprep.mubr.msk.bf16.mxu0 %vm352_vm0, %v292_v46  ;;  %929 = vmatprep.mubr.msk.bf16.mxu1 %vm352_vm0, %v308_v51  ;;  %v103_v0 = vmul.f32 %v1008_v5, %v32_v50  ;;  %v236_v2 = vmax.f32 %v172_v57, 0.0  ;;  %v204_v3 = vadd.f32 %v1015_v8, %v133_v58  ;;  %v205_v4 = vadd.f32 %v1015_v8, %v134_v59 }
  0x1c   :  { %v104_v6 = vmul.f32 %v1008_v5, %v33_v55  ;;  %v309_v9 = vpack.c.bf16 %v267_v62, %v266_v56  ;;  %v237_v10 = vmax.f32 %v173_v63, 0.0  ;;  %v135_v12 = vmul.f32 %v1008_v5, %v64_v60  ;;  %v71_v55 = vld [vmem:[%s1621_s0 + $0x1a8] sm:$0xff]  ;;  %v40_v60 = vld [vmem:[%s1621_s0 + $0xb0] sm:$0xff] }
  0x1d   :  { %v174_v11 = vadd.f32 %v1015_v8, %v103_v0  ;;  %v268_v14 = vmax.f32 %v204_v3, 0.0  ;;  %v269_v15 = vmax.f32 %v205_v4, 0.0  ;;  %v136_v17 = vmul.f32 %v1008_v5, %v65_v1  ;;  %v41_v1 = vld [vmem:[%s1621_s0 + $0xb8] sm:$0xff] }
  0x1e   :  { %v175_v16 = vadd.f32 %v1015_v8, %v104_v6  ;;  %v294_v20 = vpack.c.bf16 %v237_v10, %v236_v2  ;;  %v206_v22 = vadd.f32 %v1015_v8, %v135_v12  ;;  %v105_v23 = vmul.f32 %v1008_v5, %v34_v7  ;;  %v72_v6 = vld [vmem:[%s1621_s0 + $0x1b0] sm:$0xff]  ;;  %v73_v12 = vld [vmem:[%s1621_s0 + $0x1b8] sm:$0xff] }
  0x1f   :  { %v238_v21 = vmax.f32 %v174_v11, 0.0  ;;  %v310_v25 = vpack.c.bf16 %v269_v15, %v268_v14  ;;  %v207_v27 = vadd.f32 %v1015_v8, %v136_v17  ;;  %v106_v28 = vmul.f32 %v1008_v5, %v35_v13  ;;  %v42_v17 = vld [vmem:[%s1621_s0 + $0xc0] sm:$0xff] }
  0x20   :  { %v239_v26 = vmax.f32 %v175_v16, 0.0  ;;  %v270_v30 = vmax.f32 %v206_v22, 0.0  ;;  %v176_v31 = vadd.f32 %v1015_v8, %v105_v23  ;;  %v137_v32 = vmul.f32 %v1008_v5, %v66_v18  ;;  %v43_v22 = vld [vmem:[%s1621_s0 + $0xc8] sm:$0xff] }
  0x21   :  { %v138_v33 = vmul.f32 %v1008_v5, %v67_v19  ;;  %v271_v36 = vmax.f32 %v207_v27, 0.0  ;;  %v177_v37 = vadd.f32 %v1015_v8, %v106_v28  ;;  %v107_v38 = vmul.f32 %v1008_v5, %v36_v24  ;;  %v74_v27 = vld [vmem:[%s1621_s0 + $0x1c0] sm:$0xff]  ;;  %v75_v28 = vld [vmem:[%s1621_s0 + $0x1c8] sm:$0xff] }
  0x22   :  { %898 = vmatmul.mubr.msk.bf16.gmra.mrb[8].mxu0 %vm352_vm0, %v293_v61  ;;  %930 = vmatmul.mubr.msk.bf16.gmra.mrb[8].mxu1 %vm352_vm0, %v309_v9  ;;  %v295_v35 = vpack.c.bf16 %v239_v26, %v238_v21  ;;  %v240_v40 = vmax.f32 %v176_v31, 0.0  ;;  %v208_v41 = vadd.f32 %v1015_v8, %v137_v32  ;;  %v108_v43 = vmul.f32 %v1008_v5, %v37_v29 }
  0x23   :  { %901 = vmatprep.mubr.msk.bf16.mxu0 %vm352_vm0, %v294_v20  ;;  %933 = vmatprep.mubr.msk.bf16.mxu1 %vm352_vm0, %v310_v25  ;;  %v209_v42 = vadd.f32 %v1015_v8, %v138_v33  ;;  %v311_v45 = vpack.c.bf16 %v271_v36, %v270_v30  ;;  %v241_v46 = vmax.f32 %v177_v37, 0.0  ;;  %v178_v47 = vadd.f32 %v1015_v8, %v107_v38  ;;  %v44_v33 = vld [vmem:[%s1621_s0 + $0xd0] sm:$0xff]  ;;  %v45_v38 = vld [vmem:[%s1621_s0 + $0xd8] sm:$0xff] }
  0x24   :  { %v139_v48 = vmul.f32 %v1008_v5, %v68_v34  ;;  %v272_v50 = vmax.f32 %v208_v41, 0.0  ;;  %v179_v52 = vadd.f32 %v1015_v8, %v108_v43  ;;  %v140_v53 = vmul.f32 %v1008_v5, %v69_v39  ;;  %v76_v43 = vld [vmem:[%s1621_s0 + $0x1d0] sm:$0xff] }
  0x25   :  { %v273_v51 = vmax.f32 %v209_v42, 0.0  ;;  %v296_v56 = vpack.c.bf16 %v241_v46, %v240_v40  ;;  %v242_v57 = vmax.f32 %v178_v47, 0.0  ;;  %v109_v59 = vmul.f32 %v1008_v5, %v38_v44 }
  0x26   :  { %v210_v58 = vadd.f32 %v1015_v8, %v139_v48  ;;  %v243_v62 = vmax.f32 %v179_v52, 0.0  ;;  %v211_v63 = vadd.f32 %v1015_v8, %v140_v53  ;;  %v110_v0 = vmul.f32 %v1008_v5, %v39_v49  ;;  %v77_v48 = vld [vmem:[%s1621_s0 + $0x1d8] sm:$0xff]  ;;  %v46_v53 = vld [vmem:[%s1621_s0 + $0xe0] sm:$0xff] }
  0x27   :  { %v312_v61 = vpack.c.bf16 %v273_v51, %v272_v50  ;;  %v180_v2 = vadd.f32 %v1015_v8, %v109_v59  ;;  %v141_v3 = vmul.f32 %v1008_v5, %v70_v54  ;;  %v142_v4 = vmul.f32 %v1008_v5, %v71_v55 }
  0x28   :  { %v274_v7 = vmax.f32 %v210_v58, 0.0  ;;  %v275_v9 = vmax.f32 %v211_v63, 0.0  ;;  %v181_v10 = vadd.f32 %v1015_v8, %v110_v0  ;;  %v111_v11 = vmul.f32 %v1008_v5, %v40_v60  ;;  %v79_v63 = vld [vmem:[%s1621_s0 + $0x1e8] sm:$0xff] }
  0x29   :  { %v244_v13 = vmax.f32 %v180_v2, 0.0  ;;  %v212_v14 = vadd.f32 %v1015_v8, %v141_v3  ;;  %v213_v15 = vadd.f32 %v1015_v8, %v142_v4  ;;  %v112_v16 = vmul.f32 %v1008_v5, %v41_v1 }
  0x2a   :  { %902 = vmatmul.mubr.msk.bf16.gmra.mrb[12].mxu0 %vm352_vm0, %v295_v35  ;;  %934 = vmatmul.mubr.msk.bf16.gmra.mrb[12].mxu1 %vm352_vm0, %v311_v45  ;;  %v297_v18 = vpack.c.bf16 %v243_v62, %v242_v57  ;;  %v245_v19 = vmax.f32 %v181_v10, 0.0  ;;  %v182_v20 = vadd.f32 %v1015_v8, %v111_v11  ;;  %v143_v21 = vmul.f32 %v1008_v5, %v72_v6  ;;  %v47_v57 = vld [vmem:[%s1621_s0 + $0xe8] sm:$0xff]  ;;  %v78_v62 = vld [vmem:[%s1621_s0 + $0x1e0] sm:$0xff] }
  0x2b   :  { %905 = vmatprep.mubr.msk.bf16.mxu0 %vm352_vm0, %v296_v56  ;;  %937 = vmatprep.mubr.msk.bf16.mxu1 %vm352_vm0, %v312_v61  ;;  %v276_v23 = vmax.f32 %v212_v14, 0.0  ;;  %v277_v24 = vmax.f32 %v213_v15, 0.0  ;;  %v183_v25 = vadd.f32 %v1015_v8, %v112_v16  ;;  %v144_v26 = vmul.f32 %v1008_v5, %v73_v12  ;;  %v49_v14 = vld [vmem:[%s1621_s0 + $0xf8] sm:$0xff]  ;;  %v80_v15 = vld [vmem:[%s1621_s0 + $0x1f0] sm:$0xff] }
  0x2c   :  { %v313_v29 = vpack.c.bf16 %v275_v9, %v274_v7  ;;  %v298_v30 = vpack.c.bf16 %v245_v19, %v244_v13  ;;  %v214_v31 = vadd.f32 %v1015_v8, %v143_v21  ;;  %v113_v32 = vmul.f32 %v1008_v5, %v42_v17  ;;  %v48_v13 = vld [vmem:[%s1621_s0 + $0xf0] sm:$0xff]  ;;  %v81_v19 = vld [vmem:[%s1621_s0 + $0x1f8] sm:$0xff] }
  0x2d   :  { %v314_v34 = vpack.c.bf16 %v277_v24, %v276_v23  ;;  %v246_v35 = vmax.f32 %v182_v20, 0.0  ;;  %v215_v36 = vadd.f32 %v1015_v8, %v144_v26  ;;  %v114_v37 = vmul.f32 %v1008_v5, %v43_v22 }
  0x2e   :  { %v247_v39 = vmax.f32 %v183_v25, 0.0  ;;  %v184_v40 = vadd.f32 %v1015_v8, %v113_v32  ;;  %v145_v41 = vmul.f32 %v1008_v5, %v74_v27  ;;  %v146_v42 = vmul.f32 %v1008_v5, %v75_v28 }
  0x2f   :  { %v278_v44 = vmax.f32 %v214_v31, 0.0  ;;  %v279_v45 = vmax.f32 %v215_v36, 0.0  ;;  %v185_v46 = vadd.f32 %v1015_v8, %v114_v37  ;;  %v115_v47 = vmul.f32 %v1008_v5, %v44_v33 }
  0x30   :  { %v248_v49 = vmax.f32 %v184_v40, 0.0  ;;  %v216_v50 = vadd.f32 %v1015_v8, %v145_v41  ;;  %v217_v51 = vadd.f32 %v1015_v8, %v146_v42  ;;  %v116_v52 = vmul.f32 %v1008_v5, %v45_v38 }
  0x31   :  { %v249_v54 = vmax.f32 %v185_v46, 0.0  ;;  %v186_v55 = vadd.f32 %v1015_v8, %v115_v47  ;;  %v147_v56 = vmul.f32 %v1008_v5, %v76_v43  ;;  %v148_v61 = vmul.f32 %v1008_v5, %v77_v48 }
  0x32   :  { %906 = vmatmul.mubr.msk.bf16.gmra.mrb[16].mxu0 %vm352_vm0, %v297_v18  ;;  %938 = vmatmul.mubr.msk.bf16.gmra.mrb[16].mxu1 %vm352_vm0, %v313_v29  ;;  %v280_v58 = vmax.f32 %v216_v50, 0.0  ;;  %v281_v59 = vmax.f32 %v217_v51, 0.0  ;;  %v187_v60 = vadd.f32 %v1015_v8, %v116_v52  ;;  %v299_v0 = vpack.c.bf16 %v247_v39, %v246_v35 }
  0x33   :  { %909 = vmatprep.mubr.msk.bf16.mxu0 %vm352_vm0, %v298_v30  ;;  %941 = vmatprep.mubr.msk.bf16.mxu1 %vm352_vm0, %v314_v34  ;;  %v218_v1 = vadd.f32 %v1015_v8, %v147_v56  ;;  %v117_v2 = vmul.f32 %v1008_v5, %v46_v53  ;;  %v315_v3 = vpack.c.bf16 %v279_v45, %v278_v44  ;;  %v250_v16 = vmax.f32 %v186_v55, 0.0 }
  0x34   :  { %v300_v4 = vpack.c.bf16 %v249_v54, %v248_v49  ;;  %v219_v6 = vadd.f32 %v1015_v8, %v148_v61  ;;  %v118_v7 = vmul.f32 %v1008_v5, %v47_v57  ;;  %v316_v9 = vpack.c.bf16 %v281_v59, %v280_v58 }
  0x35   :  { %v188_v10 = vadd.f32 %v1015_v8, %v117_v2  ;;  %v149_v11 = vmul.f32 %v1008_v5, %v78_v62  ;;  %v150_v12 = vmul.f32 %v1008_v5, %v79_v63  ;;  %v251_v17 = vmax.f32 %v187_v60, 0.0 }
  0x36   :  { %v189_v18 = vadd.f32 %v1015_v8, %v118_v7  ;;  %v282_v20 = vmax.f32 %v218_v1, 0.0  ;;  %v283_v21 = vmax.f32 %v219_v6, 0.0  ;;  %v119_v25 = vmul.f32 %v1008_v5, %v48_v13 }
  0x37   :  { %v220_v22 = vadd.f32 %v1015_v8, %v149_v11  ;;  %v221_v23 = vadd.f32 %v1015_v8, %v150_v12  ;;  %v252_v24 = vmax.f32 %v188_v10, 0.0  ;;  %v120_v26 = vmul.f32 %v1008_v5, %v49_v14 }
  0x38   :  { %v151_v27 = vmul.f32 %v1008_v5, %v80_v15  ;;  %v253_v28 = vmax.f32 %v189_v18, 0.0  ;;  %v152_v31 = vmul.f32 %v1008_v5, %v81_v19  ;;  %v301_v32 = vpack.c.bf16 %v251_v17, %v250_v16 }
  0x39   :  { %v284_v29 = vmax.f32 %v220_v22, 0.0  ;;  %v285_v30 = vmax.f32 %v221_v23, 0.0  ;;  %v317_v33 = vpack.c.bf16 %v283_v21, %v282_v20  ;;  %v190_v34 = vadd.f32 %v1015_v8, %v119_v25 }
  0x3a   :  { %910 = vmatmul.mubr.msk.bf16.gmra.mrb[20].mxu0 %vm352_vm0, %v299_v0  ;;  %942 = vmatmul.mubr.msk.bf16.gmra.mrb[20].mxu1 %vm352_vm0, %v315_v3  ;;  %v191_v35 = vadd.f32 %v1015_v8, %v120_v26  ;;  %v222_v36 = vadd.f32 %v1015_v8, %v151_v27  ;;  %v223_v37 = vadd.f32 %v1015_v8, %v152_v31 }
  0x3b   :  { %913 = vmatprep.mubr.msk.bf16.mxu0 %vm352_vm0, %v300_v4  ;;  %945 = vmatprep.mubr.msk.bf16.mxu1 %vm352_vm0, %v316_v9  ;;  %v302_v38 = vpack.c.bf16 %v253_v28, %v252_v24  ;;  %v318_v39 = vpack.c.bf16 %v285_v30, %v284_v29  ;;  %v254_v40 = vmax.f32 %v190_v34, 0.0 }
  0x3c   :  { %v255_v41 = vmax.f32 %v191_v35, 0.0  ;;  %v286_v42 = vmax.f32 %v222_v36, 0.0  ;;  %v287_v5 = vmax.f32 %v223_v37, 0.0 }
  0x3e   :  { %v303_v43 = vpack.c.bf16 %v255_v41, %v254_v40  ;;  %v319_v44 = vpack.c.bf16 %v287_v5, %v286_v42 }
  0x42   :  { %914 = vmatmul.mubr.msk.bf16.gmra.mrb[24].mxu0 %vm352_vm0, %v301_v32  ;;  %946 = vmatmul.mubr.msk.bf16.gmra.mrb[24].mxu1 %vm352_vm0, %v317_v33 }
  0x43   :  { %917 = vmatprep.mubr.msk.bf16.mxu0 %vm352_vm0, %v302_v38  ;;  %949 = vmatprep.mubr.msk.bf16.mxu1 %vm352_vm0, %v318_v39 }
  0x4a   :  { %918 = vmatmul.mubr.msk.bf16.gmra.mrb[28].mxu0 %vm352_vm0, %v303_v43  ;;  %950 = vmatmul.mubr.msk.bf16.gmra.mrb[28].mxu1 %vm352_vm0, %v319_v44 }
  0xe5   :  { %v891_v8 = vpop.f32.mrb[0].mxu0  ;;  %v923_v45 = vpop.f32.mrb[0].mxu1 }
  0xe6   :  { %741 = vst.msk [vmem:[%s1624_s4 + $0x10] sm:$0xff] %vm738_vm1, %v891_v8  ;;  %773 = vst.msk [vmem:[%s1624_s4 + $0x110] sm:$0xff] %vm738_vm1, %v923_v45  ;;  %v483_v46 = vpop.f32.mrb[1].mxu0  ;;  %v611_v47 = vpop.f32.mrb[1].mxu1 }
  0xe7   :  { %739 = vst.msk [vmem:[%s1624_s4] sm:$0xff] %vm738_vm1, %v483_v46  ;;  %771 = vst.msk [vmem:[%s1624_s4 + $0x100] sm:$0xff] %vm738_vm1, %v611_v47  ;;  %v892_v48 = vpop.f32.mrb[2].mxu0  ;;  %v924_v49 = vpop.f32.mrb[2].mxu1 }
  0xe8   :  { %742 = vst.msk [vmem:[%s1624_s4 + $0x18] sm:$0xff] %vm738_vm1, %v892_v48  ;;  %774 = vst.msk [vmem:[%s1624_s4 + $0x118] sm:$0xff] %vm738_vm1, %v924_v49  ;;  %v486_v50 = vpop.f32.mrb[3].mxu0  ;;  %v614_v51 = vpop.f32.mrb[3].mxu1 }
  0xe9   :  { %740 = vst.msk [vmem:[%s1624_s4 + $0x8] sm:$0xff] %vm738_vm1, %v486_v50  ;;  %772 = vst.msk [vmem:[%s1624_s4 + $0x108] sm:$0xff] %vm738_vm1, %v614_v51 }
  0xed   :  { %v895_v52 = vpop.f32.mrb[4].mxu0  ;;  %v927_v53 = vpop.f32.mrb[4].mxu1 }
  0xee   :  { %745 = vst.msk [vmem:[%s1624_s4 + $0x30] sm:$0xff] %vm738_vm1, %v895_v52  ;;  %777 = vst.msk [vmem:[%s1624_s4 + $0x130] sm:$0xff] %vm738_vm1, %v927_v53  ;;  %v499_v54 = vpop.f32.mrb[5].mxu0  ;;  %v627_v55 = vpop.f32.mrb[5].mxu1 }
  0xef   :  { %743 = vst.msk [vmem:[%s1624_s4 + $0x20] sm:$0xff] %vm738_vm1, %v499_v54  ;;  %775 = vst.msk [vmem:[%s1624_s4 + $0x120] sm:$0xff] %vm738_vm1, %v627_v55  ;;  %v896_v56 = vpop.f32.mrb[6].mxu0  ;;  %v928_v57 = vpop.f32.mrb[6].mxu1 }
  0xf0   :  { %746 = vst.msk [vmem:[%s1624_s4 + $0x38] sm:$0xff] %vm738_vm1, %v896_v56  ;;  %778 = vst.msk [vmem:[%s1624_s4 + $0x138] sm:$0xff] %vm738_vm1, %v928_v57  ;;  %v502_v58 = vpop.f32.mrb[7].mxu0  ;;  %v630_v59 = vpop.f32.mrb[7].mxu1 }
  0xf1   :  { %744 = vst.msk [vmem:[%s1624_s4 + $0x28] sm:$0xff] %vm738_vm1, %v502_v58  ;;  %776 = vst.msk [vmem:[%s1624_s4 + $0x128] sm:$0xff] %vm738_vm1, %v630_v59 }
  0xf5   :  { %v899_v60 = vpop.f32.mrb[8].mxu0  ;;  %v931_v61 = vpop.f32.mrb[8].mxu1 }
  0xf6   :  { %749 = vst.msk [vmem:[%s1624_s4 + $0x50] sm:$0xff] %vm738_vm1, %v899_v60  ;;  %781 = vst.msk [vmem:[%s1624_s4 + $0x150] sm:$0xff] %vm738_vm1, %v931_v61  ;;  %v515_v62 = vpop.f32.mrb[9].mxu0  ;;  %v643_v63 = vpop.f32.mrb[9].mxu1 }
  0xf7   :  { %747 = vst.msk [vmem:[%s1624_s4 + $0x40] sm:$0xff] %vm738_vm1, %v515_v62  ;;  %779 = vst.msk [vmem:[%s1624_s4 + $0x140] sm:$0xff] %vm738_vm1, %v643_v63  ;;  %v900_v0 = vpop.f32.mrb[10].mxu0  ;;  %v932_v1 = vpop.f32.mrb[10].mxu1 }
  0xf8   :  { %750 = vst.msk [vmem:[%s1624_s4 + $0x58] sm:$0xff] %vm738_vm1, %v900_v0  ;;  %782 = vst.msk [vmem:[%s1624_s4 + $0x158] sm:$0xff] %vm738_vm1, %v932_v1  ;;  %v518_v2 = vpop.f32.mrb[11].mxu0  ;;  %v646_v3 = vpop.f32.mrb[11].mxu1 }
  0xf9   :  { %748 = vst.msk [vmem:[%s1624_s4 + $0x48] sm:$0xff] %vm738_vm1, %v518_v2  ;;  %780 = vst.msk [vmem:[%s1624_s4 + $0x148] sm:$0xff] %vm738_vm1, %v646_v3 }
  0xfd   :  { %v903_v4 = vpop.f32.mrb[12].mxu0  ;;  %v935_v6 = vpop.f32.mrb[12].mxu1 }
  0xfe   :  { %753 = vst.msk [vmem:[%s1624_s4 + $0x70] sm:$0xff] %vm738_vm1, %v903_v4  ;;  %785 = vst.msk [vmem:[%s1624_s4 + $0x170] sm:$0xff] %vm738_vm1, %v935_v6  ;;  %v531_v7 = vpop.f32.mrb[13].mxu0  ;;  %v659_v9 = vpop.f32.mrb[13].mxu1 }
  0xff   :  { %751 = vst.msk [vmem:[%s1624_s4 + $0x60] sm:$0xff] %vm738_vm1, %v531_v7  ;;  %783 = vst.msk [vmem:[%s1624_s4 + $0x160] sm:$0xff] %vm738_vm1, %v659_v9  ;;  %v904_v10 = vpop.f32.mrb[14].mxu0  ;;  %v936_v11 = vpop.f32.mrb[14].mxu1 }
 0x100   :  { %754 = vst.msk [vmem:[%s1624_s4 + $0x78] sm:$0xff] %vm738_vm1, %v904_v10  ;;  %786 = vst.msk [vmem:[%s1624_s4 + $0x178] sm:$0xff] %vm738_vm1, %v936_v11  ;;  %v534_v12 = vpop.f32.mrb[15].mxu0  ;;  %v662_v13 = vpop.f32.mrb[15].mxu1 }
 0x101   :  { %752 = vst.msk [vmem:[%s1624_s4 + $0x68] sm:$0xff] %vm738_vm1, %v534_v12  ;;  %784 = vst.msk [vmem:[%s1624_s4 + $0x168] sm:$0xff] %vm738_vm1, %v662_v13 }
 0x105   :  { %v907_v14 = vpop.f32.mrb[16].mxu0  ;;  %v939_v15 = vpop.f32.mrb[16].mxu1 }
 0x106   :  { %757 = vst.msk [vmem:[%s1624_s4 + $0x90] sm:$0xff] %vm738_vm1, %v907_v14  ;;  %789 = vst.msk [vmem:[%s1624_s4 + $0x190] sm:$0xff] %vm738_vm1, %v939_v15  ;;  %v547_v16 = vpop.f32.mrb[17].mxu0  ;;  %v675_v17 = vpop.f32.mrb[17].mxu1 }
 0x107   :  { %755 = vst.msk [vmem:[%s1624_s4 + $0x80] sm:$0xff] %vm738_vm1, %v547_v16  ;;  %787 = vst.msk [vmem:[%s1624_s4 + $0x180] sm:$0xff] %vm738_vm1, %v675_v17  ;;  %v908_v18 = vpop.f32.mrb[18].mxu0  ;;  %v940_v19 = vpop.f32.mrb[18].mxu1 }
 0x108   :  { %758 = vst.msk [vmem:[%s1624_s4 + $0x98] sm:$0xff] %vm738_vm1, %v908_v18  ;;  %790 = vst.msk [vmem:[%s1624_s4 + $0x198] sm:$0xff] %vm738_vm1, %v940_v19  ;;  %v550_v20 = vpop.f32.mrb[19].mxu0  ;;  %v678_v21 = vpop.f32.mrb[19].mxu1 }
 0x109   :  { %756 = vst.msk [vmem:[%s1624_s4 + $0x88] sm:$0xff] %vm738_vm1, %v550_v20  ;;  %788 = vst.msk [vmem:[%s1624_s4 + $0x188] sm:$0xff] %vm738_vm1, %v678_v21 }
 0x10d   :  { %v911_v22 = vpop.f32.mrb[20].mxu0  ;;  %v943_v23 = vpop.f32.mrb[20].mxu1 }
 0x10e   :  { %761 = vst.msk [vmem:[%s1624_s4 + $0xb0] sm:$0xff] %vm738_vm1, %v911_v22  ;;  %793 = vst.msk [vmem:[%s1624_s4 + $0x1b0] sm:$0xff] %vm738_vm1, %v943_v23  ;;  %v563_v24 = vpop.f32.mrb[21].mxu0  ;;  %v691_v25 = vpop.f32.mrb[21].mxu1 }
 0x10f   :  { %759 = vst.msk [vmem:[%s1624_s4 + $0xa0] sm:$0xff] %vm738_vm1, %v563_v24  ;;  %791 = vst.msk [vmem:[%s1624_s4 + $0x1a0] sm:$0xff] %vm738_vm1, %v691_v25  ;;  %v912_v26 = vpop.f32.mrb[22].mxu0  ;;  %v944_v27 = vpop.f32.mrb[22].mxu1 }
 0x110   :  { %762 = vst.msk [vmem:[%s1624_s4 + $0xb8] sm:$0xff] %vm738_vm1, %v912_v26  ;;  %794 = vst.msk [vmem:[%s1624_s4 + $0x1b8] sm:$0xff] %vm738_vm1, %v944_v27  ;;  %v566_v28 = vpop.f32.mrb[23].mxu0  ;;  %v694_v29 = vpop.f32.mrb[23].mxu1 }
 0x111   :  { %760 = vst.msk [vmem:[%s1624_s4 + $0xa8] sm:$0xff] %vm738_vm1, %v566_v28  ;;  %792 = vst.msk [vmem:[%s1624_s4 + $0x1a8] sm:$0xff] %vm738_vm1, %v694_v29 }
 0x115   :  { %v915_v30 = vpop.f32.mrb[24].mxu0  ;;  %v947_v31 = vpop.f32.mrb[24].mxu1 }
 0x116   :  { %765 = vst.msk [vmem:[%s1624_s4 + $0xd0] sm:$0xff] %vm738_vm1, %v915_v30  ;;  %797 = vst.msk [vmem:[%s1624_s4 + $0x1d0] sm:$0xff] %vm738_vm1, %v947_v31  ;;  %v579_v32 = vpop.f32.mrb[25].mxu0  ;;  %v707_v33 = vpop.f32.mrb[25].mxu1 }
 0x117   :  { %763 = vst.msk [vmem:[%s1624_s4 + $0xc0] sm:$0xff] %vm738_vm1, %v579_v32  ;;  %795 = vst.msk [vmem:[%s1624_s4 + $0x1c0] sm:$0xff] %vm738_vm1, %v707_v33  ;;  %v916_v34 = vpop.f32.mrb[26].mxu0  ;;  %v948_v35 = vpop.f32.mrb[26].mxu1 }
 0x118   :  { %766 = vst.msk [vmem:[%s1624_s4 + $0xd8] sm:$0xff] %vm738_vm1, %v916_v34  ;;  %798 = vst.msk [vmem:[%s1624_s4 + $0x1d8] sm:$0xff] %vm738_vm1, %v948_v35  ;;  %v582_v36 = vpop.f32.mrb[27].mxu0  ;;  %v710_v37 = vpop.f32.mrb[27].mxu1 }
 0x119   :  { %764 = vst.msk [vmem:[%s1624_s4 + $0xc8] sm:$0xff] %vm738_vm1, %v582_v36  ;;  %796 = vst.msk [vmem:[%s1624_s4 + $0x1c8] sm:$0xff] %vm738_vm1, %v710_v37 }
 0x11d   :  { %v919_v38 = vpop.f32.mrb[28].mxu0  ;;  %v951_v39 = vpop.f32.mrb[28].mxu1 }
 0x11e   :  { %769 = vst.msk [vmem:[%s1624_s4 + $0xf0] sm:$0xff] %vm738_vm1, %v919_v38  ;;  %801 = vst.msk [vmem:[%s1624_s4 + $0x1f0] sm:$0xff] %vm738_vm1, %v951_v39  ;;  %v595_v40 = vpop.f32.mrb[29].mxu0  ;;  %v723_v41 = vpop.f32.mrb[29].mxu1 }
 0x11f   :  { %767 = vst.msk [vmem:[%s1624_s4 + $0xe0] sm:$0xff] %vm738_vm1, %v595_v40  ;;  %799 = vst.msk [vmem:[%s1624_s4 + $0x1e0] sm:$0xff] %vm738_vm1, %v723_v41  ;;  %v920_v42 = vpop.f32.mrb[30].mxu0  ;;  %v952_v5 = vpop.f32.mrb[30].mxu1 }
 0x120   :  { %770 = vst.msk [vmem:[%s1624_s4 + $0xf8] sm:$0xff] %vm738_vm1, %v920_v42  ;;  %802 = vst.msk [vmem:[%s1624_s4 + $0x1f8] sm:$0xff] %vm738_vm1, %v952_v5  ;;  %v598_v43 = vpop.f32.mrb[31].mxu0  ;;  %v726_v44 = vpop.f32.mrb[31].mxu1 }
 0x121   :  { %768 = vst.msk [vmem:[%s1624_s4 + $0xe8] sm:$0xff] %vm738_vm1, %v598_v43  ;;  %800 = vst.msk [vmem:[%s1624_s4 + $0x1e8] sm:$0xff] %vm738_vm1, %v726_v44 }

// kernel: generator_forward.9
= control target key start
LH: loop header
LB: loop body
LE: loop exit
PB: predicated region body
PF: predicated region fallthrough
CT: control target
= control target key end

     0   :  { %s110_s0 = inlined_call_operand.vmem [shape: f32[6,1024], index: 0, kind: input, shape index: {}]   ;;  %s111_s1 = inlined_call_operand.vmem [shape: f32[6,1024], index: 1, kind: output, shape index: {}]  }
   0x1   :  { %v8_v0 = vld [vmem:[%s110_s0] sm:$0x3f]  ;;  %v9_v1 = vld [vmem:[%s110_s0 + $0x8] sm:$0x3f]  ;;  %v10_v2 = vld [vmem:[%s110_s0 + $0x10] sm:$0x3f] }
   0x2   :  { %36 = vtanh.f32 %v8_v0  ;;  %v11_v3 = vld [vmem:[%s110_s0 + $0x18] sm:$0x3f]  ;;  %v12_v4 = vld [vmem:[%s110_s0 + $0x20] sm:$0x3f]  ;;  %v13_v5 = vld [vmem:[%s110_s0 + $0x28] sm:$0x3f] }
   0x3   :  { %38 = vtanh.f32 %v9_v1  ;;  %v14_v6 = vld [vmem:[%s110_s0 + $0x30] sm:$0x3f]  ;;  %v15_v7 = vld [vmem:[%s110_s0 + $0x38] sm:$0x3f] }
   0x4   :  { %40 = vtanh.f32 %v10_v2 }
   0x5   :  { %42 = vtanh.f32 %v11_v3 }
   0x6   :  { %44 = vtanh.f32 %v12_v4 }
   0x7   :  { %46 = vtanh.f32 %v13_v5 }
   0x8   :  { %48 = vtanh.f32 %v14_v6 }
   0x9   :  { %50 = vtanh.f32 %v15_v7 }
   0xc   :  { %v37_v8 = vpop.eup %36 }
   0xd   :  { %v39_v9 = vpop.eup %38  ;;  %24 = vst [vmem:[%s111_s1] sm:$0x3f] %v37_v8 }
   0xe   :  { %v41_v10 = vpop.eup %40  ;;  %25 = vst [vmem:[%s111_s1 + $0x8] sm:$0x3f] %v39_v9 }
   0xf   :  { %v43_v11 = vpop.eup %42  ;;  %26 = vst [vmem:[%s111_s1 + $0x10] sm:$0x3f] %v41_v10 }
  0x10   :  { %v45_v12 = vpop.eup %44  ;;  %27 = vst [vmem:[%s111_s1 + $0x18] sm:$0x3f] %v43_v11 }
  0x11   :  { %v47_v13 = vpop.eup %46  ;;  %28 = vst [vmem:[%s111_s1 + $0x20] sm:$0x3f] %v45_v12 }
  0x12   :  { %v49_v14 = vpop.eup %48  ;;  %29 = vst [vmem:[%s111_s1 + $0x28] sm:$0x3f] %v47_v13 }
  0x13   :  { %v51_v15 = vpop.eup %50  ;;  %30 = vst [vmem:[%s111_s1 + $0x30] sm:$0x3f] %v49_v14 }
  0x14   :  { %31 = vst [vmem:[%s111_s1 + $0x38] sm:$0x3f] %v51_v15 }

</bundles_post_ra>
